<compile_context>
chip_gen: v7x
topology: tpu7x:2x2x1
jax: 0.10.0
libtpu: 0.0.40
codegen_flags: <defaults>
</compile_context>

<pallas_src>
import functools

import jax
import jax.numpy as jnp
from jax.experimental import pallas as pl
from jax.experimental.pallas import tpu as pltpu

C_PAD = 64                                        # lane-padded channel width
CIN_PAD = 8                                       # input channels padded to 8
_LAYER_DIMS = [(3, 64), (64, 64), (64, 32), (32, 3)]
_RELU_FLAGS = (True, True, True, False)           # last conv has no ReLU
_K_IN = (CIN_PAD, 64, 64, 32)                     # per-layer contraction width
_NUM_LAYERS = len(_LAYER_DIMS)


def _fused_unet_kernel(x_ref, w_ref, b_ref, o_ref, pad_ref, *, H, W):
    """One batch element: 4 fused 3x3 'same' convs, activations stay in VMEM.

    x_ref:   (1, H, W, CIN_PAD)          f32 NHWC input (channels padded to 8)
    w_ref:   (L, 9, C_PAD, C_PAD)        bf16 per-tap weights (zero padded)
    b_ref:   (L, 1, C_PAD)               f32 biases (zero padded)
    o_ref:   (1, H*W, C_PAD)             f32 output of the last conv
    pad_ref: (H+2, W+2, C_PAD)           f32 scratch: zero-padded activations
    """
    cin_pad = x_ref.shape[-1]
    f32 = jnp.float32

    # (Re)write the whole padded plane each step with three ALIGNED slab
    # stores (no masked partial stores, no separate memset pass):
    #   row 0 and row H+1  -> zero halo rows
    #   rows 1..H          -> [zero col | input lanes + zero lanes | zero col]
    # This also clears stale activation lanes left by the previous step and is
    # correct under megacore (not gated on program_id).
    zero_row = jnp.zeros((1, W + 2, C_PAD), f32)
    pad_ref[0:1, :, :] = zero_row
    pad_ref[H + 1:H + 2, :, :] = zero_row

    x_lanes = jnp.concatenate(
        [x_ref[0], jnp.zeros((H, W, C_PAD - cin_pad), f32)], axis=-1)
    zero_col = jnp.zeros((H, 1, C_PAD), f32)
    pad_ref[1:H + 1, :, :] = jnp.concatenate(
        [zero_col, x_lanes, zero_col], axis=1)

    for layer in range(_NUM_LAYERS):
        kin = _K_IN[layer]
        acc = jnp.zeros((H * W, C_PAD), f32)

        # 9 accumulated MXU matmuls (one per 3x3 tap). No im2col concat.
        for dh in range(3):
            for dw in range(3):
                win = pad_ref[dh:dh + H, dw:dw + W, 0:kin]        # (H, W, kin)
                acc += jnp.dot(
                    win.reshape(H * W, kin).astype(jnp.bfloat16),
                    w_ref[layer, dh * 3 + dw, 0:kin, :],          # (kin, C_PAD)
                    preferred_element_type=jnp.float32)

        acc = acc + b_ref[layer]                                  # f32 bias
        if _RELU_FLAGS[layer]:
            acc = jnp.maximum(acc, 0.0)

        if layer < _NUM_LAYERS - 1:
            # Write the activation back into the interior of the padded plane
            # (all C_PAD lanes written -> no stale lanes for the next layer).
            pad_ref[1:H + 1, 1:W + 1, :] = acc.reshape(H, W, C_PAD)
        else:
            o_ref[0] = acc.astype(o_ref.dtype)


def fused_unet_pallas(x_nhwc, w_stack, b_stack):
    """x_nhwc: (N, H, W, CIN_PAD) f32 -> (N, H*W, C_PAD) f32, one pallas_call."""
    N, H, W, cin_pad = x_nhwc.shape
    kern = functools.partial(_fused_unet_kernel, H=H, W=W)
    return pl.pallas_call(
        kern,
        out_shape=jax.ShapeDtypeStruct((N, H * W, C_PAD), jnp.float32),
        grid=(N,),
        in_specs=[
            pl.BlockSpec((1, H, W, cin_pad), lambda n: (n, 0, 0, 0)),
            pl.BlockSpec((_NUM_LAYERS, 9, C_PAD, C_PAD),
                         lambda n: (0, 0, 0, 0)),
            pl.BlockSpec((_NUM_LAYERS, 1, C_PAD), lambda n: (0, 0, 0)),
        ],
        out_specs=pl.BlockSpec((1, H * W, C_PAD), lambda n: (n, 0, 0)),
        scratch_shapes=[pltpu.VMEM((H + 2, W + 2, C_PAD), jnp.float32)],
        compiler_params=pltpu.CompilerParams(
            dimension_semantics=("parallel",)),
    )(x_nhwc, w_stack, b_stack)


# ------------------------- parameters & forward -----------------------------

def init_params(key):
    """Deterministic PyTorch-default-style init: U(-1/sqrt(fan_in), +bound)."""
    params = []
    for cin, cout in _LAYER_DIMS:
        key, kw, kb = jax.random.split(key, 3)
        bound = 1.0 / jnp.sqrt(jnp.float32(cin * 9))
        w = jax.random.uniform(kw, (3, 3, cin, cout), jnp.float32, -bound, bound)
        b = jax.random.uniform(kb, (cout,), jnp.float32, -bound, bound)
        params.append((w, b))
    return params


def pack_params(params):
    """Pack per-layer (3,3,cin,cout)/(cout,) params into the fused format:
    (L, 9, C_PAD, C_PAD) bf16 per-tap weights + (L, 1, C_PAD) f32 biases,
    zero padded in both channel dims (done once, outside the hot path)."""
    w_stack = jnp.zeros((_NUM_LAYERS, 9, C_PAD, C_PAD), jnp.float32)
    b_stack = jnp.zeros((_NUM_LAYERS, 1, C_PAD), jnp.float32)
    for l, (w, b) in enumerate(params):
        cin, cout = w.shape[2], w.shape[3]
        w_stack = w_stack.at[l, :, :cin, :cout].set(w.reshape(9, cin, cout))
        b_stack = b_stack.at[l, 0, :cout].set(b)
    return w_stack.astype(jnp.bfloat16), b_stack


@jax.jit
def simple_unet_forward(x_nchw, w_stack, b_stack):
    """Fused Pallas forward pass. Input/output are NCHW f32 (PyTorch layout)."""
    N, C, H, W = x_nchw.shape
    cout_final = _LAYER_DIMS[-1][1]
    x_nhwc = jnp.transpose(x_nchw, (0, 2, 3, 1))
    x_pad = jnp.pad(x_nhwc, ((0, 0), (0, 0), (0, 0), (0, CIN_PAD - C)))
    out = fused_unet_pallas(x_pad, w_stack, b_stack)         # (N, H*W, C_PAD)
    out = out[:, :, :cout_final].reshape(N, H, W, cout_final)
    return jnp.transpose(out, (0, 3, 1, 2))                  # NHWC -> NCHW


def reference_forward(x_nchw, params, *, bf16_mxu):
    """Pure-JAX reference (lax conv). bf16_mxu=True mirrors the kernel's
    precision path (bf16 MXU operands, f32 accumulation, f32 bias/ReLU)."""
    x = jnp.transpose(x_nchw, (0, 2, 3, 1))
    for (w, b), relu in zip(params, _RELU_FLAGS):
        lhs, rhs = x, w
        if bf16_mxu:
            lhs = lhs.astype(jnp.bfloat16)
            rhs = rhs.astype(jnp.bfloat16)
        x = jax.lax.conv_general_dilated(
            lhs, rhs, window_strides=(1, 1), padding="SAME",
            dimension_numbers=("NHWC", "HWIO", "NHWC"),
            preferred_element_type=jnp.float32) + b
        if relu:
            x = jnp.maximum(x, 0.0)
    return jnp.transpose(x, (0, 3, 1, 2))


if __name__ == "__main__":
    key = jax.random.PRNGKey(0)
    k_x, k_p = jax.random.split(key)

    # small NCHW input consistent with Conv2d(3, ...): batch=2, C=3, 16x16
    x = jax.random.normal(k_x, (2, 3, 16, 16), dtype=jnp.float32)
    params = init_params(k_p)
    w_stack, b_stack = pack_params(params)

    out = jax.block_until_ready(simple_unet_forward(x, w_stack, b_stack))
    assert out.shape == (2, 3, 16, 16), out.shape

    # Tight check against a precision-matched (bf16 MXU / f32 accum) reference.
    ref_bf16 = jax.block_until_ready(
        reference_forward(x, params, bf16_mxu=True))
    assert jnp.allclose(out, ref_bf16, rtol=2e-3, atol=2e-3), \
        "mismatch vs bf16-matched JAX reference"

    # Loose check against the pure-f32 module semantics.
    ref_f32 = jax.block_until_ready(
        reference_forward(x, params, bf16_mxu=False))
    assert jnp.allclose(out, ref_f32, rtol=5e-2, atol=5e-2), \
        "mismatch vs f32 JAX reference"

    print("KERNEL_OK")
</pallas_src>

<mosaic_0001>
module attributes {stable_mosaic.version = 11 : i64} {
  func.func @_fused_unet_kernel(%arg0: i32, %arg1: memref<1x16x16x8xf32, #tpu.memory_space<vmem>>, %arg2: memref<4x9x64x64xbf16, #tpu.memory_space<vmem>>, %arg3: memref<4x1x64xf32, #tpu.memory_space<vmem>>, %arg4: memref<1x256x64xf32, #tpu.memory_space<vmem>>, %arg5: memref<18x18x64xf32, #tpu.memory_space<vmem>>) attributes {dimension_semantics = [#tpu.dimension_semantics<parallel>], iteration_bounds = array<i64: 2>, scalar_prefetch = 0 : i64, scratch_operands = 1 : i64, tpu.core_type = #tpu.core_type<tc>, window_params = [{transform_indices = @transform_0, window_bounds = array<i64: 1, 16, 16, 8>}, {pipeline_mode = #tpu.pipeline_mode<synchronous>, transform_indices = @transform_1, window_bounds = array<i64: 4, 9, 64, 64>}, {pipeline_mode = #tpu.pipeline_mode<synchronous>, transform_indices = @transform_2, window_bounds = array<i64: 4, 1, 64>}, {transform_indices = @transform_3, window_bounds = array<i64: 1, 256, 64>}]} {
    %cst = arith.constant 0.000000e+00 : f32
    %0 = vector.broadcast %cst : f32 to vector<1x18x64xf32>
    %c0 = arith.constant 0 : index
    %c0_0 = arith.constant 0 : index
    %c0_1 = arith.constant 0 : index
    %1 = vector.load %arg5[%c0, %c0_0, %c0_1] : memref<18x18x64xf32, #tpu.memory_space<vmem>>, vector<1x18x64xf32>
    tpu.vector_store %arg5[%c0, %c0_0, %c0_1], %0 {strides = array<i32>} : memref<18x18x64xf32, #tpu.memory_space<vmem>>, vector<1x18x64xf32>,
    %c17 = arith.constant 17 : index
    %c0_2 = arith.constant 0 : index
    %c0_3 = arith.constant 0 : index
    %2 = vector.load %arg5[%c17, %c0_2, %c0_3] : memref<18x18x64xf32, #tpu.memory_space<vmem>>, vector<1x18x64xf32>
    tpu.vector_store %arg5[%c17, %c0_2, %c0_3], %0 {strides = array<i32>} : memref<18x18x64xf32, #tpu.memory_space<vmem>>, vector<1x18x64xf32>,
    %c0_4 = arith.constant 0 : index
    %c0_5 = arith.constant 0 : index
    %c0_6 = arith.constant 0 : index
    %c0_7 = arith.constant 0 : index
    %3 = vector.load %arg1[%c0_4, %c0_5, %c0_6, %c0_7] : memref<1x16x16x8xf32, #tpu.memory_space<vmem>>, vector<1x16x16x8xf32>
    %4 = vector.shape_cast %3 : vector<1x16x16x8xf32> to vector<16x16x8xf32>
    %cst_8 = arith.constant 0.000000e+00 : f32
    %5 = vector.broadcast %cst_8 : f32 to vector<16x16x56xf32>
    %6 = tpu.concatenate %4, %5 in 2 : vector<16x16x8xf32>, vector<16x16x56xf32> -> vector<16x16x64xf32>
    %cst_9 = arith.constant 0.000000e+00 : f32
    %7 = vector.broadcast %cst_9 : f32 to vector<16x1x64xf32>
    %8 = tpu.concatenate %7, %6, %7 in 1 : vector<16x1x64xf32>, vector<16x16x64xf32>, vector<16x1x64xf32> -> vector<16x18x64xf32>
    %c1 = arith.constant 1 : index
    %c0_10 = arith.constant 0 : index
    %c0_11 = arith.constant 0 : index
    %9 = vector.load %arg5[%c1, %c0_10, %c0_11] : memref<18x18x64xf32, #tpu.memory_space<vmem>>, vector<16x18x64xf32>
    tpu.vector_store %arg5[%c1, %c0_10, %c0_11], %8 {strides = array<i32>} : memref<18x18x64xf32, #tpu.memory_space<vmem>>, vector<16x18x64xf32>,
    %cst_12 = arith.constant 0.000000e+00 : f32
    %10 = vector.broadcast %cst_12 : f32 to vector<256x64xf32>
    %c0_13 = arith.constant 0 : index
    %c0_14 = arith.constant 0 : index
    %c0_15 = arith.constant 0 : index
    %11 = vector.load %arg5[%c0_13, %c0_14, %c0_15] : memref<18x18x64xf32, #tpu.memory_space<vmem>>, vector<16x16x8xf32>
    %12 = vector.shape_cast %11 : vector<16x16x8xf32> to vector<256x8xf32>
    %13 = arith.truncf %12 : vector<256x8xf32> to vector<256x8xbf16>
    %c0_16 = arith.constant 0 : index
    %c0_17 = arith.constant 0 : index
    %c0_18 = arith.constant 0 : index
    %c0_19 = arith.constant 0 : index
    %14 = vector.load %arg2[%c0_16, %c0_17, %c0_18, %c0_19] : memref<4x9x64x64xbf16, #tpu.memory_space<vmem>>, vector<1x1x8x64xbf16>
    %15 = vector.shape_cast %14 : vector<1x1x8x64xbf16> to vector<8x64xbf16>
    %cst_20 = arith.constant dense<0.000000e+00> : vector<256x64xf32>
    %16 = tpu.matmul %13, %15, %cst_20 {dimension_numbers = #tpu.dot_dimension_numbers<[1], [0], [0], [1], [0, 0, 1, 1], [], []>} : vector<256x8xbf16>, vector<8x64xbf16>, vector<256x64xf32> -> vector<256x64xf32>
    %17 = arith.addf %10, %16 : vector<256x64xf32>
    %c0_21 = arith.constant 0 : index
    %c1_22 = arith.constant 1 : index
    %c0_23 = arith.constant 0 : index
    %18 = vector.load %arg5[%c0_21, %c1_22, %c0_23] : memref<18x18x64xf32, #tpu.memory_space<vmem>>, vector<16x16x8xf32>
    %19 = vector.shape_cast %18 : vector<16x16x8xf32> to vector<256x8xf32>
    %20 = arith.truncf %19 : vector<256x8xf32> to vector<256x8xbf16>
    %c0_24 = arith.constant 0 : index
    %c1_25 = arith.constant 1 : index
    %c0_26 = arith.constant 0 : index
    %c0_27 = arith.constant 0 : index
    %21 = vector.load %arg2[%c0_24, %c1_25, %c0_26, %c0_27] : memref<4x9x64x64xbf16, #tpu.memory_space<vmem>>, vector<1x1x8x64xbf16>
    %22 = vector.shape_cast %21 : vector<1x1x8x64xbf16> to vector<8x64xbf16>
    %cst_28 = arith.constant dense<0.000000e+00> : vector<256x64xf32>
    %23 = tpu.matmul %20, %22, %cst_28 {dimension_numbers = #tpu.dot_dimension_numbers<[1], [0], [0], [1], [0, 0, 1, 1], [], []>} : vector<256x8xbf16>, vector<8x64xbf16>, vector<256x64xf32> -> vector<256x64xf32>
    %24 = arith.addf %17, %23 : vector<256x64xf32>
    %c0_29 = arith.constant 0 : index
    %c2 = arith.constant 2 : index
    %c0_30 = arith.constant 0 : index
    %25 = vector.load %arg5[%c0_29, %c2, %c0_30] : memref<18x18x64xf32, #tpu.memory_space<vmem>>, vector<16x16x8xf32>
    %26 = vector.shape_cast %25 : vector<16x16x8xf32> to vector<256x8xf32>
    %27 = arith.truncf %26 : vector<256x8xf32> to vector<256x8xbf16>
    %c0_31 = arith.constant 0 : index
    %c2_32 = arith.constant 2 : index
    %c0_33 = arith.constant 0 : index
    %c0_34 = arith.constant 0 : index
    %28 = vector.load %arg2[%c0_31, %c2_32, %c0_33, %c0_34] : memref<4x9x64x64xbf16, #tpu.memory_space<vmem>>, vector<1x1x8x64xbf16>
    %29 = vector.shape_cast %28 : vector<1x1x8x64xbf16> to vector<8x64xbf16>
    %cst_35 = arith.constant dense<0.000000e+00> : vector<256x64xf32>
    %30 = tpu.matmul %27, %29, %cst_35 {dimension_numbers = #tpu.dot_dimension_numbers<[1], [0], [0], [1], [0, 0, 1, 1], [], []>} : vector<256x8xbf16>, vector<8x64xbf16>, vector<256x64xf32> -> vector<256x64xf32>
    %31 = arith.addf %24, %30 : vector<256x64xf32>
    %c1_36 = arith.constant 1 : index
    %c0_37 = arith.constant 0 : index
    %c0_38 = arith.constant 0 : index
    %32 = vector.load %arg5[%c1_36, %c0_37, %c0_38] : memref<18x18x64xf32, #tpu.memory_space<vmem>>, vector<16x16x8xf32>
    %33 = vector.shape_cast %32 : vector<16x16x8xf32> to vector<256x8xf32>
    %34 = arith.truncf %33 : vector<256x8xf32> to vector<256x8xbf16>
    %c0_39 = arith.constant 0 : index
    %c3 = arith.constant 3 : index
    %c0_40 = arith.constant 0 : index
    %c0_41 = arith.constant 0 : index
    %35 = vector.load %arg2[%c0_39, %c3, %c0_40, %c0_41] : memref<4x9x64x64xbf16, #tpu.memory_space<vmem>>, vector<1x1x8x64xbf16>
    %36 = vector.shape_cast %35 : vector<1x1x8x64xbf16> to vector<8x64xbf16>
    %cst_42 = arith.constant dense<0.000000e+00> : vector<256x64xf32>
    %37 = tpu.matmul %34, %36, %cst_42 {dimension_numbers = #tpu.dot_dimension_numbers<[1], [0], [0], [1], [0, 0, 1, 1], [], []>} : vector<256x8xbf16>, vector<8x64xbf16>, vector<256x64xf32> -> vector<256x64xf32>
    %38 = arith.addf %31, %37 : vector<256x64xf32>
    %c1_43 = arith.constant 1 : index
    %c1_44 = arith.constant 1 : index
    %c0_45 = arith.constant 0 : index
    %39 = vector.load %arg5[%c1_43, %c1_44, %c0_45] : memref<18x18x64xf32, #tpu.memory_space<vmem>>, vector<16x16x8xf32>
    %40 = vector.shape_cast %39 : vector<16x16x8xf32> to vector<256x8xf32>
    %41 = arith.truncf %40 : vector<256x8xf32> to vector<256x8xbf16>
    %c0_46 = arith.constant 0 : index
    %c4 = arith.constant 4 : index
    %c0_47 = arith.constant 0 : index
    %c0_48 = arith.constant 0 : index
    %42 = vector.load %arg2[%c0_46, %c4, %c0_47, %c0_48] : memref<4x9x64x64xbf16, #tpu.memory_space<vmem>>, vector<1x1x8x64xbf16>
    %43 = vector.shape_cast %42 : vector<1x1x8x64xbf16> to vector<8x64xbf16>
    %cst_49 = arith.constant dense<0.000000e+00> : vector<256x64xf32>
    %44 = tpu.matmul %41, %43, %cst_49 {dimension_numbers = #tpu.dot_dimension_numbers<[1], [0], [0], [1], [0, 0, 1, 1], [], []>} : vector<256x8xbf16>, vector<8x64xbf16>, vector<256x64xf32> -> vector<256x64xf32>
    %45 = arith.addf %38, %44 : vector<256x64xf32>
    %c1_50 = arith.constant 1 : index
    %c2_51 = arith.constant 2 : index
    %c0_52 = arith.constant 0 : index
    %46 = vector.load %arg5[%c1_50, %c2_51, %c0_52] : memref<18x18x64xf32, #tpu.memory_space<vmem>>, vector<16x16x8xf32>
    %47 = vector.shape_cast %46 : vector<16x16x8xf32> to vector<256x8xf32>
    %48 = arith.truncf %47 : vector<256x8xf32> to vector<256x8xbf16>
    %c0_53 = arith.constant 0 : index
    %c5 = arith.constant 5 : index
    %c0_54 = arith.constant 0 : index
    %c0_55 = arith.constant 0 : index
    %49 = vector.load %arg2[%c0_53, %c5, %c0_54, %c0_55] : memref<4x9x64x64xbf16, #tpu.memory_space<vmem>>, vector<1x1x8x64xbf16>
    %50 = vector.shape_cast %49 : vector<1x1x8x64xbf16> to vector<8x64xbf16>
    %cst_56 = arith.constant dense<0.000000e+00> : vector<256x64xf32>
    %51 = tpu.matmul %48, %50, %cst_56 {dimension_numbers = #tpu.dot_dimension_numbers<[1], [0], [0], [1], [0, 0, 1, 1], [], []>} : vector<256x8xbf16>, vector<8x64xbf16>, vector<256x64xf32> -> vector<256x64xf32>
    %52 = arith.addf %45, %51 : vector<256x64xf32>
    %c2_57 = arith.constant 2 : index
    %c0_58 = arith.constant 0 : index
    %c0_59 = arith.constant 0 : index
    %53 = vector.load %arg5[%c2_57, %c0_58, %c0_59] : memref<18x18x64xf32, #tpu.memory_space<vmem>>, vector<16x16x8xf32>
    %54 = vector.shape_cast %53 : vector<16x16x8xf32> to vector<256x8xf32>
    %55 = arith.truncf %54 : vector<256x8xf32> to vector<256x8xbf16>
    %c0_60 = arith.constant 0 : index
    %c6 = arith.constant 6 : index
    %c0_61 = arith.constant 0 : index
    %c0_62 = arith.constant 0 : index
    %56 = vector.load %arg2[%c0_60, %c6, %c0_61, %c0_62] : memref<4x9x64x64xbf16, #tpu.memory_space<vmem>>, vector<1x1x8x64xbf16>
    %57 = vector.shape_cast %56 : vector<1x1x8x64xbf16> to vector<8x64xbf16>
    %cst_63 = arith.constant dense<0.000000e+00> : vector<256x64xf32>
    %58 = tpu.matmul %55, %57, %cst_63 {dimension_numbers = #tpu.dot_dimension_numbers<[1], [0], [0], [1], [0, 0, 1, 1], [], []>} : vector<256x8xbf16>, vector<8x64xbf16>, vector<256x64xf32> -> vector<256x64xf32>
    %59 = arith.addf %52, %58 : vector<256x64xf32>
    %c2_64 = arith.constant 2 : index
    %c1_65 = arith.constant 1 : index
    %c0_66 = arith.constant 0 : index
    %60 = vector.load %arg5[%c2_64, %c1_65, %c0_66] : memref<18x18x64xf32, #tpu.memory_space<vmem>>, vector<16x16x8xf32>
    %61 = vector.shape_cast %60 : vector<16x16x8xf32> to vector<256x8xf32>
    %62 = arith.truncf %61 : vector<256x8xf32> to vector<256x8xbf16>
    %c0_67 = arith.constant 0 : index
    %c7 = arith.constant 7 : index
    %c0_68 = arith.constant 0 : index
    %c0_69 = arith.constant 0 : index
    %63 = vector.load %arg2[%c0_67, %c7, %c0_68, %c0_69] : memref<4x9x64x64xbf16, #tpu.memory_space<vmem>>, vector<1x1x8x64xbf16>
    %64 = vector.shape_cast %63 : vector<1x1x8x64xbf16> to vector<8x64xbf16>
    %cst_70 = arith.constant dense<0.000000e+00> : vector<256x64xf32>
    %65 = tpu.matmul %62, %64, %cst_70 {dimension_numbers = #tpu.dot_dimension_numbers<[1], [0], [0], [1], [0, 0, 1, 1], [], []>} : vector<256x8xbf16>, vector<8x64xbf16>, vector<256x64xf32> -> vector<256x64xf32>
    %66 = arith.addf %59, %65 : vector<256x64xf32>
    %c2_71 = arith.constant 2 : index
    %c2_72 = arith.constant 2 : index
    %c0_73 = arith.constant 0 : index
    %67 = vector.load %arg5[%c2_71, %c2_72, %c0_73] : memref<18x18x64xf32, #tpu.memory_space<vmem>>, vector<16x16x8xf32>
    %68 = vector.shape_cast %67 : vector<16x16x8xf32> to vector<256x8xf32>
    %69 = arith.truncf %68 : vector<256x8xf32> to vector<256x8xbf16>
    %c0_74 = arith.constant 0 : index
    %c8 = arith.constant 8 : index
    %c0_75 = arith.constant 0 : index
    %c0_76 = arith.constant 0 : index
    %70 = vector.load %arg2[%c0_74, %c8, %c0_75, %c0_76] : memref<4x9x64x64xbf16, #tpu.memory_space<vmem>>, vector<1x1x8x64xbf16>
    %71 = vector.shape_cast %70 : vector<1x1x8x64xbf16> to vector<8x64xbf16>
    %cst_77 = arith.constant dense<0.000000e+00> : vector<256x64xf32>
    %72 = tpu.matmul %69, %71, %cst_77 {dimension_numbers = #tpu.dot_dimension_numbers<[1], [0], [0], [1], [0, 0, 1, 1], [], []>} : vector<256x8xbf16>, vector<8x64xbf16>, vector<256x64xf32> -> vector<256x64xf32>
    %73 = arith.addf %66, %72 : vector<256x64xf32>
    %c0_78 = arith.constant 0 : index
    %c0_79 = arith.constant 0 : index
    %c0_80 = arith.constant 0 : index
    %74 = vector.load %arg3[%c0_78, %c0_79, %c0_80] : memref<4x1x64xf32, #tpu.memory_space<vmem>>, vector<1x1x64xf32>
    %75 = vector.shape_cast %74 : vector<1x1x64xf32> to vector<1x64xf32>
    %76 = vector.broadcast %75 : vector<1x64xf32> to vector<256x64xf32>
    %77 = arith.addf %73, %76 : vector<256x64xf32>
    %cst_81 = arith.constant 0.000000e+00 : f32
    %78 = vector.broadcast %cst_81 : f32 to vector<256x64xf32>
    %79 = arith.maximumf %77, %78 : vector<256x64xf32>
    %80 = vector.shape_cast %79 : vector<256x64xf32> to vector<16x16x64xf32>
    %c1_82 = arith.constant 1 : index
    %c1_83 = arith.constant 1 : index
    %c0_84 = arith.constant 0 : index
    %81 = vector.load %arg5[%c1_82, %c1_83, %c0_84] : memref<18x18x64xf32, #tpu.memory_space<vmem>>, vector<16x16x64xf32>
    tpu.vector_store %arg5[%c1_82, %c1_83, %c0_84], %80 {strides = array<i32>} : memref<18x18x64xf32, #tpu.memory_space<vmem>>, vector<16x16x64xf32>,
    %cst_85 = arith.constant 0.000000e+00 : f32
    %82 = vector.broadcast %cst_85 : f32 to vector<256x64xf32>
    %c0_86 = arith.constant 0 : index
    %c0_87 = arith.constant 0 : index
    %c0_88 = arith.constant 0 : index
    %83 = vector.load %arg5[%c0_86, %c0_87, %c0_88] : memref<18x18x64xf32, #tpu.memory_space<vmem>>, vector<16x16x64xf32>
    %84 = vector.shape_cast %83 : vector<16x16x64xf32> to vector<256x64xf32>
    %85 = arith.truncf %84 : vector<256x64xf32> to vector<256x64xbf16>
    %c1_89 = arith.constant 1 : index
    %c0_90 = arith.constant 0 : index
    %c0_91 = arith.constant 0 : index
    %c0_92 = arith.constant 0 : index
    %86 = vector.load %arg2[%c1_89, %c0_90, %c0_91, %c0_92] : memref<4x9x64x64xbf16, #tpu.memory_space<vmem>>, vector<1x1x64x64xbf16>
    %87 = vector.shape_cast %86 : vector<1x1x64x64xbf16> to vector<64x64xbf16>
    %cst_93 = arith.constant dense<0.000000e+00> : vector<256x64xf32>
    %88 = tpu.matmul %85, %87, %cst_93 {dimension_numbers = #tpu.dot_dimension_numbers<[1], [0], [0], [1], [0, 0, 1, 1], [], []>} : vector<256x64xbf16>, vector<64x64xbf16>, vector<256x64xf32> -> vector<256x64xf32>
    %89 = arith.addf %82, %88 : vector<256x64xf32>
    %c0_94 = arith.constant 0 : index
    %c1_95 = arith.constant 1 : index
    %c0_96 = arith.constant 0 : index
    %90 = vector.load %arg5[%c0_94, %c1_95, %c0_96] : memref<18x18x64xf32, #tpu.memory_space<vmem>>, vector<16x16x64xf32>
    %91 = vector.shape_cast %90 : vector<16x16x64xf32> to vector<256x64xf32>
    %92 = arith.truncf %91 : vector<256x64xf32> to vector<256x64xbf16>
    %c1_97 = arith.constant 1 : index
    %c1_98 = arith.constant 1 : index
    %c0_99 = arith.constant 0 : index
    %c0_100 = arith.constant 0 : index
    %93 = vector.load %arg2[%c1_97, %c1_98, %c0_99, %c0_100] : memref<4x9x64x64xbf16, #tpu.memory_space<vmem>>, vector<1x1x64x64xbf16>
    %94 = vector.shape_cast %93 : vector<1x1x64x64xbf16> to vector<64x64xbf16>
    %cst_101 = arith.constant dense<0.000000e+00> : vector<256x64xf32>
    %95 = tpu.matmul %92, %94, %cst_101 {dimension_numbers = #tpu.dot_dimension_numbers<[1], [0], [0], [1], [0, 0, 1, 1], [], []>} : vector<256x64xbf16>, vector<64x64xbf16>, vector<256x64xf32> -> vector<256x64xf32>
    %96 = arith.addf %89, %95 : vector<256x64xf32>
    %c0_102 = arith.constant 0 : index
    %c2_103 = arith.constant 2 : index
    %c0_104 = arith.constant 0 : index
    %97 = vector.load %arg5[%c0_102, %c2_103, %c0_104] : memref<18x18x64xf32, #tpu.memory_space<vmem>>, vector<16x16x64xf32>
    %98 = vector.shape_cast %97 : vector<16x16x64xf32> to vector<256x64xf32>
    %99 = arith.truncf %98 : vector<256x64xf32> to vector<256x64xbf16>
    %c1_105 = arith.constant 1 : index
    %c2_106 = arith.constant 2 : index
    %c0_107 = arith.constant 0 : index
    %c0_108 = arith.constant 0 : index
    %100 = vector.load %arg2[%c1_105, %c2_106, %c0_107, %c0_108] : memref<4x9x64x64xbf16, #tpu.memory_space<vmem>>, vector<1x1x64x64xbf16>
    %101 = vector.shape_cast %100 : vector<1x1x64x64xbf16> to vector<64x64xbf16>
    %cst_109 = arith.constant dense<0.000000e+00> : vector<256x64xf32>
    %102 = tpu.matmul %99, %101, %cst_109 {dimension_numbers = #tpu.dot_dimension_numbers<[1], [0], [0], [1], [0, 0, 1, 1], [], []>} : vector<256x64xbf16>, vector<64x64xbf16>, vector<256x64xf32> -> vector<256x64xf32>
    %103 = arith.addf %96, %102 : vector<256x64xf32>
    %c1_110 = arith.constant 1 : index
    %c0_111 = arith.constant 0 : index
    %c0_112 = arith.constant 0 : index
    %104 = vector.load %arg5[%c1_110, %c0_111, %c0_112] : memref<18x18x64xf32, #tpu.memory_space<vmem>>, vector<16x16x64xf32>
    %105 = vector.shape_cast %104 : vector<16x16x64xf32> to vector<256x64xf32>
    %106 = arith.truncf %105 : vector<256x64xf32> to vector<256x64xbf16>
    %c1_113 = arith.constant 1 : index
    %c3_114 = arith.constant 3 : index
    %c0_115 = arith.constant 0 : index
    %c0_116 = arith.constant 0 : index
    %107 = vector.load %arg2[%c1_113, %c3_114, %c0_115, %c0_116] : memref<4x9x64x64xbf16, #tpu.memory_space<vmem>>, vector<1x1x64x64xbf16>
    %108 = vector.shape_cast %107 : vector<1x1x64x64xbf16> to vector<64x64xbf16>
    %cst_117 = arith.constant dense<0.000000e+00> : vector<256x64xf32>
    %109 = tpu.matmul %106, %108, %cst_117 {dimension_numbers = #tpu.dot_dimension_numbers<[1], [0], [0], [1], [0, 0, 1, 1], [], []>} : vector<256x64xbf16>, vector<64x64xbf16>, vector<256x64xf32> -> vector<256x64xf32>
    %110 = arith.addf %103, %109 : vector<256x64xf32>
    %c1_118 = arith.constant 1 : index
    %c1_119 = arith.constant 1 : index
    %c0_120 = arith.constant 0 : index
    %111 = vector.load %arg5[%c1_118, %c1_119, %c0_120] : memref<18x18x64xf32, #tpu.memory_space<vmem>>, vector<16x16x64xf32>
    %112 = vector.shape_cast %111 : vector<16x16x64xf32> to vector<256x64xf32>
    %113 = arith.truncf %112 : vector<256x64xf32> to vector<256x64xbf16>
    %c1_121 = arith.constant 1 : index
    %c4_122 = arith.constant 4 : index
    %c0_123 = arith.constant 0 : index
    %c0_124 = arith.constant 0 : index
    %114 = vector.load %arg2[%c1_121, %c4_122, %c0_123, %c0_124] : memref<4x9x64x64xbf16, #tpu.memory_space<vmem>>, vector<1x1x64x64xbf16>
    %115 = vector.shape_cast %114 : vector<1x1x64x64xbf16> to vector<64x64xbf16>
    %cst_125 = arith.constant dense<0.000000e+00> : vector<256x64xf32>
    %116 = tpu.matmul %113, %115, %cst_125 {dimension_numbers = #tpu.dot_dimension_numbers<[1], [0], [0], [1], [0, 0, 1, 1], [], []>} : vector<256x64xbf16>, vector<64x64xbf16>, vector<256x64xf32> -> vector<256x64xf32>
    %117 = arith.addf %110, %116 : vector<256x64xf32>
    %c1_126 = arith.constant 1 : index
    %c2_127 = arith.constant 2 : index
    %c0_128 = arith.constant 0 : index
    %118 = vector.load %arg5[%c1_126, %c2_127, %c0_128] : memref<18x18x64xf32, #tpu.memory_space<vmem>>, vector<16x16x64xf32>
    %119 = vector.shape_cast %118 : vector<16x16x64xf32> to vector<256x64xf32>
    %120 = arith.truncf %119 : vector<256x64xf32> to vector<256x64xbf16>
    %c1_129 = arith.constant 1 : index
    %c5_130 = arith.constant 5 : index
    %c0_131 = arith.constant 0 : index
    %c0_132 = arith.constant 0 : index
    %121 = vector.load %arg2[%c1_129, %c5_130, %c0_131, %c0_132] : memref<4x9x64x64xbf16, #tpu.memory_space<vmem>>, vector<1x1x64x64xbf16>
    %122 = vector.shape_cast %121 : vector<1x1x64x64xbf16> to vector<64x64xbf16>
    %cst_133 = arith.constant dense<0.000000e+00> : vector<256x64xf32>
    %123 = tpu.matmul %120, %122, %cst_133 {dimension_numbers = #tpu.dot_dimension_numbers<[1], [0], [0], [1], [0, 0, 1, 1], [], []>} : vector<256x64xbf16>, vector<64x64xbf16>, vector<256x64xf32> -> vector<256x64xf32>
    %124 = arith.addf %117, %123 : vector<256x64xf32>
    %c2_134 = arith.constant 2 : index
    %c0_135 = arith.constant 0 : index
    %c0_136 = arith.constant 0 : index
    %125 = vector.load %arg5[%c2_134, %c0_135, %c0_136] : memref<18x18x64xf32, #tpu.memory_space<vmem>>, vector<16x16x64xf32>
    %126 = vector.shape_cast %125 : vector<16x16x64xf32> to vector<256x64xf32>
    %127 = arith.truncf %126 : vector<256x64xf32> to vector<256x64xbf16>
    %c1_137 = arith.constant 1 : index
    %c6_138 = arith.constant 6 : index
    %c0_139 = arith.constant 0 : index
    %c0_140 = arith.constant 0 : index
    %128 = vector.load %arg2[%c1_137, %c6_138, %c0_139, %c0_140] : memref<4x9x64x64xbf16, #tpu.memory_space<vmem>>, vector<1x1x64x64xbf16>
    %129 = vector.shape_cast %128 : vector<1x1x64x64xbf16> to vector<64x64xbf16>
    %cst_141 = arith.constant dense<0.000000e+00> : vector<256x64xf32>
    %130 = tpu.matmul %127, %129, %cst_141 {dimension_numbers = #tpu.dot_dimension_numbers<[1], [0], [0], [1], [0, 0, 1, 1], [], []>} : vector<256x64xbf16>, vector<64x64xbf16>, vector<256x64xf32> -> vector<256x64xf32>
    %131 = arith.addf %124, %130 : vector<256x64xf32>
    %c2_142 = arith.constant 2 : index
    %c1_143 = arith.constant 1 : index
    %c0_144 = arith.constant 0 : index
    %132 = vector.load %arg5[%c2_142, %c1_143, %c0_144] : memref<18x18x64xf32, #tpu.memory_space<vmem>>, vector<16x16x64xf32>
    %133 = vector.shape_cast %132 : vector<16x16x64xf32> to vector<256x64xf32>
    %134 = arith.truncf %133 : vector<256x64xf32> to vector<256x64xbf16>
    %c1_145 = arith.constant 1 : index
    %c7_146 = arith.constant 7 : index
    %c0_147 = arith.constant 0 : index
    %c0_148 = arith.constant 0 : index
    %135 = vector.load %arg2[%c1_145, %c7_146, %c0_147, %c0_148] : memref<4x9x64x64xbf16, #tpu.memory_space<vmem>>, vector<1x1x64x64xbf16>
    %136 = vector.shape_cast %135 : vector<1x1x64x64xbf16> to vector<64x64xbf16>
    %cst_149 = arith.constant dense<0.000000e+00> : vector<256x64xf32>
    %137 = tpu.matmul %134, %136, %cst_149 {dimension_numbers = #tpu.dot_dimension_numbers<[1], [0], [0], [1], [0, 0, 1, 1], [], []>} : vector<256x64xbf16>, vector<64x64xbf16>, vector<256x64xf32> -> vector<256x64xf32>
    %138 = arith.addf %131, %137 : vector<256x64xf32>
    %c2_150 = arith.constant 2 : index
    %c2_151 = arith.constant 2 : index
    %c0_152 = arith.constant 0 : index
    %139 = vector.load %arg5[%c2_150, %c2_151, %c0_152] : memref<18x18x64xf32, #tpu.memory_space<vmem>>, vector<16x16x64xf32>
    %140 = vector.shape_cast %139 : vector<16x16x64xf32> to vector<256x64xf32>
    %141 = arith.truncf %140 : vector<256x64xf32> to vector<256x64xbf16>
    %c1_153 = arith.constant 1 : index
    %c8_154 = arith.constant 8 : index
    %c0_155 = arith.constant 0 : index
    %c0_156 = arith.constant 0 : index
    %142 = vector.load %arg2[%c1_153, %c8_154, %c0_155, %c0_156] : memref<4x9x64x64xbf16, #tpu.memory_space<vmem>>, vector<1x1x64x64xbf16>
    %143 = vector.shape_cast %142 : vector<1x1x64x64xbf16> to vector<64x64xbf16>
    %cst_157 = arith.constant dense<0.000000e+00> : vector<256x64xf32>
    %144 = tpu.matmul %141, %143, %cst_157 {dimension_numbers = #tpu.dot_dimension_numbers<[1], [0], [0], [1], [0, 0, 1, 1], [], []>} : vector<256x64xbf16>, vector<64x64xbf16>, vector<256x64xf32> -> vector<256x64xf32>
    %145 = arith.addf %138, %144 : vector<256x64xf32>
    %c1_158 = arith.constant 1 : index
    %c0_159 = arith.constant 0 : index
    %c0_160 = arith.constant 0 : index
    %146 = vector.load %arg3[%c1_158, %c0_159, %c0_160] : memref<4x1x64xf32, #tpu.memory_space<vmem>>, vector<1x1x64xf32>
    %147 = vector.shape_cast %146 : vector<1x1x64xf32> to vector<1x64xf32>
    %148 = vector.broadcast %147 : vector<1x64xf32> to vector<256x64xf32>
    %149 = arith.addf %145, %148 : vector<256x64xf32>
    %cst_161 = arith.constant 0.000000e+00 : f32
    %150 = vector.broadcast %cst_161 : f32 to vector<256x64xf32>
    %151 = arith.maximumf %149, %150 : vector<256x64xf32>
    %152 = vector.shape_cast %151 : vector<256x64xf32> to vector<16x16x64xf32>
    %c1_162 = arith.constant 1 : index
    %c1_163 = arith.constant 1 : index
    %c0_164 = arith.constant 0 : index
    %153 = vector.load %arg5[%c1_162, %c1_163, %c0_164] : memref<18x18x64xf32, #tpu.memory_space<vmem>>, vector<16x16x64xf32>
    tpu.vector_store %arg5[%c1_162, %c1_163, %c0_164], %152 {strides = array<i32>} : memref<18x18x64xf32, #tpu.memory_space<vmem>>, vector<16x16x64xf32>,
    %cst_165 = arith.constant 0.000000e+00 : f32
    %154 = vector.broadcast %cst_165 : f32 to vector<256x64xf32>
    %c0_166 = arith.constant 0 : index
    %c0_167 = arith.constant 0 : index
    %c0_168 = arith.constant 0 : index
    %155 = vector.load %arg5[%c0_166, %c0_167, %c0_168] : memref<18x18x64xf32, #tpu.memory_space<vmem>>, vector<16x16x64xf32>
    %156 = vector.shape_cast %155 : vector<16x16x64xf32> to vector<256x64xf32>
    %157 = arith.truncf %156 : vector<256x64xf32> to vector<256x64xbf16>
    %c2_169 = arith.constant 2 : index
    %c0_170 = arith.constant 0 : index
    %c0_171 = arith.constant 0 : index
    %c0_172 = arith.constant 0 : index
    %158 = vector.load %arg2[%c2_169, %c0_170, %c0_171, %c0_172] : memref<4x9x64x64xbf16, #tpu.memory_space<vmem>>, vector<1x1x64x64xbf16>
    %159 = vector.shape_cast %158 : vector<1x1x64x64xbf16> to vector<64x64xbf16>
    %cst_173 = arith.constant dense<0.000000e+00> : vector<256x64xf32>
    %160 = tpu.matmul %157, %159, %cst_173 {dimension_numbers = #tpu.dot_dimension_numbers<[1], [0], [0], [1], [0, 0, 1, 1], [], []>} : vector<256x64xbf16>, vector<64x64xbf16>, vector<256x64xf32> -> vector<256x64xf32>
    %161 = arith.addf %154, %160 : vector<256x64xf32>
    %c0_174 = arith.constant 0 : index
    %c1_175 = arith.constant 1 : index
    %c0_176 = arith.constant 0 : index
    %162 = vector.load %arg5[%c0_174, %c1_175, %c0_176] : memref<18x18x64xf32, #tpu.memory_space<vmem>>, vector<16x16x64xf32>
    %163 = vector.shape_cast %162 : vector<16x16x64xf32> to vector<256x64xf32>
    %164 = arith.truncf %163 : vector<256x64xf32> to vector<256x64xbf16>
    %c2_177 = arith.constant 2 : index
    %c1_178 = arith.constant 1 : index
    %c0_179 = arith.constant 0 : index
    %c0_180 = arith.constant 0 : index
    %165 = vector.load %arg2[%c2_177, %c1_178, %c0_179, %c0_180] : memref<4x9x64x64xbf16, #tpu.memory_space<vmem>>, vector<1x1x64x64xbf16>
    %166 = vector.shape_cast %165 : vector<1x1x64x64xbf16> to vector<64x64xbf16>
    %cst_181 = arith.constant dense<0.000000e+00> : vector<256x64xf32>
    %167 = tpu.matmul %164, %166, %cst_181 {dimension_numbers = #tpu.dot_dimension_numbers<[1], [0], [0], [1], [0, 0, 1, 1], [], []>} : vector<256x64xbf16>, vector<64x64xbf16>, vector<256x64xf32> -> vector<256x64xf32>
    %168 = arith.addf %161, %167 : vector<256x64xf32>
    %c0_182 = arith.constant 0 : index
    %c2_183 = arith.constant 2 : index
    %c0_184 = arith.constant 0 : index
    %169 = vector.load %arg5[%c0_182, %c2_183, %c0_184] : memref<18x18x64xf32, #tpu.memory_space<vmem>>, vector<16x16x64xf32>
    %170 = vector.shape_cast %169 : vector<16x16x64xf32> to vector<256x64xf32>
    %171 = arith.truncf %170 : vector<256x64xf32> to vector<256x64xbf16>
    %c2_185 = arith.constant 2 : index
    %c2_186 = arith.constant 2 : index
    %c0_187 = arith.constant 0 : index
    %c0_188 = arith.constant 0 : index
    %172 = vector.load %arg2[%c2_185, %c2_186, %c0_187, %c0_188] : memref<4x9x64x64xbf16, #tpu.memory_space<vmem>>, vector<1x1x64x64xbf16>
    %173 = vector.shape_cast %172 : vector<1x1x64x64xbf16> to vector<64x64xbf16>
    %cst_189 = arith.constant dense<0.000000e+00> : vector<256x64xf32>
    %174 = tpu.matmul %171, %173, %cst_189 {dimension_numbers = #tpu.dot_dimension_numbers<[1], [0], [0], [1], [0, 0, 1, 1], [], []>} : vector<256x64xbf16>, vector<64x64xbf16>, vector<256x64xf32> -> vector<256x64xf32>
    %175 = arith.addf %168, %174 : vector<256x64xf32>
    %c1_190 = arith.constant 1 : index
    %c0_191 = arith.constant 0 : index
    %c0_192 = arith.constant 0 : index
    %176 = vector.load %arg5[%c1_190, %c0_191, %c0_192] : memref<18x18x64xf32, #tpu.memory_space<vmem>>, vector<16x16x64xf32>
    %177 = vector.shape_cast %176 : vector<16x16x64xf32> to vector<256x64xf32>
    %178 = arith.truncf %177 : vector<256x64xf32> to vector<256x64xbf16>
    %c2_193 = arith.constant 2 : index
    %c3_194 = arith.constant 3 : index
    %c0_195 = arith.constant 0 : index
    %c0_196 = arith.constant 0 : index
    %179 = vector.load %arg2[%c2_193, %c3_194, %c0_195, %c0_196] : memref<4x9x64x64xbf16, #tpu.memory_space<vmem>>, vector<1x1x64x64xbf16>
    %180 = vector.shape_cast %179 : vector<1x1x64x64xbf16> to vector<64x64xbf16>
    %cst_197 = arith.constant dense<0.000000e+00> : vector<256x64xf32>
    %181 = tpu.matmul %178, %180, %cst_197 {dimension_numbers = #tpu.dot_dimension_numbers<[1], [0], [0], [1], [0, 0, 1, 1], [], []>} : vector<256x64xbf16>, vector<64x64xbf16>, vector<256x64xf32> -> vector<256x64xf32>
    %182 = arith.addf %175, %181 : vector<256x64xf32>
    %c1_198 = arith.constant 1 : index
    %c1_199 = arith.constant 1 : index
    %c0_200 = arith.constant 0 : index
    %183 = vector.load %arg5[%c1_198, %c1_199, %c0_200] : memref<18x18x64xf32, #tpu.memory_space<vmem>>, vector<16x16x64xf32>
    %184 = vector.shape_cast %183 : vector<16x16x64xf32> to vector<256x64xf32>
    %185 = arith.truncf %184 : vector<256x64xf32> to vector<256x64xbf16>
    %c2_201 = arith.constant 2 : index
    %c4_202 = arith.constant 4 : index
    %c0_203 = arith.constant 0 : index
    %c0_204 = arith.constant 0 : index
    %186 = vector.load %arg2[%c2_201, %c4_202, %c0_203, %c0_204] : memref<4x9x64x64xbf16, #tpu.memory_space<vmem>>, vector<1x1x64x64xbf16>
    %187 = vector.shape_cast %186 : vector<1x1x64x64xbf16> to vector<64x64xbf16>
    %cst_205 = arith.constant dense<0.000000e+00> : vector<256x64xf32>
    %188 = tpu.matmul %185, %187, %cst_205 {dimension_numbers = #tpu.dot_dimension_numbers<[1], [0], [0], [1], [0, 0, 1, 1], [], []>} : vector<256x64xbf16>, vector<64x64xbf16>, vector<256x64xf32> -> vector<256x64xf32>
    %189 = arith.addf %182, %188 : vector<256x64xf32>
    %c1_206 = arith.constant 1 : index
    %c2_207 = arith.constant 2 : index
    %c0_208 = arith.constant 0 : index
    %190 = vector.load %arg5[%c1_206, %c2_207, %c0_208] : memref<18x18x64xf32, #tpu.memory_space<vmem>>, vector<16x16x64xf32>
    %191 = vector.shape_cast %190 : vector<16x16x64xf32> to vector<256x64xf32>
    %192 = arith.truncf %191 : vector<256x64xf32> to vector<256x64xbf16>
    %c2_209 = arith.constant 2 : index
    %c5_210 = arith.constant 5 : index
    %c0_211 = arith.constant 0 : index
    %c0_212 = arith.constant 0 : index
    %193 = vector.load %arg2[%c2_209, %c5_210, %c0_211, %c0_212] : memref<4x9x64x64xbf16, #tpu.memory_space<vmem>>, vector<1x1x64x64xbf16>
    %194 = vector.shape_cast %193 : vector<1x1x64x64xbf16> to vector<64x64xbf16>
    %cst_213 = arith.constant dense<0.000000e+00> : vector<256x64xf32>
    %195 = tpu.matmul %192, %194, %cst_213 {dimension_numbers = #tpu.dot_dimension_numbers<[1], [0], [0], [1], [0, 0, 1, 1], [], []>} : vector<256x64xbf16>, vector<64x64xbf16>, vector<256x64xf32> -> vector<256x64xf32>
    %196 = arith.addf %189, %195 : vector<256x64xf32>
    %c2_214 = arith.constant 2 : index
    %c0_215 = arith.constant 0 : index
    %c0_216 = arith.constant 0 : index
    %197 = vector.load %arg5[%c2_214, %c0_215, %c0_216] : memref<18x18x64xf32, #tpu.memory_space<vmem>>, vector<16x16x64xf32>
    %198 = vector.shape_cast %197 : vector<16x16x64xf32> to vector<256x64xf32>
    %199 = arith.truncf %198 : vector<256x64xf32> to vector<256x64xbf16>
    %c2_217 = arith.constant 2 : index
    %c6_218 = arith.constant 6 : index
    %c0_219 = arith.constant 0 : index
    %c0_220 = arith.constant 0 : index
    %200 = vector.load %arg2[%c2_217, %c6_218, %c0_219, %c0_220] : memref<4x9x64x64xbf16, #tpu.memory_space<vmem>>, vector<1x1x64x64xbf16>
    %201 = vector.shape_cast %200 : vector<1x1x64x64xbf16> to vector<64x64xbf16>
    %cst_221 = arith.constant dense<0.000000e+00> : vector<256x64xf32>
    %202 = tpu.matmul %199, %201, %cst_221 {dimension_numbers = #tpu.dot_dimension_numbers<[1], [0], [0], [1], [0, 0, 1, 1], [], []>} : vector<256x64xbf16>, vector<64x64xbf16>, vector<256x64xf32> -> vector<256x64xf32>
    %203 = arith.addf %196, %202 : vector<256x64xf32>
    %c2_222 = arith.constant 2 : index
    %c1_223 = arith.constant 1 : index
    %c0_224 = arith.constant 0 : index
    %204 = vector.load %arg5[%c2_222, %c1_223, %c0_224] : memref<18x18x64xf32, #tpu.memory_space<vmem>>, vector<16x16x64xf32>
    %205 = vector.shape_cast %204 : vector<16x16x64xf32> to vector<256x64xf32>
    %206 = arith.truncf %205 : vector<256x64xf32> to vector<256x64xbf16>
    %c2_225 = arith.constant 2 : index
    %c7_226 = arith.constant 7 : index
    %c0_227 = arith.constant 0 : index
    %c0_228 = arith.constant 0 : index
    %207 = vector.load %arg2[%c2_225, %c7_226, %c0_227, %c0_228] : memref<4x9x64x64xbf16, #tpu.memory_space<vmem>>, vector<1x1x64x64xbf16>
    %208 = vector.shape_cast %207 : vector<1x1x64x64xbf16> to vector<64x64xbf16>
    %cst_229 = arith.constant dense<0.000000e+00> : vector<256x64xf32>
    %209 = tpu.matmul %206, %208, %cst_229 {dimension_numbers = #tpu.dot_dimension_numbers<[1], [0], [0], [1], [0, 0, 1, 1], [], []>} : vector<256x64xbf16>, vector<64x64xbf16>, vector<256x64xf32> -> vector<256x64xf32>
    %210 = arith.addf %203, %209 : vector<256x64xf32>
    %c2_230 = arith.constant 2 : index
    %c2_231 = arith.constant 2 : index
    %c0_232 = arith.constant 0 : index
    %211 = vector.load %arg5[%c2_230, %c2_231, %c0_232] : memref<18x18x64xf32, #tpu.memory_space<vmem>>, vector<16x16x64xf32>
    %212 = vector.shape_cast %211 : vector<16x16x64xf32> to vector<256x64xf32>
    %213 = arith.truncf %212 : vector<256x64xf32> to vector<256x64xbf16>
    %c2_233 = arith.constant 2 : index
    %c8_234 = arith.constant 8 : index
    %c0_235 = arith.constant 0 : index
    %c0_236 = arith.constant 0 : index
    %214 = vector.load %arg2[%c2_233, %c8_234, %c0_235, %c0_236] : memref<4x9x64x64xbf16, #tpu.memory_space<vmem>>, vector<1x1x64x64xbf16>
    %215 = vector.shape_cast %214 : vector<1x1x64x64xbf16> to vector<64x64xbf16>
    %cst_237 = arith.constant dense<0.000000e+00> : vector<256x64xf32>
    %216 = tpu.matmul %213, %215, %cst_237 {dimension_numbers = #tpu.dot_dimension_numbers<[1], [0], [0], [1], [0, 0, 1, 1], [], []>} : vector<256x64xbf16>, vector<64x64xbf16>, vector<256x64xf32> -> vector<256x64xf32>
    %217 = arith.addf %210, %216 : vector<256x64xf32>
    %c2_238 = arith.constant 2 : index
    %c0_239 = arith.constant 0 : index
    %c0_240 = arith.constant 0 : index
    %218 = vector.load %arg3[%c2_238, %c0_239, %c0_240] : memref<4x1x64xf32, #tpu.memory_space<vmem>>, vector<1x1x64xf32>
    %219 = vector.shape_cast %218 : vector<1x1x64xf32> to vector<1x64xf32>
    %220 = vector.broadcast %219 : vector<1x64xf32> to vector<256x64xf32>
    %221 = arith.addf %217, %220 : vector<256x64xf32>
    %cst_241 = arith.constant 0.000000e+00 : f32
    %222 = vector.broadcast %cst_241 : f32 to vector<256x64xf32>
    %223 = arith.maximumf %221, %222 : vector<256x64xf32>
    %224 = vector.shape_cast %223 : vector<256x64xf32> to vector<16x16x64xf32>
    %c1_242 = arith.constant 1 : index
    %c1_243 = arith.constant 1 : index
    %c0_244 = arith.constant 0 : index
    %225 = vector.load %arg5[%c1_242, %c1_243, %c0_244] : memref<18x18x64xf32, #tpu.memory_space<vmem>>, vector<16x16x64xf32>
    tpu.vector_store %arg5[%c1_242, %c1_243, %c0_244], %224 {strides = array<i32>} : memref<18x18x64xf32, #tpu.memory_space<vmem>>, vector<16x16x64xf32>,
    %cst_245 = arith.constant 0.000000e+00 : f32
    %226 = vector.broadcast %cst_245 : f32 to vector<256x64xf32>
    %c0_246 = arith.constant 0 : index
    %c0_247 = arith.constant 0 : index
    %c0_248 = arith.constant 0 : index
    %227 = vector.load %arg5[%c0_246, %c0_247, %c0_248] : memref<18x18x64xf32, #tpu.memory_space<vmem>>, vector<16x16x32xf32>
    %228 = vector.shape_cast %227 : vector<16x16x32xf32> to vector<256x32xf32>
    %229 = arith.truncf %228 : vector<256x32xf32> to vector<256x32xbf16>
    %c3_249 = arith.constant 3 : index
    %c0_250 = arith.constant 0 : index
    %c0_251 = arith.constant 0 : index
    %c0_252 = arith.constant 0 : index
    %230 = vector.load %arg2[%c3_249, %c0_250, %c0_251, %c0_252] : memref<4x9x64x64xbf16, #tpu.memory_space<vmem>>, vector<1x1x32x64xbf16>
    %231 = vector.shape_cast %230 : vector<1x1x32x64xbf16> to vector<32x64xbf16>
    %cst_253 = arith.constant dense<0.000000e+00> : vector<256x64xf32>
    %232 = tpu.matmul %229, %231, %cst_253 {dimension_numbers = #tpu.dot_dimension_numbers<[1], [0], [0], [1], [0, 0, 1, 1], [], []>} : vector<256x32xbf16>, vector<32x64xbf16>, vector<256x64xf32> -> vector<256x64xf32>
    %233 = arith.addf %226, %232 : vector<256x64xf32>
    %c0_254 = arith.constant 0 : index
    %c1_255 = arith.constant 1 : index
    %c0_256 = arith.constant 0 : index
    %234 = vector.load %arg5[%c0_254, %c1_255, %c0_256] : memref<18x18x64xf32, #tpu.memory_space<vmem>>, vector<16x16x32xf32>
    %235 = vector.shape_cast %234 : vector<16x16x32xf32> to vector<256x32xf32>
    %236 = arith.truncf %235 : vector<256x32xf32> to vector<256x32xbf16>
    %c3_257 = arith.constant 3 : index
    %c1_258 = arith.constant 1 : index
    %c0_259 = arith.constant 0 : index
    %c0_260 = arith.constant 0 : index
    %237 = vector.load %arg2[%c3_257, %c1_258, %c0_259, %c0_260] : memref<4x9x64x64xbf16, #tpu.memory_space<vmem>>, vector<1x1x32x64xbf16>
    %238 = vector.shape_cast %237 : vector<1x1x32x64xbf16> to vector<32x64xbf16>
    %cst_261 = arith.constant dense<0.000000e+00> : vector<256x64xf32>
    %239 = tpu.matmul %236, %238, %cst_261 {dimension_numbers = #tpu.dot_dimension_numbers<[1], [0], [0], [1], [0, 0, 1, 1], [], []>} : vector<256x32xbf16>, vector<32x64xbf16>, vector<256x64xf32> -> vector<256x64xf32>
    %240 = arith.addf %233, %239 : vector<256x64xf32>
    %c0_262 = arith.constant 0 : index
    %c2_263 = arith.constant 2 : index
    %c0_264 = arith.constant 0 : index
    %241 = vector.load %arg5[%c0_262, %c2_263, %c0_264] : memref<18x18x64xf32, #tpu.memory_space<vmem>>, vector<16x16x32xf32>
    %242 = vector.shape_cast %241 : vector<16x16x32xf32> to vector<256x32xf32>
    %243 = arith.truncf %242 : vector<256x32xf32> to vector<256x32xbf16>
    %c3_265 = arith.constant 3 : index
    %c2_266 = arith.constant 2 : index
    %c0_267 = arith.constant 0 : index
    %c0_268 = arith.constant 0 : index
    %244 = vector.load %arg2[%c3_265, %c2_266, %c0_267, %c0_268] : memref<4x9x64x64xbf16, #tpu.memory_space<vmem>>, vector<1x1x32x64xbf16>
    %245 = vector.shape_cast %244 : vector<1x1x32x64xbf16> to vector<32x64xbf16>
    %cst_269 = arith.constant dense<0.000000e+00> : vector<256x64xf32>
    %246 = tpu.matmul %243, %245, %cst_269 {dimension_numbers = #tpu.dot_dimension_numbers<[1], [0], [0], [1], [0, 0, 1, 1], [], []>} : vector<256x32xbf16>, vector<32x64xbf16>, vector<256x64xf32> -> vector<256x64xf32>
    %247 = arith.addf %240, %246 : vector<256x64xf32>
    %c1_270 = arith.constant 1 : index
    %c0_271 = arith.constant 0 : index
    %c0_272 = arith.constant 0 : index
    %248 = vector.load %arg5[%c1_270, %c0_271, %c0_272] : memref<18x18x64xf32, #tpu.memory_space<vmem>>, vector<16x16x32xf32>
    %249 = vector.shape_cast %248 : vector<16x16x32xf32> to vector<256x32xf32>
    %250 = arith.truncf %249 : vector<256x32xf32> to vector<256x32xbf16>
    %c3_273 = arith.constant 3 : index
    %c3_274 = arith.constant 3 : index
    %c0_275 = arith.constant 0 : index
    %c0_276 = arith.constant 0 : index
    %251 = vector.load %arg2[%c3_273, %c3_274, %c0_275, %c0_276] : memref<4x9x64x64xbf16, #tpu.memory_space<vmem>>, vector<1x1x32x64xbf16>
    %252 = vector.shape_cast %251 : vector<1x1x32x64xbf16> to vector<32x64xbf16>
    %cst_277 = arith.constant dense<0.000000e+00> : vector<256x64xf32>
    %253 = tpu.matmul %250, %252, %cst_277 {dimension_numbers = #tpu.dot_dimension_numbers<[1], [0], [0], [1], [0, 0, 1, 1], [], []>} : vector<256x32xbf16>, vector<32x64xbf16>, vector<256x64xf32> -> vector<256x64xf32>
    %254 = arith.addf %247, %253 : vector<256x64xf32>
    %c1_278 = arith.constant 1 : index
    %c1_279 = arith.constant 1 : index
    %c0_280 = arith.constant 0 : index
    %255 = vector.load %arg5[%c1_278, %c1_279, %c0_280] : memref<18x18x64xf32, #tpu.memory_space<vmem>>, vector<16x16x32xf32>
    %256 = vector.shape_cast %255 : vector<16x16x32xf32> to vector<256x32xf32>
    %257 = arith.truncf %256 : vector<256x32xf32> to vector<256x32xbf16>
    %c3_281 = arith.constant 3 : index
    %c4_282 = arith.constant 4 : index
    %c0_283 = arith.constant 0 : index
    %c0_284 = arith.constant 0 : index
    %258 = vector.load %arg2[%c3_281, %c4_282, %c0_283, %c0_284] : memref<4x9x64x64xbf16, #tpu.memory_space<vmem>>, vector<1x1x32x64xbf16>
    %259 = vector.shape_cast %258 : vector<1x1x32x64xbf16> to vector<32x64xbf16>
    %cst_285 = arith.constant dense<0.000000e+00> : vector<256x64xf32>
    %260 = tpu.matmul %257, %259, %cst_285 {dimension_numbers = #tpu.dot_dimension_numbers<[1], [0], [0], [1], [0, 0, 1, 1], [], []>} : vector<256x32xbf16>, vector<32x64xbf16>, vector<256x64xf32> -> vector<256x64xf32>
    %261 = arith.addf %254, %260 : vector<256x64xf32>
    %c1_286 = arith.constant 1 : index
    %c2_287 = arith.constant 2 : index
    %c0_288 = arith.constant 0 : index
    %262 = vector.load %arg5[%c1_286, %c2_287, %c0_288] : memref<18x18x64xf32, #tpu.memory_space<vmem>>, vector<16x16x32xf32>
    %263 = vector.shape_cast %262 : vector<16x16x32xf32> to vector<256x32xf32>
    %264 = arith.truncf %263 : vector<256x32xf32> to vector<256x32xbf16>
    %c3_289 = arith.constant 3 : index
    %c5_290 = arith.constant 5 : index
    %c0_291 = arith.constant 0 : index
    %c0_292 = arith.constant 0 : index
    %265 = vector.load %arg2[%c3_289, %c5_290, %c0_291, %c0_292] : memref<4x9x64x64xbf16, #tpu.memory_space<vmem>>, vector<1x1x32x64xbf16>
    %266 = vector.shape_cast %265 : vector<1x1x32x64xbf16> to vector<32x64xbf16>
    %cst_293 = arith.constant dense<0.000000e+00> : vector<256x64xf32>
    %267 = tpu.matmul %264, %266, %cst_293 {dimension_numbers = #tpu.dot_dimension_numbers<[1], [0], [0], [1], [0, 0, 1, 1], [], []>} : vector<256x32xbf16>, vector<32x64xbf16>, vector<256x64xf32> -> vector<256x64xf32>
    %268 = arith.addf %261, %267 : vector<256x64xf32>
    %c2_294 = arith.constant 2 : index
    %c0_295 = arith.constant 0 : index
    %c0_296 = arith.constant 0 : index
    %269 = vector.load %arg5[%c2_294, %c0_295, %c0_296] : memref<18x18x64xf32, #tpu.memory_space<vmem>>, vector<16x16x32xf32>
    %270 = vector.shape_cast %269 : vector<16x16x32xf32> to vector<256x32xf32>
    %271 = arith.truncf %270 : vector<256x32xf32> to vector<256x32xbf16>
    %c3_297 = arith.constant 3 : index
    %c6_298 = arith.constant 6 : index
    %c0_299 = arith.constant 0 : index
    %c0_300 = arith.constant 0 : index
    %272 = vector.load %arg2[%c3_297, %c6_298, %c0_299, %c0_300] : memref<4x9x64x64xbf16, #tpu.memory_space<vmem>>, vector<1x1x32x64xbf16>
    %273 = vector.shape_cast %272 : vector<1x1x32x64xbf16> to vector<32x64xbf16>
    %cst_301 = arith.constant dense<0.000000e+00> : vector<256x64xf32>
    %274 = tpu.matmul %271, %273, %cst_301 {dimension_numbers = #tpu.dot_dimension_numbers<[1], [0], [0], [1], [0, 0, 1, 1], [], []>} : vector<256x32xbf16>, vector<32x64xbf16>, vector<256x64xf32> -> vector<256x64xf32>
    %275 = arith.addf %268, %274 : vector<256x64xf32>
    %c2_302 = arith.constant 2 : index
    %c1_303 = arith.constant 1 : index
    %c0_304 = arith.constant 0 : index
    %276 = vector.load %arg5[%c2_302, %c1_303, %c0_304] : memref<18x18x64xf32, #tpu.memory_space<vmem>>, vector<16x16x32xf32>
    %277 = vector.shape_cast %276 : vector<16x16x32xf32> to vector<256x32xf32>
    %278 = arith.truncf %277 : vector<256x32xf32> to vector<256x32xbf16>
    %c3_305 = arith.constant 3 : index
    %c7_306 = arith.constant 7 : index
    %c0_307 = arith.constant 0 : index
    %c0_308 = arith.constant 0 : index
    %279 = vector.load %arg2[%c3_305, %c7_306, %c0_307, %c0_308] : memref<4x9x64x64xbf16, #tpu.memory_space<vmem>>, vector<1x1x32x64xbf16>
    %280 = vector.shape_cast %279 : vector<1x1x32x64xbf16> to vector<32x64xbf16>
    %cst_309 = arith.constant dense<0.000000e+00> : vector<256x64xf32>
    %281 = tpu.matmul %278, %280, %cst_309 {dimension_numbers = #tpu.dot_dimension_numbers<[1], [0], [0], [1], [0, 0, 1, 1], [], []>} : vector<256x32xbf16>, vector<32x64xbf16>, vector<256x64xf32> -> vector<256x64xf32>
    %282 = arith.addf %275, %281 : vector<256x64xf32>
    %c2_310 = arith.constant 2 : index
    %c2_311 = arith.constant 2 : index
    %c0_312 = arith.constant 0 : index
    %283 = vector.load %arg5[%c2_310, %c2_311, %c0_312] : memref<18x18x64xf32, #tpu.memory_space<vmem>>, vector<16x16x32xf32>
    %284 = vector.shape_cast %283 : vector<16x16x32xf32> to vector<256x32xf32>
    %285 = arith.truncf %284 : vector<256x32xf32> to vector<256x32xbf16>
    %c3_313 = arith.constant 3 : index
    %c8_314 = arith.constant 8 : index
    %c0_315 = arith.constant 0 : index
    %c0_316 = arith.constant 0 : index
    %286 = vector.load %arg2[%c3_313, %c8_314, %c0_315, %c0_316] : memref<4x9x64x64xbf16, #tpu.memory_space<vmem>>, vector<1x1x32x64xbf16>
    %287 = vector.shape_cast %286 : vector<1x1x32x64xbf16> to vector<32x64xbf16>
    %cst_317 = arith.constant dense<0.000000e+00> : vector<256x64xf32>
    %288 = tpu.matmul %285, %287, %cst_317 {dimension_numbers = #tpu.dot_dimension_numbers<[1], [0], [0], [1], [0, 0, 1, 1], [], []>} : vector<256x32xbf16>, vector<32x64xbf16>, vector<256x64xf32> -> vector<256x64xf32>
    %289 = arith.addf %282, %288 : vector<256x64xf32>
    %c3_318 = arith.constant 3 : index
    %c0_319 = arith.constant 0 : index
    %c0_320 = arith.constant 0 : index
    %290 = vector.load %arg3[%c3_318, %c0_319, %c0_320] : memref<4x1x64xf32, #tpu.memory_space<vmem>>, vector<1x1x64xf32>
    %291 = vector.shape_cast %290 : vector<1x1x64xf32> to vector<1x64xf32>
    %292 = vector.broadcast %291 : vector<1x64xf32> to vector<256x64xf32>
    %293 = arith.addf %289, %292 : vector<256x64xf32>
    %c0_321 = arith.constant 0 : index
    %c0_322 = arith.constant 0 : index
    %c0_323 = arith.constant 0 : index
    %294 = vector.load %arg4[%c0_321, %c0_322, %c0_323] : memref<1x256x64xf32, #tpu.memory_space<vmem>>, vector<1x256x64xf32>
    %295 = vector.shape_cast %294 : vector<1x256x64xf32> to vector<256x64xf32>
    %296 = vector.shape_cast %293 : vector<256x64xf32> to vector<1x256x64xf32>
    tpu.vector_store %arg4[%c0_321, %c0_322, %c0_323], %296 {strides = array<i32>} : memref<1x256x64xf32, #tpu.memory_space<vmem>>, vector<1x256x64xf32>,
    return
  }
  func.func @transform_0(%arg0: i32) -> (i32, i32, i32, i32) {
    %c0_i32 = arith.constant 0 : i32
    %c0_i32_0 = arith.constant 0 : i32
    %c0_i32_1 = arith.constant 0 : i32
    %c0_i32_2 = arith.constant 0 : i32
    return %arg0, %c0_i32, %c0_i32_0, %c0_i32_1 : i32, i32, i32, i32
  }
  func.func @transform_1(%arg0: i32) -> (i32, i32, i32, i32) {
    %c0_i32 = arith.constant 0 : i32
    %c0_i32_0 = arith.constant 0 : i32
    %c0_i32_1 = arith.constant 0 : i32
    %c0_i32_2 = arith.constant 0 : i32
    %c0_i32_3 = arith.constant 0 : i32
    return %c0_i32, %c0_i32_0, %c0_i32_1, %c0_i32_2 : i32, i32, i32, i32
  }
  func.func @transform_2(%arg0: i32) -> (i32, i32, i32) {
    %c0_i32 = arith.constant 0 : i32
    %c0_i32_0 = arith.constant 0 : i32
    %c0_i32_1 = arith.constant 0 : i32
    %c0_i32_2 = arith.constant 0 : i32
    return %c0_i32, %c0_i32_0, %c0_i32_1 : i32, i32, i32
  }
  func.func @transform_3(%arg0: i32) -> (i32, i32, i32) {
    %c0_i32 = arith.constant 0 : i32
    %c0_i32_0 = arith.constant 0 : i32
    %c0_i32_1 = arith.constant 0 : i32
    return %arg0, %c0_i32, %c0_i32_0 : i32, i32, i32
  }
}

</mosaic_0001>

<bundles_post_ra>
// kernel: simple_unet_forward.1
= control target key start
LH: loop header
LB: loop body
LE: loop exit
PB: predicated region body
PF: predicated region fallthrough
CT: control target
= control target key end

     0   :  { %s15896_s12 = smov 0   ;;  %s18210_s0 = inlined_call_operand.vmem [shape: f32[2,16,16,8], index: 0, kind: input, shape index: {}]   ;;  %s18211_s1 = inlined_call_operand.vmem [shape: bf16[4,9,64,64], index: 1, kind: input, shape index: {}]   ;;  %s18212_s2 = inlined_call_operand.vmem [shape: f32[4,1,64], index: 2, kind: input, shape index: {}]   ;;  %s18213_s3 = inlined_call_operand.vmem [shape: f32[2,256,64], index: 3, kind: output, shape index: {}]  }
   0x1 LB: > { %s11836_s13 = sadd.s32 4294967295, %s15873_s12   ;;  %p11840_p0 = scmp.ge.s32.totalorder %s15873_s12, 1  ;;  %s15873_s12 = sphi %s15896_s12, %s13_s12  }
   0x2   : > { %p137_p1 = scmp.lt.s32.totalorder %s15873_s12, 3 }
   0x4   : > { %p138_p2 = pnand %p11840_p0, %p137_p1 }
   0x5   : > { %v11845_v0 = vld [vmem:[%s18211_s1 + $0x20] sm:$0xf] (!%p138_p2)  ;;  %vm603_vm0 = vcmask (!%p138_p2), 1043456   ;;  %vm172_vm1 = vcmask (!%p138_p2), 523264   ;;  %vm175_vm2 = vcmask (!%p138_p2), 517120   ;;  %v15875_v2 = vmov (!%p138_p2), 0.0  }
   0x6   : > { %141 = sbr.rel (%p138_p2) target bundleno = 3041 (0xbe1), region = 32  ;;  %15759 = vmatprep.subr.msk.bf16.mxu0 (!%p138_p2), %vm603_vm0, %v11845_v0  ;;  %v605_v1 = vsel (!%p138_p2), %vm603_vm0, %v11845_v0, 0  ;;  %173 = vst.msk [vmem:[#allocation2] sm:$0xff] (!%p138_p2), %vm172_vm1, %v15875_v2  ;;  %174 = vst.msk [vmem:[#allocation2 + $0x8] sm:$0xff] (!%p138_p2), %vm172_vm1, %v15875_v2  ;;  %v504_v3 = vld [vmem:[%s18211_s1] sm:$0xf] (!%p138_p2) }
   0x7   : > { %176 = vst.msk [vmem:[#allocation2 + $0x10] sm:$0x3] (!%p138_p2), %vm175_vm2, %v15875_v2  ;;  %180 = vst.msk [vmem:[#allocation2 + $0x1a8] sm:$0x3] (!%p138_p2), %vm175_vm2, %v15875_v2  ;;  %p161_p3 = scmp.lt.s32.totalorder (!%p138_p2), %s11836_s13, 1  ;;  %13386 = vmatpush3.bf16.msra.mxu0 (!%p138_p2), %v605_v1  ;;  %vm213_vm3 = vcmask (!%p138_p2), 64512  }
   0x8   : > { %178 = vst.msk [vmem:[#allocation2 + $0x198] sm:$0xff] (!%p138_p2), %vm172_vm1, %v15875_v2  ;;  %179 = vst.msk [vmem:[#allocation2 + $0x1a0] sm:$0xff] (!%p138_p2), %vm172_vm1, %v15875_v2  ;;  %15760 = vmatprep.subr.msk.bf16.mxu0 (!%p138_p2), %vm603_vm0, %v504_v3  ;;  %vm278_vm4 = vcmask (!%p138_p2), 1040384   ;;  %v15932_v6 = vsel (!%p138_p2), %vm603_vm0, %v504_v3, 0  ;;  %vm9136_vm5 = vcmask (!%p138_p2), 261120  }
   0xd   : > { %s18215_s13 = smov (!%p161_p3, %s11836_s13), 1  ;;  %v505_v8 = vld [vmem:[#allocation2 + $0x1] sm:$0xff] }
   0xe   : > { %s12708_s18 = sshll.u32 %s18215_s13, 8  ;;  %v506_v9 = vld [vmem:[#allocation2 + $0x9] sm:$0xff] }
   0xf   : > { %s15927_s21 = scalar_lea.vmem %s18210_s0, %s12708_s18  ;;  %v537_v14 = vpack.c.bf16 %v506_v9, %v505_v8  ;;  %s18109_s7 = scalar_lea.vmem %s18213_s3, %s12708_s18 }
  0x10   : > { %v181_v4 = vld [vmem:[%s15927_s21] sm:$0xff]  ;;  %v182_v5 = vld [vmem:[%s15927_s21 + $0x8] sm:$0xff]  ;;  %v183_v7 = vld [vmem:[%s15927_s21 + $0x10] sm:$0xff] }
  0x11   : > { %v214_v10 = vsel %vm213_vm3, %v181_v4, 0.0  ;;  %v215_v11 = vsel %vm213_vm3, %v182_v5, 0.0  ;;  %v184_v12 = vld [vmem:[%s15927_s21 + $0x18] sm:$0xff]  ;;  %v216_v13 = vsel %vm213_vm3, %v183_v7, 0.0  ;;  %v185_v18 = vld [vmem:[%s15927_s21 + $0x20] sm:$0xff]  ;;  %v186_v19 = vld [vmem:[%s15927_s21 + $0x28] sm:$0xff]  ;;  %13387 = vmatprep.mubr.msk.bf16.mxu0 %vm213_vm3, %v537_v14 }
  0x12   : > { %v279_v15 = vrot.slane %v214_v10, 7  ;;  %v280_v16 = vrot.slane %v215_v11, 7  ;;  %v217_v17 = vsel %vm213_vm3, %v184_v12, 0.0  ;;  %v187_v20 = vld [vmem:[%s15927_s21 + $0x30] sm:$0xff]  ;;  %v282_v21 = vrot.slane %v216_v13, 7  ;;  %v188_v25 = vld [vmem:[%s15927_s21 + $0x38] sm:$0xff] }
  0x13   : > { %v283_v22 = vrot.slane %v217_v17, 7  ;;  %v218_v23 = vsel %vm213_vm3, %v185_v18, 0.0  ;;  %v219_v24 = vsel %vm213_vm3, %v186_v19, 0.0  ;;  %v189_v26 = vld [vmem:[%s15927_s21 + $0x40] sm:$0xff]  ;;  %v190_v35 = vld [vmem:[%s15927_s21 + $0x48] sm:$0xff]  ;;  %v191_v36 = vld [vmem:[%s15927_s21 + $0x50] sm:$0xff] }
  0x14   : > { %v281_v27 = vsel %vm278_vm4, %v279_v15, %v280_v16  ;;  %v375_v28 = vsel %vm278_vm4, 0.0, %v279_v15  ;;  %v391_v29 = vsel %vm278_vm4, %v280_v16, 0.0  ;;  %v285_v30 = vrot.slane %v218_v23, 7  ;;  %v192_v37 = vld [vmem:[%s15927_s21 + $0x58] sm:$0xff]  ;;  %v193_v46 = vld [vmem:[%s15927_s21 + $0x60] sm:$0xff]  ;;  %v194_v51 = vld [vmem:[%s15927_s21 + $0x68] sm:$0xff] }
  0x15   : > { %408 = vst.msk [vmem:[#allocation2 + $0x18] sm:$0xff] %vm172_vm1, %v375_v28  ;;  %409 = vst.msk [vmem:[#allocation2 + $0x20] sm:$0xff] %vm172_vm1, %v281_v27  ;;  %v284_v31 = vsel %vm278_vm4, %v282_v21, %v283_v22  ;;  %v376_v32 = vsel %vm278_vm4, 0.0, %v282_v21  ;;  %v392_v33 = vsel %vm278_vm4, %v283_v22, 0.0  ;;  %v286_v34 = vrot.slane %v219_v24, 7  ;;  %v195_v60 = vld [vmem:[%s15927_s21 + $0x70] sm:$0xff] }
  0x16   : > { %410 = vst.msk [vmem:[#allocation2 + $0x28] sm:$0x3] %vm175_vm2, %v391_v29  ;;  %413 = vst.msk [vmem:[#allocation2 + $0x40] sm:$0x3] %vm175_vm2, %v392_v33  ;;  %v377_v38 = vsel %vm278_vm4, 0.0, %v285_v30  ;;  %v220_v39 = vsel %vm213_vm3, %v187_v20, 0.0 }
  0x17   : > { %411 = vst.msk [vmem:[#allocation2 + $0x30] sm:$0xff] %vm172_vm1, %v376_v32  ;;  %412 = vst.msk [vmem:[#allocation2 + $0x38] sm:$0xff] %vm172_vm1, %v284_v31  ;;  %v221_v40 = vsel %vm213_vm3, %v188_v25, 0.0  ;;  %v222_v41 = vsel %vm213_vm3, %v189_v26, 0.0  ;;  %v287_v42 = vsel %vm278_vm4, %v285_v30, %v286_v34  ;;  %v393_v43 = vsel %vm278_vm4, %v286_v34, 0.0  ;;  %v196_v61 = vld [vmem:[%s15927_s21 + $0x78] sm:$0xff] }
  0x18   : > { %414 = vst.msk [vmem:[#allocation2 + $0x48] sm:$0xff] %vm172_vm1, %v377_v38  ;;  %v288_v44 = vrot.slane %v220_v39, 7  ;;  %v289_v45 = vrot.slane %v221_v40, 7  ;;  %415 = vst.msk [vmem:[#allocation2 + $0x50] sm:$0xff] %vm172_vm1, %v287_v42  ;;  %v223_v47 = vsel %vm213_vm3, %v190_v35, 0.0  ;;  %v291_v48 = vrot.slane %v222_v41, 7 }
  0x19   : > { %416 = vst.msk [vmem:[#allocation2 + $0x58] sm:$0x3] %vm175_vm2, %v393_v43  ;;  %v224_v49 = vsel %vm213_vm3, %v191_v36, 0.0  ;;  %v225_v50 = vsel %vm213_vm3, %v192_v37, 0.0  ;;  %v292_v55 = vrot.slane %v223_v47, 7  ;;  %v226_v59 = vsel %vm213_vm3, %v193_v46, 0.0 }
  0x1a   : > { %v290_v52 = vsel %vm278_vm4, %v288_v44, %v289_v45  ;;  %v378_v53 = vsel %vm278_vm4, 0.0, %v288_v44  ;;  %v394_v54 = vsel %vm278_vm4, %v289_v45, 0.0  ;;  %v379_v56 = vsel %vm278_vm4, 0.0, %v291_v48  ;;  %v197_v2 = vld [vmem:[%s15927_s21 + $0x80] sm:$0xff]  ;;  %v198_v3 = vld [vmem:[%s15927_s21 + $0x88] sm:$0xff]  ;;  %v199_v11 = vld [vmem:[%s15927_s21 + $0x90] sm:$0xff] }
  0x1b   : > { %417 = vst.msk [vmem:[#allocation2 + $0x60] sm:$0xff] %vm172_vm1, %v378_v53  ;;  %418 = vst.msk [vmem:[#allocation2 + $0x68] sm:$0xff] %vm172_vm1, %v290_v52  ;;  %v294_v57 = vrot.slane %v224_v49, 7  ;;  %v295_v58 = vrot.slane %v225_v50, 7  ;;  %v293_v62 = vsel %vm278_vm4, %v291_v48, %v292_v55  ;;  %v395_v63 = vsel %vm278_vm4, %v292_v55, 0.0  ;;  %v200_v22 = vld [vmem:[%s15927_s21 + $0x98] sm:$0xff] }
  0x1c   : > { %419 = vst.msk [vmem:[#allocation2 + $0x70] sm:$0x3] %vm175_vm2, %v394_v54  ;;  %v227_v0 = vsel %vm213_vm3, %v194_v51, 0.0  ;;  %v297_v1 = vrot.slane %v226_v59, 7  ;;  %v507_v4 = vld [vmem:[#allocation2 + $0x19] sm:$0xff]  ;;  %v228_v16 = vsel %vm213_vm3, %v195_v60, 0.0 }
  0x1d   : > { %420 = vst.msk [vmem:[#allocation2 + $0x78] sm:$0xff] %vm172_vm1, %v379_v56  ;;  %v508_v5 = vld [vmem:[#allocation2 + $0x21] sm:$0xff]  ;;  %421 = vst.msk [vmem:[#allocation2 + $0x80] sm:$0xff] %vm172_vm1, %v293_v62  ;;  %v296_v7 = vsel %vm278_vm4, %v294_v57, %v295_v58  ;;  %v380_v8 = vsel %vm278_vm4, 0.0, %v294_v57  ;;  %v396_v9 = vsel %vm278_vm4, %v295_v58, 0.0  ;;  %v298_v10 = vrot.slane %v227_v0, 7 }
  0x1e   : > { %422 = vst.msk [vmem:[#allocation2 + $0x88] sm:$0x3] %vm175_vm2, %v395_v63  ;;  %v15999_v12 = vpack.c.bf16 %v508_v5, %v507_v4  ;;  %v509_v13 = vld [vmem:[#allocation2 + $0x31] sm:$0xff]  ;;  %v510_v14 = vld [vmem:[#allocation2 + $0x39] sm:$0xff]  ;;  %425 = vst.msk [vmem:[#allocation2 + $0xa0] sm:$0x3] %vm175_vm2, %v396_v9 }
  0x1f   : > { %423 = vst.msk [vmem:[#allocation2 + $0x90] sm:$0xff] %vm172_vm1, %v380_v8  ;;  %424 = vst.msk [vmem:[#allocation2 + $0x98] sm:$0xff] %vm172_vm1, %v296_v7  ;;  %v381_v15 = vsel %vm278_vm4, 0.0, %v297_v1  ;;  %v229_v17 = vsel %vm213_vm3, %v196_v61, 0.0  ;;  %v16007_v18 = vpack.c.bf16 %v510_v14, %v509_v13  ;;  %v299_v19 = vsel %vm278_vm4, %v297_v1, %v298_v10  ;;  %v16016_v23 = vld [vmem:[%s18211_s1 + $0x40] sm:$0xf] }
  0x20   : > { %v397_v20 = vsel %vm278_vm4, %v298_v10, 0.0  ;;  %426 = vst.msk [vmem:[#allocation2 + $0xa8] sm:$0xff] %vm172_vm1, %v381_v15  ;;  %v300_v21 = vrot.slane %v228_v16, 7  ;;  %13388 = vmatmul.mubr.msk.bf16.vlgmr.msra.gmra.mrb[0].mxu0 %vm213_vm3, %v15999_v12  ;;  %v511_v24 = vld [vmem:[#allocation2 + $0x49] sm:$0xff]  ;;  %v512_v25 = vld [vmem:[#allocation2 + $0x51] sm:$0xff]  ;;  %427 = vst.msk [vmem:[#allocation2 + $0xb0] sm:$0xff] %vm172_vm1, %v299_v19 }
  0x21   : > { %428 = vst.msk [vmem:[#allocation2 + $0xb8] sm:$0x3] %vm175_vm2, %v397_v20  ;;  %v301_v26 = vrot.slane %v229_v17, 7  ;;  %v230_v27 = vsel %vm213_vm3, %v197_v2, 0.0  ;;  %v231_v28 = vsel %vm213_vm3, %v198_v3, 0.0  ;;  %v232_v29 = vsel %vm213_vm3, %v199_v11, 0.0  ;;  %13420 = vmatpush3.bf16.msra.mxu0 %v15932_v6  ;;  %13391 = vmatprep.mubr.msk.bf16.mxu0 %vm213_vm3, %v16007_v18 }
  0x22   : > { %v382_v30 = vsel %vm278_vm4, 0.0, %v300_v21  ;;  %v303_v31 = vrot.slane %v230_v27, 7  ;;  %v304_v32 = vrot.slane %v231_v28, 7  ;;  %v201_v33 = vld [vmem:[%s15927_s21 + $0xa0] sm:$0xff]  ;;  %v202_v34 = vld [vmem:[%s15927_s21 + $0xa8] sm:$0xff]  ;;  %v233_v6 = vsel %vm213_vm3, %v200_v22, 0.0  ;;  %15761 = vmatprep.subr.msk.bf16.mxu0 %vm603_vm0, %v16016_v23 }
  0x23   : > { %v513_v35 = vld [vmem:[#allocation2 + $0x61] sm:$0xff]  ;;  %v514_v36 = vld [vmem:[#allocation2 + $0x69] sm:$0xff]  ;;  %v302_v37 = vsel %vm278_vm4, %v300_v21, %v301_v26  ;;  %v398_v38 = vsel %vm278_vm4, %v301_v26, 0.0  ;;  %429 = vst.msk [vmem:[#allocation2 + $0xc0] sm:$0xff] %vm172_vm1, %v382_v30  ;;  %v306_v39 = vrot.slane %v232_v29, 7  ;;  %v16038_v41 = vpack.c.bf16 %v512_v25, %v511_v24  ;;  %v204_v45 = vld [vmem:[%s15927_s21 + $0xb8] sm:$0xff] }
  0x24   : > { %v203_v40 = vld [vmem:[%s15927_s21 + $0xb0] sm:$0xff]  ;;  %430 = vst.msk [vmem:[#allocation2 + $0xc8] sm:$0xff] %vm172_vm1, %v302_v37  ;;  %v305_v42 = vsel %vm278_vm4, %v303_v31, %v304_v32  ;;  %v383_v43 = vsel %vm278_vm4, 0.0, %v303_v31  ;;  %v399_v44 = vsel %vm278_vm4, %v304_v32, 0.0  ;;  %v307_v46 = vrot.slane %v233_v6, 7  ;;  %v205_v54 = vld [vmem:[%s15927_s21 + $0xc0] sm:$0xff] }
  0x25   : > { %431 = vst.msk [vmem:[#allocation2 + $0xd0] sm:$0x3] %vm175_vm2, %v398_v38  ;;  %434 = vst.msk [vmem:[#allocation2 + $0xe8] sm:$0x3] %vm175_vm2, %v399_v44  ;;  %v384_v47 = vsel %vm278_vm4, 0.0, %v306_v39  ;;  %v234_v48 = vsel %vm213_vm3, %v201_v33, 0.0  ;;  %v16052_v50 = vpack.c.bf16 %v514_v36, %v513_v35 }
  0x26   : > { %432 = vst.msk [vmem:[#allocation2 + $0xd8] sm:$0xff] %vm172_vm1, %v383_v43  ;;  %433 = vst.msk [vmem:[#allocation2 + $0xe0] sm:$0xff] %vm172_vm1, %v305_v42  ;;  %v235_v49 = vsel %vm213_vm3, %v202_v34, 0.0  ;;  %v309_v51 = vrot.slane %v234_v48, 7  ;;  %v236_v53 = vsel %vm213_vm3, %v203_v40, 0.0  ;;  %v206_v55 = vld [vmem:[%s15927_s21 + $0xc8] sm:$0xff]  ;;  %v308_v56 = vsel %vm278_vm4, %v306_v39, %v307_v46 }
  0x27   : > { %435 = vst.msk [vmem:[#allocation2 + $0xf0] sm:$0xff] %vm172_vm1, %v384_v47  ;;  %v310_v52 = vrot.slane %v235_v49, 7  ;;  %v400_v57 = vsel %vm278_vm4, %v307_v46, 0.0  ;;  %v237_v58 = vsel %vm213_vm3, %v204_v45, 0.0  ;;  %v207_v59 = vld [vmem:[%s15927_s21 + $0xd0] sm:$0xff]  ;;  %436 = vst.msk [vmem:[#allocation2 + $0xf8] sm:$0xff] %vm172_vm1, %v308_v56 }
  0x28   : > { %437 = vst.msk [vmem:[#allocation2 + $0x100] sm:$0x3] %vm175_vm2, %v400_v57  ;;  %v385_v61 = vsel %vm278_vm4, 0.0, %v309_v51  ;;  %v312_v63 = vrot.slane %v236_v53, 7  ;;  %v208_v0 = vld [vmem:[%s15927_s21 + $0xd8] sm:$0xff]  ;;  %13392 = vmatmul.mubr.msk.bf16.gmra.mrb[4].mxu0 %vm213_vm3, %v16038_v41  ;;  %v313_v1 = vrot.slane %v237_v58, 7 }
  0x29   : > { %v311_v60 = vsel %vm278_vm4, %v309_v51, %v310_v52  ;;  %v401_v62 = vsel %vm278_vm4, %v310_v52, 0.0  ;;  %438 = vst.msk [vmem:[#allocation2 + $0x108] sm:$0xff] %vm172_vm1, %v385_v61  ;;  %v238_v2 = vsel %vm213_vm3, %v205_v54, 0.0  ;;  %v239_v3 = vsel %vm213_vm3, %v206_v55, 0.0  ;;  %v209_v4 = vld [vmem:[%s15927_s21 + $0xe0] sm:$0xff]  ;;  %13395 = vmatprep.mubr.msk.bf16.mxu0 %vm213_vm3, %v16052_v50  ;;  %v517_v13 = vld [vmem:[#allocation2 + $0x91] sm:$0xff] }
  0x2a   : > { %439 = vst.msk [vmem:[#allocation2 + $0x110] sm:$0xff] %vm172_vm1, %v311_v60  ;;  %v515_v5 = vld [vmem:[#allocation2 + $0x79] sm:$0xff]  ;;  %v516_v7 = vld [vmem:[#allocation2 + $0x81] sm:$0xff]  ;;  %v386_v8 = vsel %vm278_vm4, 0.0, %v312_v63  ;;  %v315_v9 = vrot.slane %v238_v2, 7  ;;  %v316_v10 = vrot.slane %v239_v3, 7  ;;  %v314_v15 = vsel %vm278_vm4, %v312_v63, %v313_v1 }
  0x2b   : > { %440 = vst.msk [vmem:[#allocation2 + $0x118] sm:$0x3] %vm175_vm2, %v401_v62  ;;  %v240_v11 = vsel %vm213_vm3, %v207_v59, 0.0  ;;  %v518_v14 = vld [vmem:[#allocation2 + $0x99] sm:$0xff]  ;;  %v402_v16 = vsel %vm278_vm4, %v313_v1, 0.0  ;;  %v241_v17 = vsel %vm213_vm3, %v208_v0, 0.0  ;;  %v16090_v25 = vpack.c.bf16 %v516_v7, %v515_v5 }
  0x2c   : > { %441 = vst.msk [vmem:[#allocation2 + $0x120] sm:$0xff] %vm172_vm1, %v386_v8  ;;  %v318_v19 = vrot.slane %v240_v11, 7  ;;  %v210_v20 = vld [vmem:[%s15927_s21 + $0xe8] sm:$0xff]  ;;  %442 = vst.msk [vmem:[#allocation2 + $0x128] sm:$0xff] %vm172_vm1, %v314_v15  ;;  %v317_v21 = vsel %vm278_vm4, %v315_v9, %v316_v10  ;;  %v387_v22 = vsel %vm278_vm4, 0.0, %v315_v9  ;;  %v403_v24 = vsel %vm278_vm4, %v316_v10, 0.0 }
  0x2d   : > { %443 = vst.msk [vmem:[#allocation2 + $0x130] sm:$0x3] %vm175_vm2, %v402_v16  ;;  %446 = vst.msk [vmem:[#allocation2 + $0x148] sm:$0x3] %vm175_vm2, %v403_v24  ;;  %v319_v26 = vrot.slane %v241_v17, 7  ;;  %v242_v28 = vsel %vm213_vm3, %v209_v4, 0.0  ;;  %v16097_v29 = vpack.c.bf16 %v518_v14, %v517_v13 }
  0x2e   : > { %444 = vst.msk [vmem:[#allocation2 + $0x138] sm:$0xff] %vm172_vm1, %v387_v22  ;;  %445 = vst.msk [vmem:[#allocation2 + $0x140] sm:$0xff] %vm172_vm1, %v317_v21  ;;  %v388_v27 = vsel %vm278_vm4, 0.0, %v318_v19  ;;  %v243_v30 = vsel %vm213_vm3, %v210_v20, 0.0  ;;  %v321_v31 = vrot.slane %v242_v28, 7  ;;  %v519_v38 = vld [vmem:[#allocation2 + $0xa9] sm:$0xff] }
  0x2f   : > { %447 = vst.msk [vmem:[#allocation2 + $0x150] sm:$0xff] %vm172_vm1, %v388_v27  ;;  %v320_v32 = vsel %vm278_vm4, %v318_v19, %v319_v26  ;;  %v404_v33 = vsel %vm278_vm4, %v319_v26, 0.0  ;;  %v322_v34 = vrot.slane %v243_v30, 7  ;;  %v520_v6 = vld [vmem:[#allocation2 + $0xb1] sm:$0xff]  ;;  %v521_v39 = vld [vmem:[#allocation2 + $0xc1] sm:$0xff]  ;;  %v522_v40 = vld [vmem:[#allocation2 + $0xc9] sm:$0xff] }
  0x30   : > { %448 = vst.msk [vmem:[#allocation2 + $0x158] sm:$0xff] %vm172_vm1, %v320_v32  ;;  %v389_v35 = vsel %vm278_vm4, 0.0, %v321_v31  ;;  %13396 = vmatmul.mubr.msk.bf16.gmra.mrb[8].mxu0 %vm213_vm3, %v16090_v25  ;;  %v16115_v42 = vpack.c.bf16 %v520_v6, %v519_v38  ;;  %v16117_v43 = vpack.c.bf16 %v522_v40, %v521_v39  ;;  %v523_v44 = vld [vmem:[#allocation2 + $0xd9] sm:$0xff]  ;;  %v524_v45 = vld [vmem:[#allocation2 + $0xe1] sm:$0xff]  ;;  %v525_v46 = vld [vmem:[#allocation2 + $0xf1] sm:$0xff]  ;;  %v1079_v9 = vsel %vm603_vm0, %v16016_v23, 0 }
  0x31   : > { %449 = vst.msk [vmem:[#allocation2 + $0x160] sm:$0x3] %vm175_vm2, %v404_v33  ;;  %v323_v36 = vsel %vm278_vm4, %v321_v31, %v322_v34  ;;  %v405_v37 = vsel %vm278_vm4, %v322_v34, 0.0  ;;  %13399 = vmatprep.mubr.msk.bf16.mxu0 %vm213_vm3, %v16097_v29  ;;  %v526_v47 = vld [vmem:[#allocation2 + $0xf9] sm:$0xff]  ;;  %v16123_v48 = vpack.c.bf16 %v524_v45, %v523_v44  ;;  %v527_v51 = vld [vmem:[#allocation2 + $0x109] sm:$0xff] }
  0x32   : > { %450 = vst.msk [vmem:[#allocation2 + $0x168] sm:$0xff] %vm172_vm1, %v389_v35  ;;  %451 = vst.msk [vmem:[#allocation2 + $0x170] sm:$0xff] %vm172_vm1, %v323_v36  ;;  %v16125_v49 = vpack.c.bf16 %v526_v47, %v525_v46  ;;  %v528_v52 = vld [vmem:[#allocation2 + $0x111] sm:$0xff]  ;;  %v456_v63 = vld [vmem:[#allocation2] sm:$0xff] }
  0x33   : > { %452 = vst.msk [vmem:[#allocation2 + $0x178] sm:$0x3] %vm175_vm2, %v405_v37  ;;  %v529_v53 = vld [vmem:[#allocation2 + $0x121] sm:$0xff]  ;;  %v16131_v55 = vpack.c.bf16 %v528_v52, %v527_v51  ;;  %v458_v5 = vld [vmem:[#allocation2 + $0x18] sm:$0xff]  ;;  %v460_v8 = vld [vmem:[#allocation2 + $0x30] sm:$0xff] }
  0x34   : > { %v530_v54 = vld [vmem:[#allocation2 + $0x129] sm:$0xff]  ;;  %v459_v7 = vld [vmem:[#allocation2 + $0x20] sm:$0xff]  ;;  %v461_v10 = vld [vmem:[#allocation2 + $0x38] sm:$0xff] }
  0x35   : > { %v16133_v56 = vpack.c.bf16 %v530_v54, %v529_v53  ;;  %v531_v57 = vld [vmem:[#allocation2 + $0x139] sm:$0xff]  ;;  %v532_v58 = vld [vmem:[#allocation2 + $0x141] sm:$0xff]  ;;  %v16154_v11 = vpack.c.bf16 %v459_v7, %v458_v5  ;;  %v16156_v13 = vpack.c.bf16 %v461_v10, %v460_v8  ;;  %v463_v16 = vld [vmem:[#allocation2 + $0x50] sm:$0xff] }
  0x36   : > { %v16139_v61 = vpack.c.bf16 %v532_v58, %v531_v57  ;;  %v457_v0 = vld [vmem:[#allocation2 + $0x8] sm:$0xff]  ;;  %v16161_v14 = vld [vmem:[%s18211_s1 + $0x60] sm:$0xf]  ;;  %v466_v21 = vld [vmem:[#allocation2 + $0x78] sm:$0xff] }
  0x37   : > { %v533_v59 = vld [vmem:[#allocation2 + $0x151] sm:$0xff]  ;;  %v488_v4 = vpack.c.bf16 %v457_v0, %v456_v63  ;;  %v462_v15 = vld [vmem:[#allocation2 + $0x48] sm:$0xff]  ;;  %v464_v17 = vld [vmem:[#allocation2 + $0x60] sm:$0xff] }
  0x38   : > { %13400 = vmatmul.mubr.msk.bf16.gmra.mrb[12].mxu0 %vm213_vm3, %v16115_v42  ;;  %v534_v60 = vld [vmem:[#allocation2 + $0x159] sm:$0xff]  ;;  %v465_v19 = vld [vmem:[#allocation2 + $0x68] sm:$0xff]  ;;  %v16169_v23 = vpack.c.bf16 %v463_v16, %v462_v15  ;;  %v468_v24 = vld [vmem:[#allocation2 + $0x90] sm:$0xff] }
  0x39   : > { %13403 = vmatprep.mubr.msk.bf16.mxu0 %vm213_vm3, %v16117_v43  ;;  %v16141_v62 = vpack.c.bf16 %v534_v60, %v533_v59  ;;  %v535_v1 = vld [vmem:[#allocation2 + $0x169] sm:$0xff]  ;;  %v16171_v20 = vpack.c.bf16 %v465_v19, %v464_v17  ;;  %v467_v22 = vld [vmem:[#allocation2 + $0x80] sm:$0xff]  ;;  %v469_v26 = vld [vmem:[#allocation2 + $0x98] sm:$0xff] }
  0x3a   : > { %v536_v2 = vld [vmem:[#allocation2 + $0x171] sm:$0xff]  ;;  %v16177_v27 = vpack.c.bf16 %v467_v22, %v466_v21  ;;  %v16179_v28 = vpack.c.bf16 %v469_v26, %v468_v24  ;;  %v470_v30 = vld [vmem:[#allocation2 + $0xa8] sm:$0xff]  ;;  %v472_v32 = vld [vmem:[#allocation2 + $0xc0] sm:$0xff] }
  0x3b   : > { %v16147_v3 = vpack.c.bf16 %v536_v2, %v535_v1  ;;  %v471_v31 = vld [vmem:[#allocation2 + $0xb0] sm:$0xff]  ;;  %v473_v33 = vld [vmem:[#allocation2 + $0xc8] sm:$0xff]  ;;  %v474_v36 = vld [vmem:[#allocation2 + $0xd8] sm:$0xff] }
  0x3c   : > { %v16185_v34 = vpack.c.bf16 %v471_v31, %v470_v30  ;;  %v16187_v35 = vpack.c.bf16 %v473_v33, %v472_v32  ;;  %v475_v37 = vld [vmem:[#allocation2 + $0xe0] sm:$0xff]  ;;  %v476_v38 = vld [vmem:[#allocation2 + $0xf0] sm:$0xff]  ;;  %v477_v6 = vld [vmem:[#allocation2 + $0xf8] sm:$0xff]  ;;  %v1373_v32 = vsel %vm603_vm0, %v16161_v14, 0 }
  0x3d   : > { %v16193_v39 = vpack.c.bf16 %v475_v37, %v474_v36  ;;  %v16195_v40 = vpack.c.bf16 %v477_v6, %v476_v38  ;;  %v478_v44 = vld [vmem:[#allocation2 + $0x108] sm:$0xff]  ;;  %v479_v45 = vld [vmem:[#allocation2 + $0x110] sm:$0xff]  ;;  %v480_v46 = vld [vmem:[#allocation2 + $0x120] sm:$0xff] }
  0x3e   : > { %v481_v47 = vld [vmem:[#allocation2 + $0x128] sm:$0xff]  ;;  %v16201_v51 = vpack.c.bf16 %v479_v45, %v478_v44  ;;  %v482_v53 = vld [vmem:[#allocation2 + $0x138] sm:$0xff]  ;;  %v483_v54 = vld [vmem:[#allocation2 + $0x140] sm:$0xff] }
  0x3f   : > { %v16203_v52 = vpack.c.bf16 %v481_v47, %v480_v46  ;;  %v211_v57 = vld [vmem:[%s15927_s21 + $0xf0] sm:$0xff]  ;;  %v212_v58 = vld [vmem:[%s15927_s21 + $0xf8] sm:$0xff]  ;;  %v980_v15 = vld [vmem:[#allocation2 + $0x2] sm:$0xff] }
  0x40   : > { %13404 = vmatmul.mubr.msk.bf16.gmra.mrb[16].mxu0 %vm213_vm3, %v16123_v48  ;;  %v484_v59 = vld [vmem:[#allocation2 + $0x150] sm:$0xff]  ;;  %v485_v60 = vld [vmem:[#allocation2 + $0x158] sm:$0xff]  ;;  %v244_v63 = vsel %vm213_vm3, %v211_v57, 0.0  ;;  %v16213_v0 = vsel %vm213_vm3, %v212_v58, 0.0  ;;  %v983_v22 = vld [vmem:[#allocation2 + $0x22] sm:$0xff] }
  0x41   : > { %13407 = vmatprep.mubr.msk.bf16.mxu0 %vm213_vm3, %v16125_v49  ;;  %v324_v1 = vrot.slane %v244_v63, 7  ;;  %v325_v2 = vrot.slane %v16213_v0, 7  ;;  %v16218_v5 = vpack.c.bf16 %v485_v60, %v484_v59  ;;  %v487_v10 = vld [vmem:[#allocation2 + $0x170] sm:$0xff]  ;;  %v982_v21 = vld [vmem:[#allocation2 + $0x1a] sm:$0xff]  ;;  %v988_v38 = vld [vmem:[#allocation2 + $0x62] sm:$0xff] }
  0x42   : > { %v981_v16 = vld [vmem:[#allocation2 + $0xa] sm:$0xff]  ;;  %v984_v24 = vld [vmem:[#allocation2 + $0x32] sm:$0xff]  ;;  %v985_v26 = vld [vmem:[#allocation2 + $0x3a] sm:$0xff]  ;;  %v16235_v30 = vpack.c.bf16 %v983_v22, %v982_v21 }
  0x43   : > { %v326_v7 = vsel %vm278_vm4, %v324_v1, %v325_v2  ;;  %v390_v8 = vsel %vm278_vm4, 0.0, %v324_v1  ;;  %v1012_v19 = vpack.c.bf16 %v981_v16, %v980_v15  ;;  %v16237_v31 = vpack.c.bf16 %v985_v26, %v984_v24  ;;  %v11912_v33 = vld [vmem:[%s18211_s1 + $0x80] sm:$0xf]  ;;  %v986_v36 = vld [vmem:[#allocation2 + $0x4a] sm:$0xff]  ;;  %v987_v37 = vld [vmem:[#allocation2 + $0x52] sm:$0xff] }
  0x44   : > { %453 = vst.msk [vmem:[#allocation2 + $0x180] sm:$0xff] %vm172_vm1, %v390_v8  ;;  %454 = vst.msk [vmem:[#allocation2 + $0x188] sm:$0xff] %vm172_vm1, %v326_v7  ;;  %v989_v6 = vld [vmem:[#allocation2 + $0x6a] sm:$0xff]  ;;  %v16249_v44 = vpack.c.bf16 %v987_v37, %v986_v36  ;;  %v990_v45 = vld [vmem:[#allocation2 + $0x7a] sm:$0xff]  ;;  %v1667_v0 = vsel %vm603_vm0, %v11912_v33, 0 }
  0x45   : > { %v991_v46 = vld [vmem:[#allocation2 + $0x82] sm:$0xff]  ;;  %v992_v47 = vld [vmem:[#allocation2 + $0x92] sm:$0xff]  ;;  %v994_v58 = vld [vmem:[#allocation2 + $0xaa] sm:$0xff] }
  0x46   : > { %v995_v59 = vld [vmem:[#allocation2 + $0xb2] sm:$0xff]  ;;  %v996_v60 = vld [vmem:[#allocation2 + $0xc2] sm:$0xff]  ;;  %v997_v63 = vld [vmem:[#allocation2 + $0xca] sm:$0xff] }
  0x47   : > { %v16265_v1 = vpack.c.bf16 %v995_v59, %v994_v58  ;;  %v16267_v7 = vpack.c.bf16 %v997_v63, %v996_v60  ;;  %v998_v8 = vld [vmem:[#allocation2 + $0xda] sm:$0xff]  ;;  %v1002_v21 = vld [vmem:[#allocation2 + $0x10a] sm:$0xff]  ;;  %v1003_v22 = vld [vmem:[#allocation2 + $0x112] sm:$0xff] }
  0x48   : > { %13408 = vmatmul.mubr.msk.bf16.gmra.mrb[20].mxu0 %vm213_vm3, %v16131_v55  ;;  %v1001_v15 = vld [vmem:[#allocation2 + $0xfa] sm:$0xff]  ;;  %v1004_v24 = vld [vmem:[#allocation2 + $0x122] sm:$0xff]  ;;  %v1005_v26 = vld [vmem:[#allocation2 + $0x12a] sm:$0xff] }
  0x49   : > { %13411 = vmatprep.mubr.msk.bf16.mxu0 %vm213_vm3, %v16133_v56  ;;  %v16283_v36 = vpack.c.bf16 %v1005_v26, %v1004_v24  ;;  %v1006_v37 = vld [vmem:[#allocation2 + $0x13a] sm:$0xff]  ;;  %v1010_v58 = vld [vmem:[#allocation2 + $0x16a] sm:$0xff]  ;;  %v1011_v59 = vld [vmem:[#allocation2 + $0x172] sm:$0xff] }
  0x4a   : > { %v16301_v60 = vpack.c.bf16 %v1011_v59, %v1010_v58  ;;  %v2463_v24 = vld [vmem:[#allocation2 + $0xc1] sm:$0xff]  ;;  %v2464_v26 = vld [vmem:[#allocation2 + $0xc9] sm:$0xff]  ;;  %v2468_v58 = vld [vmem:[#allocation2 + $0xf9] sm:$0xff] }
  0x50   : > { %13412 = vmatmul.mubr.msk.bf16.gmra.mrb[24].mxu0 %vm213_vm3, %v16139_v61 }
  0x51   : > { %13415 = vmatprep.mubr.msk.bf16.mxu0 %vm213_vm3, %v16141_v62 }
  0x58   : > { %13416 = vmatmul.mubr.msk.bf16.gmra.mrb[28].mxu0 %vm213_vm3, %v16147_v3 }
  0x59   : > { %13421 = vmatprep.mubr.msk.bf16.mxu0 %vm213_vm3, %v488_v4  ;;  %v16216_v4 = vpack.c.bf16 %v483_v54, %v482_v53  ;;  %v993_v53 = vld [vmem:[#allocation2 + $0x9a] sm:$0xff]  ;;  %v16257_v54 = vpack.c.bf16 %v991_v46, %v990_v45 }
  0x5a   : > { %v16259_v57 = vpack.c.bf16 %v993_v53, %v992_v47  ;;  %v1009_v45 = vld [vmem:[#allocation2 + $0x15a] sm:$0xff]  ;;  %v406_v53 = vsel %vm278_vm4, %v325_v2, 0.0 }
  0x5b   : > { %455 = vst.msk [vmem:[#allocation2 + $0x190] sm:$0x3] %vm175_vm2, %v406_v53  ;;  %v11929_v2 = vld [vmem:[%s18211_s1 + $0xa0] sm:$0xf]  ;;  %v2467_v53 = vld [vmem:[#allocation2 + $0xf1] sm:$0xff] }
  0x60   : > { %13422 = vmatmul.mubr.msk.bf16.vlgmr.msra.gmra.mrb[0].mxu0 %vm213_vm3, %v16154_v11 }
  0x61   : > { %13454 = vmatpush3.bf16.msra.mxu0 %v1079_v9  ;;  %13425 = vmatprep.mubr.msk.bf16.mxu0 %vm213_vm3, %v16156_v13  ;;  %v486_v9 = vld [vmem:[#allocation2 + $0x168] sm:$0xff] }
  0x62   : > { %15762 = vmatprep.subr.msk.bf16.mxu0 %vm603_vm0, %v16161_v14  ;;  %v16230_v17 = vpack.c.bf16 %v487_v10, %v486_v9  ;;  %v16251_v14 = vpack.c.bf16 %v989_v6, %v988_v38  ;;  %v999_v9 = vld [vmem:[#allocation2 + $0xe2] sm:$0xff]  ;;  %v1000_v10 = vld [vmem:[#allocation2 + $0xf2] sm:$0xff] }
  0x63   : > { %v16273_v16 = vpack.c.bf16 %v999_v9, %v998_v8  ;;  %v1007_v38 = vld [vmem:[#allocation2 + $0x142] sm:$0xff]  ;;  %v1008_v6 = vld [vmem:[#allocation2 + $0x152] sm:$0xff]  ;;  %v1961_v8 = vsel %vm603_vm0, %v11929_v2, 0 }
  0x64   : > { %v16289_v46 = vpack.c.bf16 %v1007_v38, %v1006_v37  ;;  %v16291_v47 = vpack.c.bf16 %v1009_v45, %v1008_v6  ;;  %v11946_v9 = vld [vmem:[%s18211_s1 + $0xc0] sm:$0xf]  ;;  %v2489_v38 = vpack.c.bf16 %v2464_v26, %v2463_v24 }
  0x65   : > { %v2465_v6 = vld [vmem:[#allocation2 + $0xd9] sm:$0xff]  ;;  %v2466_v45 = vld [vmem:[#allocation2 + $0xe1] sm:$0xff] }
  0x66   : > { %v2490_v59 = vpack.c.bf16 %v2466_v45, %v2465_v6 }
  0x68   : > { %13426 = vmatmul.mubr.msk.bf16.gmra.mrb[4].mxu0 %vm213_vm3, %v16169_v23 }
  0x69   : > { %13429 = vmatprep.mubr.msk.bf16.mxu0 %vm213_vm3, %v16171_v20 }
  0x70   : > { %13430 = vmatmul.mubr.msk.bf16.gmra.mrb[8].mxu0 %vm213_vm3, %v16177_v27 }
  0x71   : > { %13433 = vmatprep.mubr.msk.bf16.mxu0 %vm213_vm3, %v16179_v28 }
  0x78   : > { %13434 = vmatmul.mubr.msk.bf16.gmra.mrb[12].mxu0 %vm213_vm3, %v16185_v34 }
  0x79   : > { %13437 = vmatprep.mubr.msk.bf16.mxu0 %vm213_vm3, %v16187_v35 }
  0x80   : > { %13438 = vmatmul.mubr.msk.bf16.gmra.mrb[16].mxu0 %vm213_vm3, %v16193_v39 }
  0x81   : > { %13441 = vmatprep.mubr.msk.bf16.mxu0 %vm213_vm3, %v16195_v40 }
  0x88   : > { %13442 = vmatmul.mubr.msk.bf16.gmra.mrb[20].mxu0 %vm213_vm3, %v16201_v51 }
  0x89   : > { %13445 = vmatprep.mubr.msk.bf16.mxu0 %vm213_vm3, %v16203_v52 }
  0x90   : > { %13446 = vmatmul.mubr.msk.bf16.gmra.mrb[24].mxu0 %vm213_vm3, %v16216_v4 }
  0x91   : > { %13449 = vmatprep.mubr.msk.bf16.mxu0 %vm213_vm3, %v16218_v5 }
  0x98   : > { %13450 = vmatmul.mubr.msk.bf16.gmra.mrb[28].mxu0 %vm213_vm3, %v16230_v17 }
  0x99   : > { %13455 = vmatprep.mubr.msk.bf16.mxu0 %vm213_vm3, %v1012_v19  ;;  %v16275_v19 = vpack.c.bf16 %v1001_v15, %v1000_v10 }
  0xa0   : > { %13456 = vmatmul.mubr.msk.bf16.vlgmr.msra.gmra.mrb[0].mxu0 %vm213_vm3, %v16235_v30 }
  0xa1   : > { %13488 = vmatpush3.bf16.msra.mxu0 %v1373_v32  ;;  %13459 = vmatprep.mubr.msk.bf16.mxu0 %vm213_vm3, %v16237_v31  ;;  %v16281_v32 = vpack.c.bf16 %v1003_v22, %v1002_v21  ;;  %v2461_v21 = vld [vmem:[#allocation2 + $0xa9] sm:$0xff]  ;;  %v2462_v22 = vld [vmem:[#allocation2 + $0xb1] sm:$0xff] }
  0xa2   : > { %15763 = vmatprep.subr.msk.bf16.mxu0 %vm603_vm0, %v11912_v33  ;;  %v1305_v33 = vld [vmem:[#allocation2 + $0x188] sm:$0xff]  ;;  %v2488_v37 = vpack.c.bf16 %v2462_v22, %v2461_v21 }
  0xa8   : > { %13460 = vmatmul.mubr.msk.bf16.gmra.mrb[4].mxu0 %vm213_vm3, %v16249_v44 }
  0xa9   : > { %13463 = vmatprep.mubr.msk.bf16.mxu0 %vm213_vm3, %v16251_v14 }
  0xb0   : > { %13464 = vmatmul.mubr.msk.bf16.gmra.mrb[8].mxu0 %vm213_vm3, %v16257_v54 }
  0xb1   : > { %13467 = vmatprep.mubr.msk.bf16.mxu0 %vm213_vm3, %v16259_v57 }
  0xb8   : > { %13468 = vmatmul.mubr.msk.bf16.gmra.mrb[12].mxu0 %vm213_vm3, %v16265_v1 }
  0xb9   : > { %13471 = vmatprep.mubr.msk.bf16.mxu0 %vm213_vm3, %v16267_v7 }
  0xc0   : > { %13472 = vmatmul.mubr.msk.bf16.gmra.mrb[16].mxu0 %vm213_vm3, %v16273_v16 }
  0xc1   : > { %13475 = vmatprep.mubr.msk.bf16.mxu0 %vm213_vm3, %v16275_v19 }
  0xc8   : > { %13476 = vmatmul.mubr.msk.bf16.gmra.mrb[20].mxu0 %vm213_vm3, %v16281_v32 }
  0xc9   : > { %13479 = vmatprep.mubr.msk.bf16.mxu0 %vm213_vm3, %v16283_v36 }
  0xd0   : > { %13480 = vmatmul.mubr.msk.bf16.gmra.mrb[24].mxu0 %vm213_vm3, %v16289_v46 }
  0xd1   : > { %13483 = vmatprep.mubr.msk.bf16.mxu0 %vm213_vm3, %v16291_v47 }
  0xd8   : > { %13484 = vmatmul.mubr.msk.bf16.gmra.mrb[28].mxu0 %vm213_vm3, %v16301_v60 }
  0xd9   : > { %13489 = vmatprep.mubr.msk.bf16.mxu0 %vm213_vm3, %v16154_v11  ;;  %v1304_v11 = vld [vmem:[#allocation2 + $0x180] sm:$0xff] }
  0xda   : > { %v16340_v63 = vpack.c.bf16 %v1305_v33, %v1304_v11  ;;  %v2470_v11 = vld [vmem:[#allocation2 + $0x111] sm:$0xff]  ;;  %v2471_v33 = vld [vmem:[#allocation2 + $0x121] sm:$0xff] }
  0xe0   : > { %13490 = vmatmul.mubr.msk.bf16.vlgmr.msra.gmra.mrb[0].mxu0 %vm213_vm3, %v16156_v13 }
  0xe1   : > { %13522 = vmatpush3.bf16.msra.mxu0 %v1667_v0  ;;  %13493 = vmatprep.mubr.msk.bf16.mxu0 %vm213_vm3, %v16169_v23  ;;  %v2491_v0 = vpack.c.bf16 %v2468_v58, %v2467_v53 }
  0xe2   : > { %15764 = vmatprep.subr.msk.bf16.mxu0 %vm603_vm0, %v11929_v2  ;;  %v2469_v2 = vld [vmem:[#allocation2 + $0x109] sm:$0xff] }
  0xe8   : > { %13494 = vmatmul.mubr.msk.bf16.gmra.mrb[4].mxu0 %vm213_vm3, %v16171_v20 }
  0xe9   : > { %13497 = vmatprep.mubr.msk.bf16.mxu0 %vm213_vm3, %v16177_v27 }
  0xf0   : > { %13498 = vmatmul.mubr.msk.bf16.gmra.mrb[8].mxu0 %vm213_vm3, %v16179_v28 }
  0xf1   : > { %13501 = vmatprep.mubr.msk.bf16.mxu0 %vm213_vm3, %v16185_v34 }
  0xf8   : > { %13502 = vmatmul.mubr.msk.bf16.gmra.mrb[12].mxu0 %vm213_vm3, %v16187_v35 }
  0xf9   : > { %13505 = vmatprep.mubr.msk.bf16.mxu0 %vm213_vm3, %v16193_v39 }
 0x100   : > { %13506 = vmatmul.mubr.msk.bf16.gmra.mrb[16].mxu0 %vm213_vm3, %v16195_v40 }
 0x101   : > { %13509 = vmatprep.mubr.msk.bf16.mxu0 %vm213_vm3, %v16201_v51 }
 0x108   : > { %13510 = vmatmul.mubr.msk.bf16.gmra.mrb[20].mxu0 %vm213_vm3, %v16203_v52 }
 0x109   : > { %13513 = vmatprep.mubr.msk.bf16.mxu0 %vm213_vm3, %v16216_v4 }
 0x110   : > { %13514 = vmatmul.mubr.msk.bf16.gmra.mrb[24].mxu0 %vm213_vm3, %v16218_v5 }
 0x111   : > { %13517 = vmatprep.mubr.msk.bf16.mxu0 %vm213_vm3, %v16230_v17 }
 0x118   : > { %13518 = vmatmul.mubr.msk.bf16.gmra.mrb[28].mxu0 %vm213_vm3, %v16340_v63 }
 0x119   : > { %13523 = vmatprep.mubr.msk.bf16.mxu0 %vm213_vm3, %v15999_v12  ;;  %v1598_v12 = vld [vmem:[#allocation2 + $0x181] sm:$0xff] }
 0x120   : > { %13524 = vmatmul.mubr.msk.bf16.vlgmr.msra.gmra.mrb[0].mxu0 %vm213_vm3, %v16007_v18  ;;  %v1599_v18 = vld [vmem:[#allocation2 + $0x189] sm:$0xff] }
 0x121   : > { %13556 = vmatpush3.bf16.msra.mxu0 %v1961_v8  ;;  %13527 = vmatprep.mubr.msk.bf16.mxu0 %vm213_vm3, %v16038_v41  ;;  %v16379_v41 = vpack.c.bf16 %v1599_v18, %v1598_v12  ;;  %v2492_v8 = vpack.c.bf16 %v2470_v11, %v2469_v2  ;;  %v2481_v12 = vld [vmem:[#allocation2 + $0x199] sm:$0xff]  ;;  %v2482_v18 = vld [vmem:[#allocation2 + $0x1a1] sm:$0xff] }
 0x122   : > { %15765 = vmatprep.subr.msk.bf16.mxu0 %vm603_vm0, %v11946_v9 }
 0x128   : > { %13528 = vmatmul.mubr.msk.bf16.gmra.mrb[4].mxu0 %vm213_vm3, %v16052_v50  ;;  %v2256_v50 = vsel %vm603_vm0, %v11946_v9, 0 }
 0x129   : > { %13531 = vmatprep.mubr.msk.bf16.mxu0 %vm213_vm3, %v16090_v25  ;;  %v11963_v25 = vld [vmem:[%s18211_s1 + $0xe0] sm:$0xf] }
 0x130   : > { %13532 = vmatmul.mubr.msk.bf16.gmra.mrb[8].mxu0 %vm213_vm3, %v16097_v29  ;;  %v1892_v29 = vld [vmem:[#allocation2 + $0x182] sm:$0xff] }
 0x131   : > { %13535 = vmatprep.mubr.msk.bf16.mxu0 %vm213_vm3, %v16115_v42  ;;  %v1893_v42 = vld [vmem:[#allocation2 + $0x18a] sm:$0xff] }
 0x138   : > { %13536 = vmatmul.mubr.msk.bf16.gmra.mrb[12].mxu0 %vm213_vm3, %v16117_v43  ;;  %v16418_v43 = vpack.c.bf16 %v1893_v42, %v1892_v29 }
 0x139   : > { %13539 = vmatprep.mubr.msk.bf16.mxu0 %vm213_vm3, %v16123_v48  ;;  %v2550_v48 = vsel %vm603_vm0, %v11963_v25, 0 }
 0x140   : > { %13540 = vmatmul.mubr.msk.bf16.gmra.mrb[16].mxu0 %vm213_vm3, %v16125_v49  ;;  %v11980_v49 = vld [vmem:[%s18211_s1 + $0x100] sm:$0xf] }
 0x141   : > { %13543 = vmatprep.mubr.msk.bf16.mxu0 %vm213_vm3, %v16131_v55  ;;  %v2187_v55 = vld [vmem:[#allocation2 + $0x198] sm:$0xff] }
 0x148   : > { %13544 = vmatmul.mubr.msk.bf16.gmra.mrb[20].mxu0 %vm213_vm3, %v16133_v56  ;;  %v2188_v56 = vld [vmem:[#allocation2 + $0x1a0] sm:$0xff] }
 0x149   : > { %13547 = vmatprep.mubr.msk.bf16.mxu0 %vm213_vm3, %v16139_v61 }
 0x150   : > { %13548 = vmatmul.mubr.msk.bf16.gmra.mrb[24].mxu0 %vm213_vm3, %v16141_v62 }
 0x151   : > { %13551 = vmatprep.mubr.msk.bf16.mxu0 %vm213_vm3, %v16147_v3 }
 0x158   : > { %13552 = vmatmul.mubr.msk.bf16.gmra.mrb[28].mxu0 %vm213_vm3, %v16379_v41 }
 0x159   : > { %13557 = vmatprep.mubr.msk.bf16.mxu0 %vm213_vm3, %v16235_v30  ;;  %v2460_v30 = vld [vmem:[#allocation2 + $0x99] sm:$0xff] }
 0x160   : > { %13558 = vmatmul.mubr.msk.bf16.vlgmr.msra.gmra.mrb[0].mxu0 %vm213_vm3, %v16237_v31 }
 0x161   : > { %13590 = vmatpush3.bf16.msra.mxu0 %v2256_v50  ;;  %13561 = vmatprep.mubr.msk.bf16.mxu0 %vm213_vm3, %v16249_v44  ;;  %v2498_v50 = vpack.c.bf16 %v2482_v18, %v2481_v12  ;;  %v15784_v18 = vld [vmem:[%s18211_s1 + $0x138] sm:$0xff]  }
 0x162   : > { %15766 = vmatprep.subr.msk.bf16.mxu0 %vm603_vm0, %v11963_v25 }
 0x168   : > { %13562 = vmatmul.mubr.msk.bf16.gmra.mrb[4].mxu0 %vm213_vm3, %v16251_v14 }
 0x169   : > { %13565 = vmatprep.mubr.msk.bf16.mxu0 %vm213_vm3, %v16257_v54 }
 0x170   : > { %13566 = vmatmul.mubr.msk.bf16.gmra.mrb[8].mxu0 %vm213_vm3, %v16259_v57 }
 0x171   : > { %13569 = vmatprep.mubr.msk.bf16.mxu0 %vm213_vm3, %v16265_v1 }
 0x178   : > { %13570 = vmatmul.mubr.msk.bf16.gmra.mrb[12].mxu0 %vm213_vm3, %v16267_v7 }
 0x179   : > { %13573 = vmatprep.mubr.msk.bf16.mxu0 %vm213_vm3, %v16273_v16 }
 0x180   : > { %13574 = vmatmul.mubr.msk.bf16.gmra.mrb[16].mxu0 %vm213_vm3, %v16275_v19 }
 0x181   : > { %13577 = vmatprep.mubr.msk.bf16.mxu0 %vm213_vm3, %v16281_v32 }
 0x188   : > { %13578 = vmatmul.mubr.msk.bf16.gmra.mrb[20].mxu0 %vm213_vm3, %v16283_v36 }
 0x189   : > { %13581 = vmatprep.mubr.msk.bf16.mxu0 %vm213_vm3, %v16289_v46 }
 0x190   : > { %13582 = vmatmul.mubr.msk.bf16.gmra.mrb[24].mxu0 %vm213_vm3, %v16291_v47 }
 0x191   : > { %13585 = vmatprep.mubr.msk.bf16.mxu0 %vm213_vm3, %v16301_v60 }
 0x198   : > { %13586 = vmatmul.mubr.msk.bf16.gmra.mrb[28].mxu0 %vm213_vm3, %v16418_v43 }
 0x199   : > { %13591 = vmatprep.mubr.msk.bf16.mxu0 %vm213_vm3, %v16156_v13  ;;  %v2451_v13 = vld [vmem:[#allocation2 + $0x31] sm:$0xff] }
 0x1a0   : > { %13592 = vmatmul.mubr.msk.bf16.vlgmr.msra.gmra.mrb[0].mxu0 %vm213_vm3, %v16169_v23  ;;  %v2452_v23 = vld [vmem:[#allocation2 + $0x39] sm:$0xff] }
 0x1a1   : > { %13624 = vmatpush3.bf16.msra.mxu0 %v2550_v48  ;;  %13595 = vmatprep.mubr.msk.bf16.mxu0 %vm213_vm3, %v16171_v20  ;;  %v2204_v20 = vpack.c.bf16 %v2188_v56, %v2187_v55 }
 0x1a2   : > { %15767 = vmatprep.subr.msk.bf16.mxu0 %vm603_vm0, %v11980_v49 }
 0x1a8   : > { %13596 = vmatmul.mubr.msk.bf16.gmra.mrb[4].mxu0 %vm213_vm3, %v16177_v27  ;;  %v2483_v27 = vpack.c.bf16 %v2452_v23, %v2451_v13 }
 0x1a9   : > { %13599 = vmatprep.mubr.msk.bf16.mxu0 %vm213_vm3, %v16179_v28  ;;  %v2453_v28 = vld [vmem:[#allocation2 + $0x49] sm:$0xff] }
 0x1b0   : > { %13600 = vmatmul.mubr.msk.bf16.gmra.mrb[8].mxu0 %vm213_vm3, %v16185_v34  ;;  %v2454_v34 = vld [vmem:[#allocation2 + $0x51] sm:$0xff] }
 0x1b1   : > { %13603 = vmatprep.mubr.msk.bf16.mxu0 %vm213_vm3, %v16187_v35  ;;  %v2455_v35 = vld [vmem:[#allocation2 + $0x61] sm:$0xff] }
 0x1b8   : > { %13604 = vmatmul.mubr.msk.bf16.gmra.mrb[12].mxu0 %vm213_vm3, %v16193_v39  ;;  %v2456_v39 = vld [vmem:[#allocation2 + $0x69] sm:$0xff] }
 0x1b9   : > { %13607 = vmatprep.mubr.msk.bf16.mxu0 %vm213_vm3, %v16195_v40  ;;  %v2484_v40 = vpack.c.bf16 %v2454_v34, %v2453_v28 }
 0x1c0   : > { %13608 = vmatmul.mubr.msk.bf16.gmra.mrb[16].mxu0 %vm213_vm3, %v16201_v51  ;;  %v2485_v51 = vpack.c.bf16 %v2456_v39, %v2455_v35 }
 0x1c1   : > { %13611 = vmatprep.mubr.msk.bf16.mxu0 %vm213_vm3, %v16203_v52  ;;  %v2844_v52 = vsel %vm603_vm0, %v11980_v49, 0 }
 0x1c8   : > { %13612 = vmatmul.mubr.msk.bf16.gmra.mrb[20].mxu0 %vm213_vm3, %v16216_v4  ;;  %v2457_v4 = vld [vmem:[#allocation2 + $0x79] sm:$0xff] }
 0x1c9   : > { %13615 = vmatprep.mubr.msk.bf16.mxu0 %vm213_vm3, %v16218_v5  ;;  %v2458_v5 = vld [vmem:[#allocation2 + $0x81] sm:$0xff] }
 0x1ca   : > { %v2486_v10 = vpack.c.bf16 %v2458_v5, %v2457_v4 }
 0x1d0   : > { %13616 = vmatmul.mubr.msk.bf16.gmra.mrb[24].mxu0 %vm213_vm3, %v16230_v17  ;;  %v2459_v17 = vld [vmem:[#allocation2 + $0x91] sm:$0xff] }
 0x1d1   : > { %13619 = vmatprep.mubr.msk.bf16.mxu0 %vm213_vm3, %v16340_v63  ;;  %v2487_v15 = vpack.c.bf16 %v2460_v30, %v2459_v17  ;;  %v2472_v63 = vld [vmem:[#allocation2 + $0x129] sm:$0xff] }
 0x1d2   : > { %v2493_v9 = vpack.c.bf16 %v2472_v63, %v2471_v33 }
 0x1d8   : > { %13620 = vmatmul.mubr.msk.bf16.gmra.mrb[28].mxu0 %vm213_vm3, %v2204_v20 }
 0x1d9   : > { %13625 = vmatprep.mubr.msk.bf16.mxu0 %vm213_vm3, %v2483_v27 }
 0x1e0   : > { %13626 = vmatmul.mubr.msk.bf16.vlgmr.msra.gmra.mrb[0].mxu0 %vm213_vm3, %v2484_v40 }
 0x1e1   : > { %13658 = vmatpush3.bf16.msra.mxu0 %v2844_v52  ;;  %13629 = vmatprep.mubr.msk.bf16.mxu0 %vm213_vm3, %v2485_v51 }
 0x1e8   : > { %13630 = vmatmul.mubr.msk.bf16.gmra.mrb[4].mxu0 %vm213_vm3, %v2486_v10 }
 0x1e9   : > { %13633 = vmatprep.mubr.msk.bf16.mxu0 %vm213_vm3, %v2487_v15  ;;  %v15782_v15 = vld [vmem:[%s18211_s1 + $0x128] sm:$0xff]  }
 0x1f0   : > { %13634 = vmatmul.mubr.msk.bf16.gmra.mrb[8].mxu0 %vm213_vm3, %v2488_v37 }
 0x1f1   : > { %13637 = vmatprep.mubr.msk.bf16.mxu0 %vm213_vm3, %v2489_v38 }
 0x1f8   : > { %13638 = vmatmul.mubr.msk.bf16.gmra.mrb[12].mxu0 %vm213_vm3, %v2490_v59  ;;  %v15783_v59 = vld [vmem:[%s18211_s1 + $0x130] sm:$0xff]  }
 0x1f9   : > { %13641 = vmatprep.mubr.msk.bf16.mxu0 %vm213_vm3, %v2491_v0 }
 0x200   : > { %13642 = vmatmul.mubr.msk.bf16.gmra.mrb[16].mxu0 %vm213_vm3, %v2492_v8 }
 0x201   : > { %13645 = vmatprep.mubr.msk.bf16.mxu0 %vm213_vm3, %v2493_v9 }
 0x208   : > { %13646 = vmatmul.mubr.msk.bf16.gmra.mrb[20].mxu0 %vm213_vm3, %v16139_v61  ;;  %v2775_v61 = vld [vmem:[#allocation2 + $0x19a] sm:$0xff] }
 0x209   : > { %13649 = vmatprep.mubr.msk.bf16.mxu0 %vm213_vm3, %v16141_v62  ;;  %v2776_v62 = vld [vmem:[#allocation2 + $0x1a2] sm:$0xff] }
 0x210   : > { %13650 = vmatmul.mubr.msk.bf16.gmra.mrb[24].mxu0 %vm213_vm3, %v16147_v3  ;;  %v2792_v3 = vpack.c.bf16 %v2776_v62, %v2775_v61 }
 0x211   : > { %13653 = vmatprep.mubr.msk.bf16.mxu0 %vm213_vm3, %v16379_v41 }
 0x218   : > { %13654 = vmatmul.mubr.msk.bf16.gmra.mrb[28].mxu0 %vm213_vm3, %v2498_v50 }
 0x219   : > { %13659 = vmatprep.mubr.msk.bf16.mxu0 %vm213_vm3, %v16237_v31  ;;  %v15777_v31 = vld [vmem:[%s18211_s1 + $0x140] sm:$0xff]  }
 0x21a   : > { %13691 = vmatprep.subr.bf16.mxu1 %v15777_v31 }
 0x21b   : > { %13692 = vmatpush3.bf16.msra.mxu1 %v15777_v31 }
 0x220   : > { %13660 = vmatmul.mubr.msk.bf16.vlgmr.msra.gmra.mrb[0].mxu0 %vm213_vm3, %v16249_v44  ;;  %v15778_v44 = vld [vmem:[%s18211_s1 + $0x148] sm:$0xff]  }
 0x221   : > { %13663 = vmatprep.mubr.msk.bf16.mxu0 %vm213_vm3, %v16251_v14  ;;  %13693 = vmatprep.subr.bf16.mxu1 %v15778_v44  ;;  %v15779_v14 = vld [vmem:[%s18211_s1 + $0x150] sm:$0xff]  }
 0x222   : > { %13694 = vmatpush3.bf16.msra.mxu1 %v15778_v44 }
 0x223   : > { %13695 = vmatprep.subr.bf16.mxu1 %v15779_v14 }
 0x226   : > { %13696 = vmatpush3.bf16.msra.mxu1 %v15779_v14 }
 0x228   : > { %13664 = vmatmul.mubr.msk.bf16.gmra.mrb[4].mxu0 %vm213_vm3, %v16257_v54  ;;  %v15780_v54 = vld [vmem:[%s18211_s1 + $0x158] sm:$0xff]  }
 0x229   : > { %13667 = vmatprep.mubr.msk.bf16.mxu0 %vm213_vm3, %v16259_v57  ;;  %13697 = vmatprep.subr.bf16.mxu1 %v15780_v54  ;;  %v3199_v57 = vld [vmem:[#allocation2 + $0x1] sm:$0xff] }
 0x22a   : > { %13698 = vmatpush3.bf16.msra.mxu1 %v15780_v54 }
 0x230   : > { %13668 = vmatmul.mubr.msk.bf16.gmra.mrb[8].mxu0 %vm213_vm3, %v16265_v1  ;;  %v3200_v1 = vld [vmem:[#allocation2 + $0x9] sm:$0xff] }
 0x231   : > { %13671 = vmatprep.mubr.msk.bf16.mxu0 %vm213_vm3, %v16267_v7  ;;  %v3231_v7 = vpack.c.bf16 %v3200_v1, %v3199_v57 }
 0x233   : > { %13699 = vmatprep.mubr.msk.bf16.mxu1 %vm172_vm1, %v3231_v7  ;;  %v16587_v7 = vld [vmem:[%s18211_s1 + $0x160] sm:$0xff]  }
 0x238   : > { %13672 = vmatmul.mubr.msk.bf16.gmra.mrb[12].mxu0 %vm213_vm3, %v16273_v16  ;;  %v15781_v16 = vld [vmem:[%s18211_s1 + $0x120] sm:$0xff]  }
 0x239   : > { %13675 = vmatprep.mubr.msk.bf16.mxu0 %vm213_vm3, %v16275_v19  ;;  %13731 = vmatprep.subr.bf16.mxu1 %v15781_v16  ;;  %v16529_v19 = vld [vmem:[%s18212_s2] ss:$0 sm:$0xff] }
 0x240   : > { %13676 = vmatmul.mubr.msk.bf16.gmra.mrb[16].mxu0 %vm213_vm3, %v16281_v32 }
 0x241   : > { %13679 = vmatprep.mubr.msk.bf16.mxu0 %vm213_vm3, %v16283_v36 }
 0x248   : > { %13680 = vmatmul.mubr.msk.bf16.gmra.mrb[20].mxu0 %vm213_vm3, %v16289_v46 }
 0x249   : > { %13683 = vmatprep.mubr.msk.bf16.mxu0 %vm213_vm3, %v16291_v47 }
 0x250   : > { %13684 = vmatmul.mubr.msk.bf16.gmra.mrb[24].mxu0 %vm213_vm3, %v16301_v60 }
 0x251   : > { %13687 = vmatprep.mubr.msk.bf16.mxu0 %vm213_vm3, %v16418_v43 }
 0x258   : > { %13688 = vmatmul.mubr.msk.bf16.gmra.mrb[28].mxu0 %vm213_vm3, %v2792_v3 }
 0x2f3   : > { %v13661_v32 = vpop.f32.mrb[0].mxu0 }
 0x2f4   : > { %v3048_v36 = vadd.f32 %v13661_v32, %v16529_v19  ;;  %v2880_v46 = vpop.f32.mrb[1].mxu0 }
 0x2f5   : > { %v3046_v47 = vadd.f32 %v16529_v19, %v2880_v46  ;;  %v13662_v60 = vpop.f32.mrb[2].mxu0 }
 0x2f6   : > { %v3080_v41 = vmax.f32 %v3048_v36, 0.0  ;;  %v3049_v25 = vadd.f32 %v13662_v60, %v16529_v19  ;;  %v2883_v29 = vpop.f32.mrb[3].mxu0 }
 0x2f7   : > { %v3078_v42 = vmax.f32 %v3046_v47, 0.0  ;;  %v3047_v43 = vadd.f32 %v16529_v19, %v2883_v29 }
 0x2f8   : > { %3112 = vst.msk [vmem:[#allocation2 + $0x31] sm:$0xff] %vm172_vm1, %v3080_v41  ;;  %v3081_v48 = vmax.f32 %v3049_v25, 0.0 }
 0x2f9   : > { %3110 = vst.msk [vmem:[#allocation2 + $0x19] sm:$0xff] %vm172_vm1, %v3078_v42  ;;  %v3079_v49 = vmax.f32 %v3047_v43, 0.0 }
 0x2fa   : > { %3113 = vst.msk [vmem:[#allocation2 + $0x39] sm:$0xff] %vm172_vm1, %v3081_v48 }
 0x2fb   : > { %3111 = vst.msk [vmem:[#allocation2 + $0x21] sm:$0xff] %vm172_vm1, %v3079_v49  ;;  %v13665_v55 = vpop.f32.mrb[4].mxu0 }
 0x2fc   : > { %v3052_v56 = vadd.f32 %v13665_v55, %v16529_v19  ;;  %v2896_v13 = vpop.f32.mrb[5].mxu0 }
 0x2fd   : > { %v3050_v23 = vadd.f32 %v16529_v19, %v2896_v13  ;;  %v13666_v20 = vpop.f32.mrb[6].mxu0 }
 0x2fe   : > { %v3084_v27 = vmax.f32 %v3052_v56, 0.0  ;;  %v3053_v28 = vadd.f32 %v13666_v20, %v16529_v19  ;;  %v2899_v34 = vpop.f32.mrb[7].mxu0 }
 0x2ff   : > { %v3082_v35 = vmax.f32 %v3050_v23, 0.0  ;;  %v3051_v39 = vadd.f32 %v16529_v19, %v2899_v34  ;;  %v3203_v10 = vld [vmem:[#allocation2 + $0x31] sm:$0xff] }
 0x300   : > { %3116 = vst.msk [vmem:[#allocation2 + $0x61] sm:$0xff] %vm172_vm1, %v3084_v27  ;;  %v3085_v40 = vmax.f32 %v3053_v28, 0.0  ;;  %v3201_v4 = vld [vmem:[#allocation2 + $0x19] sm:$0xff] }
 0x301   : > { %3114 = vst.msk [vmem:[#allocation2 + $0x49] sm:$0xff] %vm172_vm1, %v3082_v35  ;;  %v3083_v51 = vmax.f32 %v3051_v39, 0.0  ;;  %v3204_v52 = vld [vmem:[#allocation2 + $0x39] sm:$0xff] }
 0x302   : > { %3117 = vst.msk [vmem:[#allocation2 + $0x69] sm:$0xff] %vm172_vm1, %v3085_v40  ;;  %v3202_v5 = vld [vmem:[#allocation2 + $0x21] sm:$0xff]  ;;  %v16553_v24 = vpack.c.bf16 %v3204_v52, %v3203_v10 }
 0x303   : > { %3115 = vst.msk [vmem:[#allocation2 + $0x51] sm:$0xff] %vm172_vm1, %v3083_v51  ;;  %v13669_v17 = vpop.f32.mrb[8].mxu0  ;;  %v16547_v30 = vpack.c.bf16 %v3202_v5, %v3201_v4 }
 0x304   : > { %v3056_v21 = vadd.f32 %v13669_v17, %v16529_v19  ;;  %v2912_v22 = vpop.f32.mrb[9].mxu0 }
 0x305   : > { %v3054_v26 = vadd.f32 %v16529_v19, %v2912_v22  ;;  %v13670_v37 = vpop.f32.mrb[10].mxu0  ;;  %13700 = vmatmul.mubr.msk.bf16.vlgmr.msra.gmra.mrb[0].mxu1 %vm172_vm1, %v16547_v30 }
 0x306   : > { %v3088_v38 = vmax.f32 %v3056_v21, 0.0  ;;  %v3057_v6 = vadd.f32 %v13670_v37, %v16529_v19  ;;  %13732 = vmatpush3.bf16.msra.mxu1 %v15781_v16  ;;  %v2915_v45 = vpop.f32.mrb[11].mxu0  ;;  %13703 = vmatprep.mubr.msk.bf16.mxu1 %vm172_vm1, %v16553_v24 }
 0x307   : > { %v3086_v53 = vmax.f32 %v3054_v26, 0.0  ;;  %v3055_v58 = vadd.f32 %v16529_v19, %v2915_v45  ;;  %13733 = vmatprep.subr.bf16.mxu1 %v15782_v15  ;;  %v3207_v12 = vld [vmem:[#allocation2 + $0x61] sm:$0xff] }
 0x308   : > { %3120 = vst.msk [vmem:[#allocation2 + $0x91] sm:$0xff] %vm172_vm1, %v3088_v38  ;;  %v3089_v0 = vmax.f32 %v3057_v6, 0.0  ;;  %v3205_v33 = vld [vmem:[#allocation2 + $0x49] sm:$0xff] }
 0x309   : > { %3118 = vst.msk [vmem:[#allocation2 + $0x79] sm:$0xff] %vm172_vm1, %v3086_v53  ;;  %v3087_v2 = vmax.f32 %v3055_v58, 0.0  ;;  %v3208_v11 = vld [vmem:[#allocation2 + $0x69] sm:$0xff] }
 0x30a   : > { %3121 = vst.msk [vmem:[#allocation2 + $0x99] sm:$0xff] %vm172_vm1, %v3089_v0  ;;  %v3206_v63 = vld [vmem:[#allocation2 + $0x51] sm:$0xff]  ;;  %13734 = vmatpush3.bf16.msra.mxu1 %v15782_v15  ;;  %v16575_v62 = vpack.c.bf16 %v3208_v11, %v3207_v12 }
 0x30b   : > { %3119 = vst.msk [vmem:[#allocation2 + $0x81] sm:$0xff] %vm172_vm1, %v3087_v2  ;;  %v13673_v8 = vpop.f32.mrb[12].mxu0  ;;  %v16569_v9 = vpack.c.bf16 %v3206_v63, %v3205_v33  ;;  %13735 = vmatprep.subr.bf16.mxu1 %v15783_v59 }
 0x30c   : > { %v3060_v50 = vadd.f32 %v13673_v8, %v16529_v19  ;;  %v2928_v61 = vpop.f32.mrb[13].mxu0 }
 0x30d   : > { %v3058_v3 = vadd.f32 %v16529_v19, %v2928_v61  ;;  %v13674_v31 = vpop.f32.mrb[14].mxu0  ;;  %13704 = vmatmul.mubr.msk.bf16.gmra.mrb[4].mxu1 %vm172_vm1, %v16569_v9 }
 0x30e   : > { %v3092_v44 = vmax.f32 %v3060_v50, 0.0  ;;  %v3061_v14 = vadd.f32 %v13674_v31, %v16529_v19  ;;  %v2931_v54 = vpop.f32.mrb[15].mxu0  ;;  %13707 = vmatprep.mubr.msk.bf16.mxu1 %vm172_vm1, %v16575_v62  ;;  %13736 = vmatpush3.bf16.msra.mxu1 %v15783_v59 }
 0x30f   : > { %v3090_v57 = vmax.f32 %v3058_v3, 0.0  ;;  %v3059_v1 = vadd.f32 %v16529_v19, %v2931_v54  ;;  %13737 = vmatprep.subr.bf16.mxu1 %v15784_v18  ;;  %v3211_v25 = vld [vmem:[#allocation2 + $0x91] sm:$0xff] }
 0x310   : > { %3124 = vst.msk [vmem:[#allocation2 + $0xc1] sm:$0xff] %vm172_vm1, %v3092_v44  ;;  %v3093_v16 = vmax.f32 %v3061_v14, 0.0  ;;  %v3209_v46 = vld [vmem:[#allocation2 + $0x79] sm:$0xff] }
 0x311   : > { %3122 = vst.msk [vmem:[#allocation2 + $0xa9] sm:$0xff] %vm172_vm1, %v3090_v57  ;;  %v3091_v32 = vmax.f32 %v3059_v1, 0.0  ;;  %v3212_v36 = vld [vmem:[#allocation2 + $0x99] sm:$0xff] }
 0x312   : > { %3125 = vst.msk [vmem:[#allocation2 + $0xc9] sm:$0xff] %vm172_vm1, %v3093_v16  ;;  %v3210_v47 = vld [vmem:[#allocation2 + $0x81] sm:$0xff]  ;;  %13738 = vmatpush3.bf16.msra.mxu1 %v15784_v18  ;;  %v16597_v43 = vpack.c.bf16 %v3212_v36, %v3211_v25 }
 0x313   : > { %3123 = vst.msk [vmem:[#allocation2 + $0xb1] sm:$0xff] %vm172_vm1, %v3091_v32  ;;  %v13677_v60 = vpop.f32.mrb[16].mxu0  ;;  %v16593_v41 = vpack.c.bf16 %v3210_v47, %v3209_v46  ;;  %13771 = vmatprep.subr.bf16.mxu1 %v16587_v7 }
 0x314   : > { %v3064_v29 = vadd.f32 %v13677_v60, %v16529_v19  ;;  %v2944_v42 = vpop.f32.mrb[17].mxu0 }
 0x315   : > { %v3062_v48 = vadd.f32 %v16529_v19, %v2944_v42  ;;  %v13678_v49 = vpop.f32.mrb[18].mxu0  ;;  %13708 = vmatmul.mubr.msk.bf16.gmra.mrb[8].mxu1 %vm172_vm1, %v16593_v41 }
 0x316   : > { %v3096_v55 = vmax.f32 %v3064_v29, 0.0  ;;  %v3065_v56 = vadd.f32 %v13678_v49, %v16529_v19  ;;  %v2947_v13 = vpop.f32.mrb[19].mxu0  ;;  %13711 = vmatprep.mubr.msk.bf16.mxu1 %vm172_vm1, %v16597_v43 }
 0x317   : > { %v3094_v23 = vmax.f32 %v3062_v48, 0.0  ;;  %v3063_v20 = vadd.f32 %v16529_v19, %v2947_v13  ;;  %v3215_v52 = vld [vmem:[#allocation2 + $0xc1] sm:$0xff] }
 0x318   : > { %3128 = vst.msk [vmem:[#allocation2 + $0xf1] sm:$0xff] %vm172_vm1, %v3096_v55  ;;  %v3097_v27 = vmax.f32 %v3065_v56, 0.0  ;;  %v3213_v35 = vld [vmem:[#allocation2 + $0xa9] sm:$0xff] }
 0x319   : > { %3126 = vst.msk [vmem:[#allocation2 + $0xd9] sm:$0xff] %vm172_vm1, %v3094_v23  ;;  %v3095_v28 = vmax.f32 %v3063_v20, 0.0  ;;  %v3216_v34 = vld [vmem:[#allocation2 + $0xc9] sm:$0xff] }
 0x31a   : > { %3129 = vst.msk [vmem:[#allocation2 + $0xf9] sm:$0xff] %vm172_vm1, %v3097_v27  ;;  %v3214_v39 = vld [vmem:[#allocation2 + $0xb1] sm:$0xff]  ;;  %v16613_v17 = vpack.c.bf16 %v3216_v34, %v3215_v52  ;;  %v3143_v52 = vld [vmem:[#allocation2 + $0x8] sm:$0xff] }
 0x31b   : > { %3127 = vst.msk [vmem:[#allocation2 + $0xe1] sm:$0xff] %vm172_vm1, %v3095_v28  ;;  %v13681_v40 = vpop.f32.mrb[20].mxu0  ;;  %v16610_v51 = vpack.c.bf16 %v3214_v39, %v3213_v35 }
 0x31c   : > { %v3068_v4 = vadd.f32 %v13681_v40, %v16529_v19  ;;  %v2960_v5 = vpop.f32.mrb[21].mxu0 }
 0x31d   : > { %v3066_v10 = vadd.f32 %v16529_v19, %v2960_v5  ;;  %v13682_v15 = vpop.f32.mrb[22].mxu0  ;;  %13712 = vmatmul.mubr.msk.bf16.gmra.mrb[12].mxu1 %vm172_vm1, %v16610_v51 }
 0x31e   : > { %v3100_v21 = vmax.f32 %v3068_v4, 0.0  ;;  %v3069_v22 = vadd.f32 %v13682_v15, %v16529_v19  ;;  %v2963_v26 = vpop.f32.mrb[23].mxu0  ;;  %13715 = vmatprep.mubr.msk.bf16.mxu1 %vm172_vm1, %v16613_v17 }
 0x31f   : > { %v3098_v37 = vmax.f32 %v3066_v10, 0.0  ;;  %v3067_v38 = vadd.f32 %v16529_v19, %v2963_v26  ;;  %v3219_v11 = vld [vmem:[#allocation2 + $0xf1] sm:$0xff] }
 0x320   : > { %3132 = vst.msk [vmem:[#allocation2 + $0x121] sm:$0xff] %vm172_vm1, %v3100_v21  ;;  %v3101_v6 = vmax.f32 %v3069_v22, 0.0  ;;  %v3217_v58 = vld [vmem:[#allocation2 + $0xd9] sm:$0xff] }
 0x321   : > { %3130 = vst.msk [vmem:[#allocation2 + $0x109] sm:$0xff] %vm172_vm1, %v3098_v37  ;;  %v3099_v45 = vmax.f32 %v3067_v38, 0.0  ;;  %v3220_v53 = vld [vmem:[#allocation2 + $0xf9] sm:$0xff]  ;;  %v3146_v38 = vld [vmem:[#allocation2 + $0x30] sm:$0xff] }
 0x322   : > { %3133 = vst.msk [vmem:[#allocation2 + $0x129] sm:$0xff] %vm172_vm1, %v3101_v6  ;;  %v3218_v59 = vld [vmem:[#allocation2 + $0xe1] sm:$0xff]  ;;  %v16629_v8 = vpack.c.bf16 %v3220_v53, %v3219_v11  ;;  %v3147_v22 = vld [vmem:[#allocation2 + $0x38] sm:$0xff]  ;;  %v15787_v53 = vld [vmem:[%s18211_s1 + $0x170] sm:$0xff]  }
 0x323   : > { %3131 = vst.msk [vmem:[#allocation2 + $0x111] sm:$0xff] %vm172_vm1, %v3099_v45  ;;  %v13685_v0 = vpop.f32.mrb[24].mxu0  ;;  %v16626_v2 = vpack.c.bf16 %v3218_v59, %v3217_v58  ;;  %v3145_v21 = vld [vmem:[#allocation2 + $0x20] sm:$0xff]  ;;  %v3144_v26 = vld [vmem:[#allocation2 + $0x18] sm:$0xff]  ;;  %v15786_v6 = vld [vmem:[%s18211_s1 + $0x168] sm:$0xff]   ;;  %v16676_v45 = vpack.c.bf16 %v3147_v22, %v3146_v38 }
 0x324   : > { %v3072_v33 = vadd.f32 %v13685_v0, %v16529_v19  ;;  %v2976_v63 = vpop.f32.mrb[25].mxu0  ;;  %v16671_v37 = vpack.c.bf16 %v3145_v21, %v3144_v26  ;;  %v3149_v58 = vld [vmem:[#allocation2 + $0x50] sm:$0xff]  ;;  %v3151_v59 = vld [vmem:[#allocation2 + $0x68] sm:$0xff]  ;;  %v3724_v38 = vld [vmem:[#allocation2 + $0x1a] sm:$0xff] }
 0x325   : > { %v3070_v12 = vadd.f32 %v16529_v19, %v2976_v63  ;;  %v13686_v18 = vpop.f32.mrb[26].mxu0  ;;  %13716 = vmatmul.mubr.msk.bf16.gmra.mrb[16].mxu1 %vm172_vm1, %v16626_v2  ;;  %v3148_v0 = vld [vmem:[#allocation2 + $0x48] sm:$0xff] }
 0x326   : > { %v3104_v50 = vmax.f32 %v3072_v33, 0.0  ;;  %v3073_v61 = vadd.f32 %v13686_v18, %v16529_v19  ;;  %v2979_v3 = vpop.f32.mrb[27].mxu0  ;;  %13719 = vmatprep.mubr.msk.bf16.mxu1 %vm172_vm1, %v16629_v8  ;;  %v16686_v11 = vpack.c.bf16 %v3149_v58, %v3148_v0  ;;  %v3150_v33 = vld [vmem:[#allocation2 + $0x60] sm:$0xff]  ;;  %v15790_v0 = vld [vmem:[%s18211_s1 + $0x188] sm:$0xff]  }
 0x327   : > { %v3102_v31 = vmax.f32 %v3070_v12, 0.0  ;;  %v3071_v44 = vadd.f32 %v16529_v19, %v2979_v3  ;;  %v3223_v46 = vld [vmem:[#allocation2 + $0x121] sm:$0xff]  ;;  %v16691_v63 = vpack.c.bf16 %v3151_v59, %v3150_v33 }
 0x328   : > { %3136 = vst.msk [vmem:[#allocation2 + $0x151] sm:$0xff] %vm172_vm1, %v3104_v50  ;;  %v3105_v14 = vmax.f32 %v3073_v61, 0.0  ;;  %v3221_v1 = vld [vmem:[#allocation2 + $0x109] sm:$0xff]  ;;  %v15789_v12 = vld [vmem:[%s18211_s1 + $0x180] sm:$0xff]   ;;  %v3155_v50 = vld [vmem:[#allocation2 + $0x98] sm:$0xff] }
 0x329   : > { %3134 = vst.msk [vmem:[#allocation2 + $0x139] sm:$0xff] %vm172_vm1, %v3102_v31  ;;  %v3103_v54 = vmax.f32 %v3071_v44, 0.0  ;;  %v3224_v57 = vld [vmem:[#allocation2 + $0x129] sm:$0xff]  ;;  %v3153_v18 = vld [vmem:[#allocation2 + $0x80] sm:$0xff]  ;;  %v3152_v61 = vld [vmem:[#allocation2 + $0x78] sm:$0xff] }
 0x32a   : > { %3137 = vst.msk [vmem:[#allocation2 + $0x159] sm:$0xff] %vm172_vm1, %v3105_v14  ;;  %v3222_v16 = vld [vmem:[#allocation2 + $0x111] sm:$0xff]  ;;  %v16645_v25 = vpack.c.bf16 %v3224_v57, %v3223_v46  ;;  %v16700_v3 = vpack.c.bf16 %v3153_v18, %v3152_v61  ;;  %v3156_v57 = vld [vmem:[#allocation2 + $0xa8] sm:$0xff]  ;;  %v3161_v46 = vld [vmem:[#allocation2 + $0xe0] sm:$0xff] }
 0x32b   : > { %3135 = vst.msk [vmem:[#allocation2 + $0x141] sm:$0xff] %vm172_vm1, %v3103_v54  ;;  %v13689_v32 = vpop.f32.mrb[28].mxu0  ;;  %v16642_v36 = vpack.c.bf16 %v3222_v16, %v3221_v1  ;;  %v3154_v31 = vld [vmem:[#allocation2 + $0x90] sm:$0xff]  ;;  %v3159_v54 = vld [vmem:[#allocation2 + $0xc8] sm:$0xff]  ;;  %v3158_v16 = vld [vmem:[#allocation2 + $0xc0] sm:$0xff] }
 0x32c   : > { %v3076_v47 = vadd.f32 %v13689_v32, %v16529_v19  ;;  %v2992_v60 = vpop.f32.mrb[29].mxu0  ;;  %v16702_v44 = vpack.c.bf16 %v3155_v50, %v3154_v31  ;;  %v3157_v14 = vld [vmem:[#allocation2 + $0xb0] sm:$0xff]  ;;  %v16710_v32 = vpack.c.bf16 %v3159_v54, %v3158_v16  ;;  %v3727_v58 = vld [vmem:[#allocation2 + $0x3a] sm:$0xff]  ;;  %v3730_v61 = vld [vmem:[#allocation2 + $0x62] sm:$0xff] }
 0x32d   : > { %v3074_v29 = vadd.f32 %v16529_v19, %v2992_v60  ;;  %v13690_v42 = vpop.f32.mrb[30].mxu0  ;;  %13720 = vmatmul.mubr.msk.bf16.gmra.mrb[20].mxu1 %vm172_vm1, %v16642_v36  ;;  %v16708_v1 = vpack.c.bf16 %v3157_v14, %v3156_v57  ;;  %v3160_v60 = vld [vmem:[#allocation2 + $0xd8] sm:$0xff]  ;;  %v3728_v18 = vld [vmem:[#allocation2 + $0x4a] sm:$0xff]  ;;  %v15793_v57 = vld [vmem:[%s18211_s1 + $0x1a0] sm:$0xff]  }
 0x32e   : > { %v3108_v48 = vmax.f32 %v3076_v47, 0.0  ;;  %v3077_v49 = vadd.f32 %v13690_v42, %v16529_v19  ;;  %v2995_v55 = vpop.f32.mrb[31].mxu0  ;;  %13723 = vmatprep.mubr.msk.bf16.mxu1 %vm172_vm1, %v16645_v25  ;;  %v3163_v47 = vld [vmem:[#allocation2 + $0xf8] sm:$0xff]  ;;  %v3162_v42 = vld [vmem:[#allocation2 + $0xf0] sm:$0xff] }
 0x32f   : > { %v3106_v56 = vmax.f32 %v3074_v29, 0.0  ;;  %v3075_v13 = vadd.f32 %v16529_v19, %v2995_v55  ;;  %v3227_v39 = vld [vmem:[#allocation2 + $0x151] sm:$0xff]  ;;  %v3142_v19 = vld [vmem:[#allocation2] sm:$0xff]  ;;  %v16716_v29 = vpack.c.bf16 %v3161_v46, %v3160_v60  ;;  %v3167_v55 = vld [vmem:[#allocation2 + $0x128] sm:$0xff] }
 0x330   : > { %3140 = vst.msk [vmem:[#allocation2 + $0x181] sm:$0xff] %vm172_vm1, %v3108_v48  ;;  %v3109_v23 = vmax.f32 %v3077_v49, 0.0  ;;  %v3225_v28 = vld [vmem:[#allocation2 + $0x139] sm:$0xff]  ;;  %v3174_v10 = vpack.c.bf16 %v3143_v52, %v3142_v19  ;;  %v16718_v48 = vpack.c.bf16 %v3163_v47, %v3162_v42  ;;  %v3165_v49 = vld [vmem:[#allocation2 + $0x110] sm:$0xff]  ;;  %v3733_v46 = vld [vmem:[#allocation2 + $0x82] sm:$0xff] }
 0x331   : > { %3138 = vst.msk [vmem:[#allocation2 + $0x169] sm:$0xff] %vm172_vm1, %v3106_v56  ;;  %v3107_v20 = vmax.f32 %v3075_v13, 0.0  ;;  %v3228_v27 = vld [vmem:[#allocation2 + $0x159] sm:$0xff]  ;;  %v3164_v56 = vld [vmem:[#allocation2 + $0x108] sm:$0xff]  ;;  %v3170_v19 = vld [vmem:[#allocation2 + $0x150] sm:$0xff] }
 0x332   : > { %3141 = vst.msk [vmem:[#allocation2 + $0x189] sm:$0xff] %vm172_vm1, %v3109_v23  ;;  %v3226_v34 = vld [vmem:[#allocation2 + $0x141] sm:$0xff]  ;;  %v16660_v40 = vpack.c.bf16 %v3228_v27, %v3227_v39  ;;  %v16724_v13 = vpack.c.bf16 %v3165_v49, %v3164_v56  ;;  %v3729_v50 = vld [vmem:[#allocation2 + $0x52] sm:$0xff]  ;;  %v3731_v31 = vld [vmem:[#allocation2 + $0x6a] sm:$0xff] }
 0x333   : > { %3139 = vst.msk [vmem:[#allocation2 + $0x171] sm:$0xff] %vm172_vm1, %v3107_v20  ;;  %v16658_v35 = vpack.c.bf16 %v3226_v34, %v3225_v28  ;;  %v3166_v23 = vld [vmem:[#allocation2 + $0x120] sm:$0xff]  ;;  %v3171_v28 = vld [vmem:[#allocation2 + $0x158] sm:$0xff]  ;;  %v16759_v14 = vpack.c.bf16 %v3729_v50, %v3728_v18  ;;  %v16764_v54 = vpack.c.bf16 %v3731_v31, %v3730_v61 }
 0x334   : > { %v16726_v20 = vpack.c.bf16 %v3167_v55, %v3166_v23  ;;  %v3169_v27 = vld [vmem:[#allocation2 + $0x140] sm:$0xff]  ;;  %v3168_v34 = vld [vmem:[#allocation2 + $0x138] sm:$0xff]  ;;  %v16734_v52 = vpack.c.bf16 %v3171_v28, %v3170_v19  ;;  %v3736_v55 = vld [vmem:[#allocation2 + $0xaa] sm:$0xff] }
 0x335   : > { %13724 = vmatmul.mubr.msk.bf16.gmra.mrb[24].mxu1 %vm172_vm1, %v16658_v35  ;;  %v16732_v39 = vpack.c.bf16 %v3169_v27, %v3168_v34  ;;  %v3732_v16 = vld [vmem:[#allocation2 + $0x7a] sm:$0xff]  ;;  %v3734_v47 = vld [vmem:[#allocation2 + $0x92] sm:$0xff]  ;;  %v3738_v23 = vld [vmem:[#allocation2 + $0xc2] sm:$0xff] }
 0x336   : > { %13727 = vmatprep.mubr.msk.bf16.mxu1 %vm172_vm1, %v16660_v40  ;;  %v3735_v60 = vld [vmem:[#allocation2 + $0x9a] sm:$0xff]  ;;  %v16773_v42 = vpack.c.bf16 %v3733_v46, %v3732_v16  ;;  %v3737_v56 = vld [vmem:[#allocation2 + $0xb2] sm:$0xff]  ;;  %v3739_v27 = vld [vmem:[#allocation2 + $0xca] sm:$0xff] }
 0x337   : > { %v16775_v49 = vpack.c.bf16 %v3735_v60, %v3734_v47  ;;  %v16781_v28 = vpack.c.bf16 %v3737_v56, %v3736_v55  ;;  %v16783_v34 = vpack.c.bf16 %v3739_v27, %v3738_v23  ;;  %v3740_v19 = vld [vmem:[#allocation2 + $0xda] sm:$0xff]  ;;  %v3749_v50 = vld [vmem:[#allocation2 + $0x142] sm:$0xff]  ;;  %v3750_v61 = vld [vmem:[#allocation2 + $0x152] sm:$0xff] }
 0x338   : > { %v3229_v4 = vld [vmem:[#allocation2 + $0x169] sm:$0xff]  ;;  %v3748_v18 = vld [vmem:[#allocation2 + $0x13a] sm:$0xff] }
 0x339   : > { %v3172_v21 = vld [vmem:[#allocation2 + $0x168] sm:$0xff]  ;;  %v3751_v31 = vld [vmem:[#allocation2 + $0x15a] sm:$0xff]  ;;  %v15795_v56 = vld [vmem:[%s18211_s1 + $0x1b0] sm:$0xff]  }
 0x33a   : > { %v3230_v5 = vld [vmem:[#allocation2 + $0x171] sm:$0xff]  ;;  %v16807_v16 = vpack.c.bf16 %v3751_v31, %v3750_v61  ;;  %v15794_v55 = vld [vmem:[%s18211_s1 + $0x1a8] sm:$0xff]   ;;  %v4074_v27 = vld [vmem:[#allocation2 + $0x180] sm:$0xff] }
 0x33b   : > { %v16666_v15 = vpack.c.bf16 %v3230_v5, %v3229_v4  ;;  %v3722_v4 = vld [vmem:[#allocation2 + $0x2] sm:$0xff]  ;;  %v3723_v5 = vld [vmem:[#allocation2 + $0xa] sm:$0xff]  ;;  %v3753_v47 = vld [vmem:[#allocation2 + $0x172] sm:$0xff] }
 0x33c   : > { %v3754_v22 = vpack.c.bf16 %v3723_v5, %v3722_v4  ;;  %v3741_v4 = vld [vmem:[#allocation2 + $0xe2] sm:$0xff]  ;;  %v3742_v5 = vld [vmem:[#allocation2 + $0xf2] sm:$0xff]  ;;  %v3752_v46 = vld [vmem:[#allocation2 + $0x16a] sm:$0xff] }
 0x33d   : > { %13728 = vmatmul.mubr.msk.bf16.gmra.mrb[28].mxu1 %vm172_vm1, %v16666_v15  ;;  %v16813_v60 = vpack.c.bf16 %v3753_v47, %v3752_v46  ;;  %v4075_v23 = vld [vmem:[#allocation2 + $0x188] sm:$0xff]  ;;  %v5340_v61 = vld [vmem:[#allocation2 + $0x91] sm:$0xff] }
 0x33e   : > { %13739 = vmatprep.mubr.msk.bf16.mxu1 %vm172_vm1, %v3174_v10  ;;  %v3173_v10 = vld [vmem:[#allocation2 + $0x170] sm:$0xff]  ;;  %v15812_v31 = vld [vmem:[%s18211_s1 + $0x238] sm:$0xff]  }
 0x33f   : > { %v16740_v26 = vpack.c.bf16 %v3173_v10, %v3172_v21  ;;  %v3743_v10 = vld [vmem:[#allocation2 + $0xfa] sm:$0xff]  ;;  %v16789_v21 = vpack.c.bf16 %v3741_v4, %v3740_v19  ;;  %v16859_v19 = vpack.c.bf16 %v4075_v23, %v4074_v27  ;;  %v15798_v4 = vld [vmem:[%s18211_s1 + $0x1c8] sm:$0xff]   ;;  %v5343_v47 = vld [vmem:[#allocation2 + $0xb1] sm:$0xff] }
 0x340   : > { %v5347_v27 = vld [vmem:[#allocation2 + $0xe1] sm:$0xff] }
 0x345   : > { %13740 = vmatmul.mubr.msk.bf16.vlgmr.msra.gmra.mrb[0].mxu1 %vm172_vm1, %v16671_v37 }
 0x346   : > { %13772 = vmatpush3.bf16.msra.mxu1 %v16587_v7  ;;  %13743 = vmatprep.mubr.msk.bf16.mxu1 %vm172_vm1, %v16676_v45  ;;  %v15788_v7 = vld [vmem:[%s18211_s1 + $0x178] sm:$0xff]  }
 0x347   : > { %13773 = vmatprep.subr.bf16.mxu1 %v15786_v6 }
 0x34a   : > { %13774 = vmatpush3.bf16.msra.mxu1 %v15786_v6  ;;  %v3725_v6 = vld [vmem:[#allocation2 + $0x22] sm:$0xff] }
 0x34b   : > { %13775 = vmatprep.subr.bf16.mxu1 %v15787_v53  ;;  %v16745_v59 = vpack.c.bf16 %v3725_v6, %v3724_v38  ;;  %v3744_v38 = vld [vmem:[#allocation2 + $0x10a] sm:$0xff]  ;;  %v3745_v6 = vld [vmem:[#allocation2 + $0x112] sm:$0xff] }
 0x34d   : > { %13744 = vmatmul.mubr.msk.bf16.gmra.mrb[4].mxu1 %vm172_vm1, %v16686_v11 }
 0x34e   : > { %13747 = vmatprep.mubr.msk.bf16.mxu1 %vm172_vm1, %v16691_v63  ;;  %13776 = vmatpush3.bf16.msra.mxu1 %v15787_v53  ;;  %v3726_v53 = vld [vmem:[#allocation2 + $0x32] sm:$0xff] }
 0x34f   : > { %13777 = vmatprep.subr.bf16.mxu1 %v15788_v7  ;;  %v16750_v33 = vpack.c.bf16 %v3727_v58, %v3726_v53  ;;  %v3746_v53 = vld [vmem:[#allocation2 + $0x122] sm:$0xff]  ;;  %v3747_v58 = vld [vmem:[#allocation2 + $0x12a] sm:$0xff] }
 0x352   : > { %13778 = vmatpush3.bf16.msra.mxu1 %v15788_v7  ;;  %v15791_v7 = vld [vmem:[%s18211_s1 + $0x190] sm:$0xff]  }
 0x353   : > { %13811 = vmatprep.subr.bf16.mxu1 %v15789_v12 }
 0x355   : > { %13748 = vmatmul.mubr.msk.bf16.gmra.mrb[8].mxu1 %vm172_vm1, %v16700_v3 }
 0x356   : > { %13751 = vmatprep.mubr.msk.bf16.mxu1 %vm172_vm1, %v16702_v44 }
 0x35d   : > { %13752 = vmatmul.mubr.msk.bf16.gmra.mrb[12].mxu1 %vm172_vm1, %v16708_v1 }
 0x35e   : > { %13755 = vmatprep.mubr.msk.bf16.mxu1 %vm172_vm1, %v16710_v32 }
 0x365   : > { %13756 = vmatmul.mubr.msk.bf16.gmra.mrb[16].mxu1 %vm172_vm1, %v16716_v29 }
 0x366   : > { %13759 = vmatprep.mubr.msk.bf16.mxu1 %vm172_vm1, %v16718_v48 }
 0x36d   : > { %13760 = vmatmul.mubr.msk.bf16.gmra.mrb[20].mxu1 %vm172_vm1, %v16724_v13 }
 0x36e   : > { %13763 = vmatprep.mubr.msk.bf16.mxu1 %vm172_vm1, %v16726_v20 }
 0x375   : > { %13764 = vmatmul.mubr.msk.bf16.gmra.mrb[24].mxu1 %vm172_vm1, %v16732_v39 }
 0x376   : > { %13767 = vmatprep.mubr.msk.bf16.mxu1 %vm172_vm1, %v16734_v52 }
 0x37d   : > { %13768 = vmatmul.mubr.msk.bf16.gmra.mrb[28].mxu1 %vm172_vm1, %v16740_v26 }
 0x37e   : > { %13779 = vmatprep.mubr.msk.bf16.mxu1 %vm172_vm1, %v3754_v22  ;;  %v16791_v22 = vpack.c.bf16 %v3743_v10, %v3742_v5  ;;  %v15799_v5 = vld [vmem:[%s18211_s1 + $0x1d0] sm:$0xff]   ;;  %v15810_v10 = vld [vmem:[%s18211_s1 + $0x228] sm:$0xff]  }
 0x385   : > { %13780 = vmatmul.mubr.msk.bf16.vlgmr.msra.gmra.mrb[0].mxu1 %vm172_vm1, %v16745_v59 }
 0x386   : > { %13812 = vmatpush3.bf16.msra.mxu1 %v15789_v12  ;;  %13783 = vmatprep.mubr.msk.bf16.mxu1 %vm172_vm1, %v16750_v33  ;;  %v15792_v12 = vld [vmem:[%s18211_s1 + $0x198] sm:$0xff]  }
 0x387   : > { %13813 = vmatprep.subr.bf16.mxu1 %v15790_v0 }
 0x38a   : > { %13814 = vmatpush3.bf16.msra.mxu1 %v15790_v0  ;;  %v16797_v0 = vpack.c.bf16 %v3745_v6, %v3744_v38  ;;  %v15811_v6 = vld [vmem:[%s18211_s1 + $0x230] sm:$0xff]  }
 0x38b   : > { %13815 = vmatprep.subr.bf16.mxu1 %v15791_v7 }
 0x38d   : > { %13784 = vmatmul.mubr.msk.bf16.gmra.mrb[4].mxu1 %vm172_vm1, %v16759_v14 }
 0x38e   : > { %13787 = vmatprep.mubr.msk.bf16.mxu1 %vm172_vm1, %v16764_v54  ;;  %13816 = vmatpush3.bf16.msra.mxu1 %v15791_v7  ;;  %v16799_v7 = vpack.c.bf16 %v3747_v58, %v3746_v53  ;;  %v5339_v53 = vld [vmem:[#allocation2 + $0x81] sm:$0xff]  ;;  %v5341_v58 = vld [vmem:[#allocation2 + $0x99] sm:$0xff] }
 0x38f   : > { %13817 = vmatprep.subr.bf16.mxu1 %v15792_v12  ;;  %v5368_v46 = vpack.c.bf16 %v5341_v58, %v5340_v61 }
 0x392   : > { %13818 = vmatpush3.bf16.msra.mxu1 %v15792_v12  ;;  %v16805_v12 = vpack.c.bf16 %v3749_v50, %v3748_v18  ;;  %v5338_v18 = vld [vmem:[#allocation2 + $0x79] sm:$0xff] }
 0x393   : > { %13851 = vmatprep.subr.bf16.mxu1 %v15793_v57  ;;  %v5367_v50 = vpack.c.bf16 %v5339_v53, %v5338_v18 }
 0x395   : > { %13788 = vmatmul.mubr.msk.bf16.gmra.mrb[8].mxu1 %vm172_vm1, %v16773_v42 }
 0x396   : > { %13791 = vmatprep.mubr.msk.bf16.mxu1 %vm172_vm1, %v16775_v49 }
 0x39d   : > { %13792 = vmatmul.mubr.msk.bf16.gmra.mrb[12].mxu1 %vm172_vm1, %v16781_v28 }
 0x39e   : > { %13795 = vmatprep.mubr.msk.bf16.mxu1 %vm172_vm1, %v16783_v34 }
 0x3a5   : > { %13796 = vmatmul.mubr.msk.bf16.gmra.mrb[16].mxu1 %vm172_vm1, %v16789_v21 }
 0x3a6   : > { %13799 = vmatprep.mubr.msk.bf16.mxu1 %vm172_vm1, %v16791_v22 }
 0x3ad   : > { %13800 = vmatmul.mubr.msk.bf16.gmra.mrb[20].mxu1 %vm172_vm1, %v16797_v0 }
 0x3ae   : > { %13803 = vmatprep.mubr.msk.bf16.mxu1 %vm172_vm1, %v16799_v7 }
 0x3b5   : > { %13804 = vmatmul.mubr.msk.bf16.gmra.mrb[24].mxu1 %vm172_vm1, %v16805_v12 }
 0x3b6   : > { %13807 = vmatprep.mubr.msk.bf16.mxu1 %vm172_vm1, %v16807_v16 }
 0x3bd   : > { %13808 = vmatmul.mubr.msk.bf16.gmra.mrb[28].mxu1 %vm172_vm1, %v16813_v60 }
 0x3be   : > { %13819 = vmatprep.mubr.msk.bf16.mxu1 %vm172_vm1, %v16671_v37  ;;  %v15796_v37 = vld [vmem:[%s18211_s1 + $0x1b8] sm:$0xff]  }
 0x3c5   : > { %13820 = vmatmul.mubr.msk.bf16.vlgmr.msra.gmra.mrb[0].mxu1 %vm172_vm1, %v16676_v45 }
 0x3c6   : > { %13852 = vmatpush3.bf16.msra.mxu1 %v15793_v57  ;;  %13823 = vmatprep.mubr.msk.bf16.mxu1 %vm172_vm1, %v16686_v11  ;;  %v15797_v57 = vld [vmem:[%s18211_s1 + $0x1c0] sm:$0xff]  }
 0x3c7   : > { %13853 = vmatprep.subr.bf16.mxu1 %v15794_v55 }
 0x3ca   : > { %13854 = vmatpush3.bf16.msra.mxu1 %v15794_v55  ;;  %v5345_v55 = vld [vmem:[#allocation2 + $0xc9] sm:$0xff] }
 0x3cb   : > { %13855 = vmatprep.subr.bf16.mxu1 %v15795_v56 }
 0x3cd   : > { %13824 = vmatmul.mubr.msk.bf16.gmra.mrb[4].mxu1 %vm172_vm1, %v16691_v63 }
 0x3ce   : > { %13827 = vmatprep.mubr.msk.bf16.mxu1 %vm172_vm1, %v16700_v3  ;;  %13856 = vmatpush3.bf16.msra.mxu1 %v15795_v56  ;;  %v5342_v56 = vld [vmem:[#allocation2 + $0xa9] sm:$0xff] }
 0x3cf   : > { %13857 = vmatprep.subr.bf16.mxu1 %v15796_v37 }
 0x3d2   : > { %13858 = vmatpush3.bf16.msra.mxu1 %v15796_v37  ;;  %v5369_v37 = vpack.c.bf16 %v5343_v47, %v5342_v56 }
 0x3d3   : > { %13891 = vmatprep.subr.bf16.mxu1 %v15797_v57 }
 0x3d5   : > { %13828 = vmatmul.mubr.msk.bf16.gmra.mrb[8].mxu1 %vm172_vm1, %v16702_v44 }
 0x3d6   : > { %13831 = vmatprep.mubr.msk.bf16.mxu1 %vm172_vm1, %v16708_v1 }
 0x3dd   : > { %13832 = vmatmul.mubr.msk.bf16.gmra.mrb[12].mxu1 %vm172_vm1, %v16710_v32 }
 0x3de   : > { %13835 = vmatprep.mubr.msk.bf16.mxu1 %vm172_vm1, %v16716_v29 }
 0x3e5   : > { %13836 = vmatmul.mubr.msk.bf16.gmra.mrb[16].mxu1 %vm172_vm1, %v16718_v48 }
 0x3e6   : > { %13839 = vmatprep.mubr.msk.bf16.mxu1 %vm172_vm1, %v16724_v13 }
 0x3ed   : > { %13840 = vmatmul.mubr.msk.bf16.gmra.mrb[20].mxu1 %vm172_vm1, %v16726_v20 }
 0x3ee   : > { %13843 = vmatprep.mubr.msk.bf16.mxu1 %vm172_vm1, %v16732_v39 }
 0x3f5   : > { %13844 = vmatmul.mubr.msk.bf16.gmra.mrb[24].mxu1 %vm172_vm1, %v16734_v52 }
 0x3f6   : > { %13847 = vmatprep.mubr.msk.bf16.mxu1 %vm172_vm1, %v16740_v26 }
 0x3fd   : > { %13848 = vmatmul.mubr.msk.bf16.gmra.mrb[28].mxu1 %vm172_vm1, %v16859_v19 }
 0x3fe   : > { %13859 = vmatprep.mubr.msk.bf16.mxu1 %vm172_vm1, %v16547_v30  ;;  %v15800_v30 = vld [vmem:[%s18211_s1 + $0x1d8] sm:$0xff]  }
 0x405   : > { %13860 = vmatmul.mubr.msk.bf16.vlgmr.msra.gmra.mrb[0].mxu1 %vm172_vm1, %v16553_v24  ;;  %v15801_v24 = vld [vmem:[%s18211_s1 + $0x1e0] sm:$0xff]  }
 0x406   : > { %13892 = vmatpush3.bf16.msra.mxu1 %v15797_v57  ;;  %13863 = vmatprep.mubr.msk.bf16.mxu1 %vm172_vm1, %v16569_v9  ;;  %v4397_v9 = vld [vmem:[#allocation2 + $0x189] sm:$0xff]  ;;  %v5344_v57 = vld [vmem:[#allocation2 + $0xc1] sm:$0xff] }
 0x407   : > { %13893 = vmatprep.subr.bf16.mxu1 %v15798_v4  ;;  %v5370_v23 = vpack.c.bf16 %v5345_v55, %v5344_v57 }
 0x40a   : > { %13894 = vmatpush3.bf16.msra.mxu1 %v15798_v4  ;;  %v5346_v4 = vld [vmem:[#allocation2 + $0xd9] sm:$0xff] }
 0x40b   : > { %13895 = vmatprep.subr.bf16.mxu1 %v15799_v5 }
 0x40d   : > { %13864 = vmatmul.mubr.msk.bf16.gmra.mrb[4].mxu1 %vm172_vm1, %v16575_v62  ;;  %v4396_v62 = vld [vmem:[#allocation2 + $0x181] sm:$0xff] }
 0x40e   : > { %13867 = vmatprep.mubr.msk.bf16.mxu1 %vm172_vm1, %v16593_v41  ;;  %13896 = vmatpush3.bf16.msra.mxu1 %v15799_v5  ;;  %v16905_v41 = vpack.c.bf16 %v4397_v9, %v4396_v62  ;;  %v5371_v5 = vpack.c.bf16 %v5347_v27, %v5346_v4  ;;  %v5351_v9 = vld [vmem:[#allocation2 + $0x111] sm:$0xff]  ;;  %v5353_v62 = vld [vmem:[#allocation2 + $0x129] sm:$0xff] }
 0x40f   : > { %13897 = vmatprep.subr.bf16.mxu1 %v15800_v30 }
 0x412   : > { %13898 = vmatpush3.bf16.msra.mxu1 %v15800_v30  ;;  %v5348_v30 = vld [vmem:[#allocation2 + $0xf1] sm:$0xff] }
 0x413   : > { %13931 = vmatprep.subr.bf16.mxu1 %v15801_v24 }
 0x415   : > { %13868 = vmatmul.mubr.msk.bf16.gmra.mrb[8].mxu1 %vm172_vm1, %v16597_v43  ;;  %v15802_v43 = vld [vmem:[%s18211_s1 + $0x1e8] sm:$0xff]  }
 0x416   : > { %13871 = vmatprep.mubr.msk.bf16.mxu1 %vm172_vm1, %v16610_v51  ;;  %v15803_v51 = vld [vmem:[%s18211_s1 + $0x1f0] sm:$0xff]  }
 0x41d   : > { %13872 = vmatmul.mubr.msk.bf16.gmra.mrb[12].mxu1 %vm172_vm1, %v16613_v17  ;;  %v15804_v17 = vld [vmem:[%s18211_s1 + $0x1f8] sm:$0xff]  }
 0x41e   : > { %13875 = vmatprep.mubr.msk.bf16.mxu1 %vm172_vm1, %v16626_v2  ;;  %v15805_v2 = vld [vmem:[%s18211_s1 + $0x200] sm:$0xff]  }
 0x425   : > { %13876 = vmatmul.mubr.msk.bf16.gmra.mrb[16].mxu1 %vm172_vm1, %v16629_v8  ;;  %v4718_v8 = vld [vmem:[#allocation2 + $0x182] sm:$0xff] }
 0x426   : > { %13879 = vmatprep.mubr.msk.bf16.mxu1 %vm172_vm1, %v16642_v36  ;;  %v4719_v36 = vld [vmem:[#allocation2 + $0x18a] sm:$0xff] }
 0x42d   : > { %13880 = vmatmul.mubr.msk.bf16.gmra.mrb[20].mxu1 %vm172_vm1, %v16645_v25  ;;  %v16951_v25 = vpack.c.bf16 %v4719_v36, %v4718_v8  ;;  %v5355_v8 = vld [vmem:[#allocation2 + $0x141] sm:$0xff]  ;;  %v5357_v36 = vld [vmem:[#allocation2 + $0x159] sm:$0xff] }
 0x42e   : > { %13883 = vmatprep.mubr.msk.bf16.mxu1 %vm172_vm1, %v16658_v35  ;;  %v15806_v35 = vld [vmem:[%s18211_s1 + $0x208] sm:$0xff]  }
 0x435   : > { %13884 = vmatmul.mubr.msk.bf16.gmra.mrb[24].mxu1 %vm172_vm1, %v16660_v40  ;;  %v15807_v40 = vld [vmem:[%s18211_s1 + $0x210] sm:$0xff]  }
 0x436   : > { %13887 = vmatprep.mubr.msk.bf16.mxu1 %vm172_vm1, %v16666_v15  ;;  %v15808_v15 = vld [vmem:[%s18211_s1 + $0x218] sm:$0xff]  }
 0x43d   : > { %13888 = vmatmul.mubr.msk.bf16.gmra.mrb[28].mxu1 %vm172_vm1, %v16905_v41 }
 0x43e   : > { %13899 = vmatprep.mubr.msk.bf16.mxu1 %vm172_vm1, %v16745_v59  ;;  %v5336_v59 = vld [vmem:[#allocation2 + $0x61] sm:$0xff] }
 0x445   : > { %13900 = vmatmul.mubr.msk.bf16.vlgmr.msra.gmra.mrb[0].mxu1 %vm172_vm1, %v16750_v33 }
 0x446   : > { %13932 = vmatpush3.bf16.msra.mxu1 %v15801_v24  ;;  %13903 = vmatprep.mubr.msk.bf16.mxu1 %vm172_vm1, %v16759_v14 }
 0x447   : > { %13933 = vmatprep.subr.bf16.mxu1 %v15802_v43 }
 0x44a   : > { %13934 = vmatpush3.bf16.msra.mxu1 %v15802_v43  ;;  %v5350_v43 = vld [vmem:[#allocation2 + $0x109] sm:$0xff] }
 0x44b   : > { %13935 = vmatprep.subr.bf16.mxu1 %v15803_v51 }
 0x44d   : > { %13904 = vmatmul.mubr.msk.bf16.gmra.mrb[4].mxu1 %vm172_vm1, %v16764_v54 }
 0x44e   : > { %13907 = vmatprep.mubr.msk.bf16.mxu1 %vm172_vm1, %v16773_v42  ;;  %13936 = vmatpush3.bf16.msra.mxu1 %v15803_v51  ;;  %v5373_v51 = vpack.c.bf16 %v5351_v9, %v5350_v43 }
 0x44f   : > { %13937 = vmatprep.subr.bf16.mxu1 %v15804_v17 }
 0x452   : > { %13938 = vmatpush3.bf16.msra.mxu1 %v15804_v17  ;;  %v5352_v17 = vld [vmem:[#allocation2 + $0x121] sm:$0xff] }
 0x453   : > { %13971 = vmatprep.subr.bf16.mxu1 %v15805_v2 }
 0x455   : > { %13908 = vmatmul.mubr.msk.bf16.gmra.mrb[8].mxu1 %vm172_vm1, %v16775_v49 }
 0x456   : > { %13911 = vmatprep.mubr.msk.bf16.mxu1 %vm172_vm1, %v16781_v28 }
 0x45d   : > { %13912 = vmatmul.mubr.msk.bf16.gmra.mrb[12].mxu1 %vm172_vm1, %v16783_v34 }
 0x45e   : > { %13915 = vmatprep.mubr.msk.bf16.mxu1 %vm172_vm1, %v16789_v21 }
 0x465   : > { %13916 = vmatmul.mubr.msk.bf16.gmra.mrb[16].mxu1 %vm172_vm1, %v16791_v22 }
 0x466   : > { %13919 = vmatprep.mubr.msk.bf16.mxu1 %vm172_vm1, %v16797_v0 }
 0x46d   : > { %13920 = vmatmul.mubr.msk.bf16.gmra.mrb[20].mxu1 %vm172_vm1, %v16799_v7 }
 0x46e   : > { %13923 = vmatprep.mubr.msk.bf16.mxu1 %vm172_vm1, %v16805_v12 }
 0x475   : > { %13924 = vmatmul.mubr.msk.bf16.gmra.mrb[24].mxu1 %vm172_vm1, %v16807_v16 }
 0x476   : > { %13927 = vmatprep.mubr.msk.bf16.mxu1 %vm172_vm1, %v16813_v60 }
 0x47d   : > { %13928 = vmatmul.mubr.msk.bf16.gmra.mrb[28].mxu1 %vm172_vm1, %v16951_v25 }
 0x47e   : > { %13939 = vmatprep.mubr.msk.bf16.mxu1 %vm172_vm1, %v16676_v45  ;;  %v15809_v45 = vld [vmem:[%s18211_s1 + $0x220] sm:$0xff]  }
 0x485   : > { %13940 = vmatmul.mubr.msk.bf16.vlgmr.msra.gmra.mrb[0].mxu1 %vm172_vm1, %v16686_v11  ;;  %v5040_v11 = vld [vmem:[#allocation2 + $0x198] sm:$0xff] }
 0x486   : > { %13972 = vmatpush3.bf16.msra.mxu1 %v15805_v2  ;;  %13943 = vmatprep.mubr.msk.bf16.mxu1 %vm172_vm1, %v16691_v63  ;;  %v5041_v63 = vld [vmem:[#allocation2 + $0x1a0] sm:$0xff]  ;;  %v5374_v2 = vpack.c.bf16 %v5353_v62, %v5352_v17  ;;  %v15819_v17 = vld [vmem:[%s18211_s1 + $0x250] sm:$0xff]  }
 0x487   : > { %13973 = vmatprep.subr.bf16.mxu1 %v15806_v35 }
 0x48a   : > { %13974 = vmatpush3.bf16.msra.mxu1 %v15806_v35  ;;  %v5354_v35 = vld [vmem:[#allocation2 + $0x139] sm:$0xff] }
 0x48b   : > { %13975 = vmatprep.subr.bf16.mxu1 %v15807_v40 }
 0x48d   : > { %13944 = vmatmul.mubr.msk.bf16.gmra.mrb[4].mxu1 %vm172_vm1, %v16700_v3  ;;  %v5057_v3 = vpack.c.bf16 %v5041_v63, %v5040_v11  ;;  %v5359_v11 = vld [vmem:[#allocation2 + $0x171] sm:$0xff]  ;;  %v5358_v63 = vld [vmem:[#allocation2 + $0x169] sm:$0xff] }
 0x48e   : > { %13947 = vmatprep.mubr.msk.bf16.mxu1 %vm172_vm1, %v16702_v44  ;;  %13976 = vmatpush3.bf16.msra.mxu1 %v15807_v40  ;;  %v5333_v44 = vld [vmem:[#allocation2 + $0x39] sm:$0xff]  ;;  %v5375_v40 = vpack.c.bf16 %v5355_v8, %v5354_v35 }
 0x48f   : > { %13977 = vmatprep.subr.bf16.mxu1 %v15808_v15 }
 0x492   : > { %13978 = vmatpush3.bf16.msra.mxu1 %v15808_v15  ;;  %v5356_v15 = vld [vmem:[#allocation2 + $0x151] sm:$0xff] }
 0x493   : > { %14011 = vmatprep.subr.bf16.mxu1 %v15809_v45 }
 0x495   : > { %13948 = vmatmul.mubr.msk.bf16.gmra.mrb[8].mxu1 %vm172_vm1, %v16708_v1  ;;  %v5332_v1 = vld [vmem:[#allocation2 + $0x31] sm:$0xff] }
 0x496   : > { %13951 = vmatprep.mubr.msk.bf16.mxu1 %vm172_vm1, %v16710_v32  ;;  %v5364_v32 = vpack.c.bf16 %v5333_v44, %v5332_v1  ;;  %v5362_v44 = vld [vmem:[#allocation2 + $0x199] sm:$0xff]  ;;  %v5363_v1 = vld [vmem:[#allocation2 + $0x1a1] sm:$0xff] }
 0x49d   : > { %13952 = vmatmul.mubr.msk.bf16.gmra.mrb[12].mxu1 %vm172_vm1, %v16716_v29  ;;  %v15813_v29 = vld [vmem:[%s18211_s1 + $0x260] sm:$0xff]  }
 0x49e   : > { %13955 = vmatprep.mubr.msk.bf16.mxu1 %vm172_vm1, %v16718_v48  ;;  %v15814_v48 = vld [vmem:[%s18211_s1 + $0x268] sm:$0xff]   ;;  %14051 = vmatprep.subr.bf16.mxu0 %v15813_v29 }
 0x49f   : > { %14052 = vmatpush3.bf16.msra.mxu0 %v15813_v29 }
 0x4a0   : > { %14053 = vmatprep.subr.bf16.mxu0 %v15814_v48 }
 0x4a3   : > { %14054 = vmatpush3.bf16.msra.mxu0 %v15814_v48 }
 0x4a5   : > { %13956 = vmatmul.mubr.msk.bf16.gmra.mrb[16].mxu1 %vm172_vm1, %v16724_v13  ;;  %v5335_v13 = vld [vmem:[#allocation2 + $0x51] sm:$0xff] }
 0x4a6   : > { %13959 = vmatprep.mubr.msk.bf16.mxu1 %vm172_vm1, %v16726_v20  ;;  %v5337_v20 = vld [vmem:[#allocation2 + $0x69] sm:$0xff] }
 0x4a7   : > { %v5366_v38 = vpack.c.bf16 %v5337_v20, %v5336_v59 }
 0x4ad   : > { %13960 = vmatmul.mubr.msk.bf16.gmra.mrb[20].mxu1 %vm172_vm1, %v16732_v39  ;;  %v15815_v39 = vld [vmem:[%s18211_s1 + $0x270] sm:$0xff]  }
 0x4ae   : > { %13963 = vmatprep.mubr.msk.bf16.mxu1 %vm172_vm1, %v16734_v52  ;;  %v5334_v52 = vld [vmem:[#allocation2 + $0x49] sm:$0xff]  ;;  %14055 = vmatprep.subr.bf16.mxu0 %v15815_v39 }
 0x4af   : > { %14056 = vmatpush3.bf16.msra.mxu0 %v15815_v39 }
 0x4b5   : > { %13964 = vmatmul.mubr.msk.bf16.gmra.mrb[24].mxu1 %vm172_vm1, %v16740_v26  ;;  %v5365_v26 = vpack.c.bf16 %v5335_v13, %v5334_v52 }
 0x4b6   : > { %13967 = vmatprep.mubr.msk.bf16.mxu1 %vm172_vm1, %v16859_v19  ;;  %v5349_v19 = vld [vmem:[#allocation2 + $0xf9] sm:$0xff] }
 0x4b7   : > { %v5372_v24 = vpack.c.bf16 %v5349_v19, %v5348_v30 }
 0x4bd   : > { %13968 = vmatmul.mubr.msk.bf16.gmra.mrb[28].mxu1 %vm172_vm1, %v5057_v3  ;;  %v5377_v3 = vpack.c.bf16 %v5359_v11, %v5358_v63  ;;  %v15820_v63 = vld [vmem:[%s18211_s1 + $0x258] sm:$0xff]  }
 0x4be   : > { %13979 = vmatprep.mubr.msk.bf16.mxu1 %vm172_vm1, %v5364_v32  ;;  %v5379_v32 = vpack.c.bf16 %v5363_v1, %v5362_v44 }
 0x4c5   : > { %13980 = vmatmul.mubr.msk.bf16.vlgmr.msra.gmra.mrb[0].mxu1 %vm172_vm1, %v5365_v26 }
 0x4c6   : > { %14012 = vmatpush3.bf16.msra.mxu1 %v15809_v45  ;;  %13983 = vmatprep.mubr.msk.bf16.mxu1 %vm172_vm1, %v5366_v38  ;;  %v5376_v45 = vpack.c.bf16 %v5357_v36, %v5356_v15 }
 0x4c7   : > { %14013 = vmatprep.subr.bf16.mxu1 %v15810_v10 }
 0x4ca   : > { %14014 = vmatpush3.bf16.msra.mxu1 %v15810_v10 }
 0x4cb   : > { %14015 = vmatprep.subr.bf16.mxu1 %v15811_v6 }
 0x4cd   : > { %13984 = vmatmul.mubr.msk.bf16.gmra.mrb[4].mxu1 %vm172_vm1, %v5367_v50 }
 0x4ce   : > { %13987 = vmatprep.mubr.msk.bf16.mxu1 %vm172_vm1, %v5368_v46  ;;  %14016 = vmatpush3.bf16.msra.mxu1 %v15811_v6 }
 0x4cf   : > { %14017 = vmatprep.subr.bf16.mxu1 %v15812_v31 }
 0x4d2   : > { %14018 = vmatpush3.bf16.msra.mxu1 %v15812_v31 }
 0x4d5   : > { %13988 = vmatmul.mubr.msk.bf16.gmra.mrb[8].mxu1 %vm172_vm1, %v5369_v37 }
 0x4d6   : > { %13991 = vmatprep.mubr.msk.bf16.mxu1 %vm172_vm1, %v5370_v23  ;;  %v15818_v23 = vld [vmem:[%s18211_s1 + $0x248] sm:$0xff]  }
 0x4dd   : > { %13992 = vmatmul.mubr.msk.bf16.gmra.mrb[12].mxu1 %vm172_vm1, %v5371_v5 }
 0x4de   : > { %13995 = vmatprep.mubr.msk.bf16.mxu1 %vm172_vm1, %v5372_v24 }
 0x4e5   : > { %13996 = vmatmul.mubr.msk.bf16.gmra.mrb[16].mxu1 %vm172_vm1, %v5373_v51 }
 0x4e6   : > { %13999 = vmatprep.mubr.msk.bf16.mxu1 %vm172_vm1, %v5374_v2 }
 0x4ed   : > { %14000 = vmatmul.mubr.msk.bf16.gmra.mrb[20].mxu1 %vm172_vm1, %v5375_v40 }
 0x4ee   : > { %14003 = vmatprep.mubr.msk.bf16.mxu1 %vm172_vm1, %v5376_v45 }
 0x4f5   : > { %14004 = vmatmul.mubr.msk.bf16.gmra.mrb[24].mxu1 %vm172_vm1, %v5377_v3 }
 0x4f6   : > { %14007 = vmatprep.mubr.msk.bf16.mxu1 %vm172_vm1, %v16905_v41 }
 0x4fd   : > { %14008 = vmatmul.mubr.msk.bf16.gmra.mrb[28].mxu1 %vm172_vm1, %v5379_v32 }
 0x4fe   : > { %14019 = vmatprep.mubr.msk.bf16.mxu1 %vm172_vm1, %v16750_v33  ;;  %v5684_v33 = vld [vmem:[#allocation2 + $0x19a] sm:$0xff] }
 0x505   : > { %14020 = vmatmul.mubr.msk.bf16.vlgmr.msra.gmra.mrb[0].mxu1 %vm172_vm1, %v16759_v14  ;;  %v5685_v14 = vld [vmem:[#allocation2 + $0x1a2] sm:$0xff] }
 0x506   : > { %14023 = vmatprep.mubr.msk.bf16.mxu1 %vm172_vm1, %v16764_v54  ;;  %v5701_v54 = vpack.c.bf16 %v5685_v14, %v5684_v33 }
 0x50d   : > { %14024 = vmatmul.mubr.msk.bf16.gmra.mrb[4].mxu1 %vm172_vm1, %v16773_v42  ;;  %v15816_v42 = vld [vmem:[%s18211_s1 + $0x278] sm:$0xff]  }
 0x50e   : > { %14027 = vmatprep.mubr.msk.bf16.mxu1 %vm172_vm1, %v16775_v49  ;;  %14057 = vmatprep.subr.bf16.mxu0 %v15816_v42  ;;  %v6137_v49 = vld [vmem:[#allocation2 + $0x1] sm:$0xff] }
 0x50f   : > { %14058 = vmatpush3.bf16.msra.mxu0 %v15816_v42 }
 0x515   : > { %14028 = vmatmul.mubr.msk.bf16.gmra.mrb[8].mxu1 %vm172_vm1, %v16781_v28  ;;  %v6138_v28 = vld [vmem:[#allocation2 + $0x9] sm:$0xff] }
 0x516   : > { %14031 = vmatprep.mubr.msk.bf16.mxu1 %vm172_vm1, %v16783_v34  ;;  %v6169_v34 = vpack.c.bf16 %v6138_v28, %v6137_v49 }
 0x518   : > { %14059 = vmatprep.mubr.msk.bf16.mxu0 %vm172_vm1, %v6169_v34  ;;  %v17132_v34 = vld [vmem:[%s18211_s1 + $0x280] sm:$0xff]  }
 0x51d   : > { %14032 = vmatmul.mubr.msk.bf16.gmra.mrb[12].mxu1 %vm172_vm1, %v16789_v21  ;;  %v15817_v21 = vld [vmem:[%s18211_s1 + $0x240] sm:$0xff]  }
 0x51e   : > { %14035 = vmatprep.mubr.msk.bf16.mxu1 %vm172_vm1, %v16791_v22  ;;  %14091 = vmatprep.subr.bf16.mxu0 %v15817_v21  ;;  %v17074_v22 = vld [vmem:[%s18212_s2 + $0x1] ss:$0 sm:$0xff] }
 0x525   : > { %14036 = vmatmul.mubr.msk.bf16.gmra.mrb[16].mxu1 %vm172_vm1, %v16797_v0 }
 0x526   : > { %14039 = vmatprep.mubr.msk.bf16.mxu1 %vm172_vm1, %v16799_v7 }
 0x52d   : > { %14040 = vmatmul.mubr.msk.bf16.gmra.mrb[20].mxu1 %vm172_vm1, %v16805_v12 }
 0x52e   : > { %14043 = vmatprep.mubr.msk.bf16.mxu1 %vm172_vm1, %v16807_v16 }
 0x535   : > { %14044 = vmatmul.mubr.msk.bf16.gmra.mrb[24].mxu1 %vm172_vm1, %v16813_v60 }
 0x536   : > { %14047 = vmatprep.mubr.msk.bf16.mxu1 %vm172_vm1, %v16951_v25 }
 0x53d   : > { %14048 = vmatmul.mubr.msk.bf16.gmra.mrb[28].mxu1 %vm172_vm1, %v5701_v54 }
 0x5d8   : > { %v14021_v0 = vpop.f32.mrb[0].mxu1 }
 0x5d9   : > { %v5986_v7 = vadd.f32 %v14021_v0, %v17074_v22  ;;  %v5817_v12 = vpop.f32.mrb[1].mxu1 }
 0x5da   : > { %v5984_v16 = vadd.f32 %v17074_v22, %v5817_v12  ;;  %v14022_v60 = vpop.f32.mrb[2].mxu1 }
 0x5db   : > { %v6018_v41 = vmax.f32 %v5986_v7, 0.0  ;;  %v5987_v25 = vadd.f32 %v14022_v60, %v17074_v22  ;;  %v5820_v29 = vpop.f32.mrb[3].mxu1 }
 0x5dc   : > { %v6016_v48 = vmax.f32 %v5984_v16, 0.0  ;;  %v5985_v13 = vadd.f32 %v17074_v22, %v5820_v29 }
 0x5dd   : > { %6050 = vst.msk [vmem:[#allocation2 + $0x31] sm:$0xff] %vm172_vm1, %v6018_v41  ;;  %v6019_v20 = vmax.f32 %v5987_v25, 0.0 }
 0x5de   : > { %6048 = vst.msk [vmem:[#allocation2 + $0x19] sm:$0xff] %vm172_vm1, %v6016_v48  ;;  %v6017_v39 = vmax.f32 %v5985_v13, 0.0 }
 0x5df   : > { %6051 = vst.msk [vmem:[#allocation2 + $0x39] sm:$0xff] %vm172_vm1, %v6019_v20 }
 0x5e0   : > { %6049 = vst.msk [vmem:[#allocation2 + $0x21] sm:$0xff] %vm172_vm1, %v6017_v39  ;;  %v14025_v52 = vpop.f32.mrb[4].mxu1 }
 0x5e1   : > { %v5990_v26 = vadd.f32 %v14025_v52, %v17074_v22  ;;  %v5833_v59 = vpop.f32.mrb[5].mxu1 }
 0x5e2   : > { %v5988_v10 = vadd.f32 %v17074_v22, %v5833_v59  ;;  %v14026_v38 = vpop.f32.mrb[6].mxu1 }
 0x5e3   : > { %v6022_v6 = vmax.f32 %v5990_v26, 0.0  ;;  %v5991_v53 = vadd.f32 %v14026_v38, %v17074_v22  ;;  %v5836_v58 = vpop.f32.mrb[7].mxu1 }
 0x5e4   : > { %v6020_v18 = vmax.f32 %v5988_v10, 0.0  ;;  %v5989_v50 = vadd.f32 %v17074_v22, %v5836_v58  ;;  %v6141_v57 = vld [vmem:[#allocation2 + $0x31] sm:$0xff] }
 0x5e5   : > { %6054 = vst.msk [vmem:[#allocation2 + $0x61] sm:$0xff] %vm172_vm1, %v6022_v6  ;;  %v6023_v61 = vmax.f32 %v5991_v53, 0.0  ;;  %v6139_v47 = vld [vmem:[#allocation2 + $0x19] sm:$0xff] }
 0x5e6   : > { %6052 = vst.msk [vmem:[#allocation2 + $0x49] sm:$0xff] %vm172_vm1, %v6020_v18  ;;  %v6021_v31 = vmax.f32 %v5989_v50, 0.0  ;;  %v6142_v46 = vld [vmem:[#allocation2 + $0x39] sm:$0xff] }
 0x5e7   : > { %6055 = vst.msk [vmem:[#allocation2 + $0x69] sm:$0xff] %vm172_vm1, %v6023_v61  ;;  %v6140_v55 = vld [vmem:[#allocation2 + $0x21] sm:$0xff]  ;;  %v17098_v4 = vpack.c.bf16 %v6142_v46, %v6141_v57 }
 0x5e8   : > { %6053 = vst.msk [vmem:[#allocation2 + $0x51] sm:$0xff] %vm172_vm1, %v6021_v31  ;;  %v14029_v56 = vpop.f32.mrb[8].mxu1  ;;  %v17092_v37 = vpack.c.bf16 %v6140_v55, %v6139_v47 }
 0x5e9   : > { %v5994_v27 = vadd.f32 %v14029_v56, %v17074_v22  ;;  %v5849_v19 = vpop.f32.mrb[9].mxu1 }
 0x5ea   : > { %v5992_v5 = vadd.f32 %v17074_v22, %v5849_v19  ;;  %v14030_v30 = vpop.f32.mrb[10].mxu1  ;;  %14060 = vmatmul.mubr.msk.bf16.vlgmr.msra.gmra.mrb[32].mxu0 %vm172_vm1, %v17092_v37 }
 0x5eb   : > { %v6026_v24 = vmax.f32 %v5994_v27, 0.0  ;;  %v5995_v9 = vadd.f32 %v14030_v30, %v17074_v22  ;;  %14092 = vmatpush3.bf16.msra.mxu0 %v15817_v21  ;;  %v5852_v62 = vpop.f32.mrb[11].mxu1  ;;  %14063 = vmatprep.mubr.msk.bf16.mxu0 %vm172_vm1, %v17098_v4 }
 0x5ec   : > { %v6024_v43 = vmax.f32 %v5992_v5, 0.0  ;;  %v5993_v51 = vadd.f32 %v17074_v22, %v5852_v62  ;;  %14093 = vmatprep.subr.bf16.mxu0 %v15818_v23  ;;  %v6145_v11 = vld [vmem:[#allocation2 + $0x61] sm:$0xff] }
 0x5ed   : > { %6058 = vst.msk [vmem:[#allocation2 + $0x91] sm:$0xff] %vm172_vm1, %v6026_v24  ;;  %v6027_v2 = vmax.f32 %v5995_v9, 0.0  ;;  %v6143_v35 = vld [vmem:[#allocation2 + $0x49] sm:$0xff] }
 0x5ee   : > { %6056 = vst.msk [vmem:[#allocation2 + $0x79] sm:$0xff] %vm172_vm1, %v6024_v43  ;;  %v6025_v8 = vmax.f32 %v5993_v51, 0.0  ;;  %v6146_v36 = vld [vmem:[#allocation2 + $0x69] sm:$0xff] }
 0x5ef   : > { %6059 = vst.msk [vmem:[#allocation2 + $0x99] sm:$0xff] %vm172_vm1, %v6027_v2  ;;  %v6144_v40 = vld [vmem:[#allocation2 + $0x51] sm:$0xff]  ;;  %14094 = vmatpush3.bf16.msra.mxu0 %v15818_v23  ;;  %v17120_v1 = vpack.c.bf16 %v6146_v36, %v6145_v11 }
 0x5f0   : > { %6057 = vst.msk [vmem:[#allocation2 + $0x81] sm:$0xff] %vm172_vm1, %v6025_v8  ;;  %v14033_v15 = vpop.f32.mrb[12].mxu1  ;;  %v17114_v45 = vpack.c.bf16 %v6144_v40, %v6143_v35  ;;  %14095 = vmatprep.subr.bf16.mxu0 %v15819_v17 }
 0x5f1   : > { %v5998_v3 = vadd.f32 %v14033_v15, %v17074_v22  ;;  %v5865_v44 = vpop.f32.mrb[13].mxu1 }
 0x5f2   : > { %v5996_v32 = vadd.f32 %v17074_v22, %v5865_v44  ;;  %v14034_v33 = vpop.f32.mrb[14].mxu1  ;;  %14064 = vmatmul.mubr.msk.bf16.gmra.mrb[36].mxu0 %vm172_vm1, %v17114_v45 }
 0x5f3   : > { %v6030_v14 = vmax.f32 %v5998_v3, 0.0  ;;  %v5999_v54 = vadd.f32 %v14034_v33, %v17074_v22  ;;  %v5868_v42 = vpop.f32.mrb[15].mxu1  ;;  %14067 = vmatprep.mubr.msk.bf16.mxu0 %vm172_vm1, %v17120_v1  ;;  %14096 = vmatpush3.bf16.msra.mxu0 %v15819_v17 }
 0x5f4   : > { %v6028_v49 = vmax.f32 %v5996_v32, 0.0  ;;  %v5997_v28 = vadd.f32 %v17074_v22, %v5868_v42  ;;  %14097 = vmatprep.subr.bf16.mxu0 %v15820_v63  ;;  %v6149_v25 = vld [vmem:[#allocation2 + $0x91] sm:$0xff] }
 0x5f5   : > { %6062 = vst.msk [vmem:[#allocation2 + $0xc1] sm:$0xff] %vm172_vm1, %v6030_v14  ;;  %v6031_v21 = vmax.f32 %v5999_v54, 0.0  ;;  %v6147_v12 = vld [vmem:[#allocation2 + $0x79] sm:$0xff] }
 0x5f6   : > { %6060 = vst.msk [vmem:[#allocation2 + $0xa9] sm:$0xff] %vm172_vm1, %v6028_v49  ;;  %v6029_v0 = vmax.f32 %v5997_v28, 0.0  ;;  %v6150_v7 = vld [vmem:[#allocation2 + $0x99] sm:$0xff] }
 0x5f7   : > { %6063 = vst.msk [vmem:[#allocation2 + $0xc9] sm:$0xff] %vm172_vm1, %v6031_v21  ;;  %v6148_v16 = vld [vmem:[#allocation2 + $0x81] sm:$0xff]  ;;  %14098 = vmatpush3.bf16.msra.mxu0 %v15820_v63  ;;  %v17142_v13 = vpack.c.bf16 %v6150_v7, %v6149_v25 }
 0x5f8   : > { %6061 = vst.msk [vmem:[#allocation2 + $0xb1] sm:$0xff] %vm172_vm1, %v6029_v0  ;;  %v14037_v60 = vpop.f32.mrb[16].mxu1  ;;  %v17138_v41 = vpack.c.bf16 %v6148_v16, %v6147_v12  ;;  %14131 = vmatprep.subr.bf16.mxu0 %v17132_v34 }
 0x5f9   : > { %v6002_v29 = vadd.f32 %v14037_v60, %v17074_v22  ;;  %v5881_v48 = vpop.f32.mrb[17].mxu1 }
 0x5fa   : > { %v6000_v20 = vadd.f32 %v17074_v22, %v5881_v48  ;;  %v14038_v39 = vpop.f32.mrb[18].mxu1  ;;  %14068 = vmatmul.mubr.msk.bf16.gmra.mrb[40].mxu0 %vm172_vm1, %v17138_v41 }
 0x5fb   : > { %v6034_v52 = vmax.f32 %v6002_v29, 0.0  ;;  %v6003_v26 = vadd.f32 %v14038_v39, %v17074_v22  ;;  %v5884_v59 = vpop.f32.mrb[19].mxu1  ;;  %14071 = vmatprep.mubr.msk.bf16.mxu0 %vm172_vm1, %v17142_v13 }
 0x5fc   : > { %v6032_v10 = vmax.f32 %v6000_v20, 0.0  ;;  %v6001_v38 = vadd.f32 %v17074_v22, %v5884_v59  ;;  %v6153_v46 = vld [vmem:[#allocation2 + $0xc1] sm:$0xff] }
 0x5fd   : > { %6066 = vst.msk [vmem:[#allocation2 + $0xf1] sm:$0xff] %vm172_vm1, %v6034_v52  ;;  %v6035_v6 = vmax.f32 %v6003_v26, 0.0  ;;  %v6151_v18 = vld [vmem:[#allocation2 + $0xa9] sm:$0xff] }
 0x5fe   : > { %6064 = vst.msk [vmem:[#allocation2 + $0xd9] sm:$0xff] %vm172_vm1, %v6032_v10  ;;  %v6033_v53 = vmax.f32 %v6001_v38, 0.0  ;;  %v6154_v58 = vld [vmem:[#allocation2 + $0xc9] sm:$0xff] }
 0x5ff   : > { %6067 = vst.msk [vmem:[#allocation2 + $0xf9] sm:$0xff] %vm172_vm1, %v6035_v6  ;;  %v6152_v50 = vld [vmem:[#allocation2 + $0xb1] sm:$0xff]  ;;  %v17158_v56 = vpack.c.bf16 %v6154_v58, %v6153_v46  ;;  %v6081_v46 = vld [vmem:[#allocation2 + $0x8] sm:$0xff] }
 0x600   : > { %6065 = vst.msk [vmem:[#allocation2 + $0xe1] sm:$0xff] %vm172_vm1, %v6033_v53  ;;  %v14041_v61 = vpop.f32.mrb[20].mxu1  ;;  %v17155_v31 = vpack.c.bf16 %v6152_v50, %v6151_v18 }
 0x601   : > { %v6006_v47 = vadd.f32 %v14041_v61, %v17074_v22  ;;  %v5897_v55 = vpop.f32.mrb[21].mxu1 }
 0x602   : > { %v6004_v57 = vadd.f32 %v17074_v22, %v5897_v55  ;;  %v14042_v23 = vpop.f32.mrb[22].mxu1  ;;  %14072 = vmatmul.mubr.msk.bf16.gmra.mrb[44].mxu0 %vm172_vm1, %v17155_v31 }
 0x603   : > { %v6038_v27 = vmax.f32 %v6006_v47, 0.0  ;;  %v6007_v19 = vadd.f32 %v14042_v23, %v17074_v22  ;;  %v5900_v5 = vpop.f32.mrb[23].mxu1  ;;  %14075 = vmatprep.mubr.msk.bf16.mxu0 %vm172_vm1, %v17158_v56 }
 0x604   : > { %v6036_v30 = vmax.f32 %v6004_v57, 0.0  ;;  %v6005_v24 = vadd.f32 %v17074_v22, %v5900_v5  ;;  %v6157_v36 = vld [vmem:[#allocation2 + $0xf1] sm:$0xff] }
 0x605   : > { %6070 = vst.msk [vmem:[#allocation2 + $0x121] sm:$0xff] %vm172_vm1, %v6038_v27  ;;  %v6039_v9 = vmax.f32 %v6007_v19, 0.0  ;;  %v6155_v51 = vld [vmem:[#allocation2 + $0xd9] sm:$0xff] }
 0x606   : > { %6068 = vst.msk [vmem:[#allocation2 + $0x109] sm:$0xff] %vm172_vm1, %v6036_v30  ;;  %v6037_v62 = vmax.f32 %v6005_v24, 0.0  ;;  %v6158_v43 = vld [vmem:[#allocation2 + $0xf9] sm:$0xff]  ;;  %v6084_v24 = vld [vmem:[#allocation2 + $0x30] sm:$0xff] }
 0x607   : > { %6071 = vst.msk [vmem:[#allocation2 + $0x129] sm:$0xff] %vm172_vm1, %v6039_v9  ;;  %v6156_v17 = vld [vmem:[#allocation2 + $0xe1] sm:$0xff]  ;;  %v17174_v15 = vpack.c.bf16 %v6158_v43, %v6157_v36  ;;  %v6085_v19 = vld [vmem:[#allocation2 + $0x38] sm:$0xff]  ;;  %v15823_v43 = vld [vmem:[%s18211_s1 + $0x290] sm:$0xff]  }
 0x608   : > { %6069 = vst.msk [vmem:[#allocation2 + $0x111] sm:$0xff] %vm172_vm1, %v6037_v62  ;;  %v14045_v2 = vpop.f32.mrb[24].mxu1  ;;  %v17171_v8 = vpack.c.bf16 %v6156_v17, %v6155_v51  ;;  %v6083_v27 = vld [vmem:[#allocation2 + $0x20] sm:$0xff]  ;;  %v6082_v5 = vld [vmem:[#allocation2 + $0x18] sm:$0xff]  ;;  %v15822_v9 = vld [vmem:[%s18211_s1 + $0x288] sm:$0xff]   ;;  %v17221_v62 = vpack.c.bf16 %v6085_v19, %v6084_v24 }
 0x609   : > { %v6010_v35 = vadd.f32 %v14045_v2, %v17074_v22  ;;  %v5913_v40 = vpop.f32.mrb[25].mxu1  ;;  %v17216_v30 = vpack.c.bf16 %v6083_v27, %v6082_v5  ;;  %v6087_v51 = vld [vmem:[#allocation2 + $0x50] sm:$0xff]  ;;  %v6089_v17 = vld [vmem:[#allocation2 + $0x68] sm:$0xff]  ;;  %v6662_v24 = vld [vmem:[#allocation2 + $0x1a] sm:$0xff] }
 0x60a   : > { %v6008_v11 = vadd.f32 %v17074_v22, %v5913_v40  ;;  %v14046_v63 = vpop.f32.mrb[26].mxu1  ;;  %14076 = vmatmul.mubr.msk.bf16.gmra.mrb[48].mxu0 %vm172_vm1, %v17171_v8  ;;  %v6086_v2 = vld [vmem:[#allocation2 + $0x48] sm:$0xff] }
 0x60b   : > { %v6042_v3 = vmax.f32 %v6010_v35, 0.0  ;;  %v6011_v44 = vadd.f32 %v14046_v63, %v17074_v22  ;;  %v5916_v32 = vpop.f32.mrb[27].mxu1  ;;  %14079 = vmatprep.mubr.msk.bf16.mxu0 %vm172_vm1, %v17174_v15  ;;  %v17231_v36 = vpack.c.bf16 %v6087_v51, %v6086_v2  ;;  %v6088_v35 = vld [vmem:[#allocation2 + $0x60] sm:$0xff]  ;;  %v15826_v2 = vld [vmem:[%s18211_s1 + $0x2a8] sm:$0xff]  }
 0x60c   : > { %v6040_v33 = vmax.f32 %v6008_v11, 0.0  ;;  %v6009_v14 = vadd.f32 %v17074_v22, %v5916_v32  ;;  %v6161_v12 = vld [vmem:[#allocation2 + $0x121] sm:$0xff]  ;;  %v17236_v40 = vpack.c.bf16 %v6089_v17, %v6088_v35 }
 0x60d   : > { %6074 = vst.msk [vmem:[#allocation2 + $0x151] sm:$0xff] %vm172_vm1, %v6042_v3  ;;  %v6043_v54 = vmax.f32 %v6011_v44, 0.0  ;;  %v6159_v28 = vld [vmem:[#allocation2 + $0x109] sm:$0xff]  ;;  %v15825_v11 = vld [vmem:[%s18211_s1 + $0x2a0] sm:$0xff]   ;;  %v6093_v3 = vld [vmem:[#allocation2 + $0x98] sm:$0xff] }
 0x60e   : > { %6072 = vst.msk [vmem:[#allocation2 + $0x139] sm:$0xff] %vm172_vm1, %v6040_v33  ;;  %v6041_v42 = vmax.f32 %v6009_v14, 0.0  ;;  %v6162_v49 = vld [vmem:[#allocation2 + $0x129] sm:$0xff]  ;;  %v6091_v63 = vld [vmem:[#allocation2 + $0x80] sm:$0xff]  ;;  %v6090_v44 = vld [vmem:[#allocation2 + $0x78] sm:$0xff] }
 0x60f   : > { %6075 = vst.msk [vmem:[#allocation2 + $0x159] sm:$0xff] %vm172_vm1, %v6043_v54  ;;  %v6160_v21 = vld [vmem:[#allocation2 + $0x111] sm:$0xff]  ;;  %v17190_v25 = vpack.c.bf16 %v6162_v49, %v6161_v12  ;;  %v17245_v32 = vpack.c.bf16 %v6091_v63, %v6090_v44  ;;  %v6094_v49 = vld [vmem:[#allocation2 + $0xa8] sm:$0xff]  ;;  %v6099_v12 = vld [vmem:[#allocation2 + $0xe0] sm:$0xff] }
 0x610   : > { %6073 = vst.msk [vmem:[#allocation2 + $0x141] sm:$0xff] %vm172_vm1, %v6041_v42  ;;  %v14049_v0 = vpop.f32.mrb[28].mxu1  ;;  %v17187_v7 = vpack.c.bf16 %v6160_v21, %v6159_v28  ;;  %v6092_v33 = vld [vmem:[#allocation2 + $0x90] sm:$0xff]  ;;  %v6097_v42 = vld [vmem:[#allocation2 + $0xc8] sm:$0xff]  ;;  %v6096_v21 = vld [vmem:[#allocation2 + $0xc0] sm:$0xff] }
 0x611   : > { %v6014_v16 = vadd.f32 %v14049_v0, %v17074_v22  ;;  %v5929_v60 = vpop.f32.mrb[29].mxu1  ;;  %v17247_v14 = vpack.c.bf16 %v6093_v3, %v6092_v33  ;;  %v6095_v54 = vld [vmem:[#allocation2 + $0xb0] sm:$0xff]  ;;  %v17255_v0 = vpack.c.bf16 %v6097_v42, %v6096_v21  ;;  %v6665_v51 = vld [vmem:[#allocation2 + $0x3a] sm:$0xff]  ;;  %v6668_v44 = vld [vmem:[#allocation2 + $0x62] sm:$0xff] }
 0x612   : > { %v6012_v29 = vadd.f32 %v17074_v22, %v5929_v60  ;;  %v14050_v48 = vpop.f32.mrb[30].mxu1  ;;  %14080 = vmatmul.mubr.msk.bf16.gmra.mrb[52].mxu0 %vm172_vm1, %v17187_v7  ;;  %v17253_v28 = vpack.c.bf16 %v6095_v54, %v6094_v49  ;;  %v6098_v60 = vld [vmem:[#allocation2 + $0xd8] sm:$0xff]  ;;  %v6666_v63 = vld [vmem:[#allocation2 + $0x4a] sm:$0xff]  ;;  %v15829_v49 = vld [vmem:[%s18211_s1 + $0x2c0] sm:$0xff]  }
 0x613   : > { %v6046_v20 = vmax.f32 %v6014_v16, 0.0  ;;  %v6015_v39 = vadd.f32 %v14050_v48, %v17074_v22  ;;  %v5932_v52 = vpop.f32.mrb[31].mxu1  ;;  %14083 = vmatprep.mubr.msk.bf16.mxu0 %vm172_vm1, %v17190_v25  ;;  %v6101_v16 = vld [vmem:[#allocation2 + $0xf8] sm:$0xff]  ;;  %v6100_v48 = vld [vmem:[#allocation2 + $0xf0] sm:$0xff] }
 0x614   : > { %v6044_v26 = vmax.f32 %v6012_v29, 0.0  ;;  %v6013_v59 = vadd.f32 %v17074_v22, %v5932_v52  ;;  %v6165_v50 = vld [vmem:[#allocation2 + $0x151] sm:$0xff]  ;;  %v6080_v22 = vld [vmem:[#allocation2] sm:$0xff]  ;;  %v17261_v29 = vpack.c.bf16 %v6099_v12, %v6098_v60  ;;  %v6105_v52 = vld [vmem:[#allocation2 + $0x128] sm:$0xff] }
 0x615   : > { %6078 = vst.msk [vmem:[#allocation2 + $0x181] sm:$0xff] %vm172_vm1, %v6046_v20  ;;  %v6047_v10 = vmax.f32 %v6015_v39, 0.0  ;;  %v6163_v53 = vld [vmem:[#allocation2 + $0x139] sm:$0xff]  ;;  %v6112_v57 = vpack.c.bf16 %v6081_v46, %v6080_v22  ;;  %v17263_v20 = vpack.c.bf16 %v6101_v16, %v6100_v48  ;;  %v6103_v39 = vld [vmem:[#allocation2 + $0x110] sm:$0xff]  ;;  %v6671_v12 = vld [vmem:[#allocation2 + $0x82] sm:$0xff] }
 0x616   : > { %6076 = vst.msk [vmem:[#allocation2 + $0x169] sm:$0xff] %vm172_vm1, %v6044_v26  ;;  %v6045_v38 = vmax.f32 %v6013_v59, 0.0  ;;  %v6166_v6 = vld [vmem:[#allocation2 + $0x159] sm:$0xff]  ;;  %v6102_v26 = vld [vmem:[#allocation2 + $0x108] sm:$0xff]  ;;  %v6108_v22 = vld [vmem:[#allocation2 + $0x150] sm:$0xff] }
 0x617   : > { %6079 = vst.msk [vmem:[#allocation2 + $0x189] sm:$0xff] %vm172_vm1, %v6047_v10  ;;  %v6164_v58 = vld [vmem:[#allocation2 + $0x141] sm:$0xff]  ;;  %v17205_v61 = vpack.c.bf16 %v6166_v6, %v6165_v50  ;;  %v17269_v59 = vpack.c.bf16 %v6103_v39, %v6102_v26  ;;  %v6667_v3 = vld [vmem:[#allocation2 + $0x52] sm:$0xff]  ;;  %v6669_v33 = vld [vmem:[#allocation2 + $0x6a] sm:$0xff] }
 0x618   : > { %6077 = vst.msk [vmem:[#allocation2 + $0x171] sm:$0xff] %vm172_vm1, %v6045_v38  ;;  %v17203_v18 = vpack.c.bf16 %v6164_v58, %v6163_v53  ;;  %v6104_v10 = vld [vmem:[#allocation2 + $0x120] sm:$0xff]  ;;  %v6109_v53 = vld [vmem:[#allocation2 + $0x158] sm:$0xff]  ;;  %v17304_v54 = vpack.c.bf16 %v6667_v3, %v6666_v63  ;;  %v17309_v42 = vpack.c.bf16 %v6669_v33, %v6668_v44 }
 0x619   : > { %v17271_v38 = vpack.c.bf16 %v6105_v52, %v6104_v10  ;;  %v6107_v6 = vld [vmem:[#allocation2 + $0x140] sm:$0xff]  ;;  %v6106_v58 = vld [vmem:[#allocation2 + $0x138] sm:$0xff]  ;;  %v17279_v46 = vpack.c.bf16 %v6109_v53, %v6108_v22  ;;  %v6674_v52 = vld [vmem:[#allocation2 + $0xaa] sm:$0xff] }
 0x61a   : > { %14084 = vmatmul.mubr.msk.bf16.gmra.mrb[56].mxu0 %vm172_vm1, %v17203_v18  ;;  %v17277_v50 = vpack.c.bf16 %v6107_v6, %v6106_v58  ;;  %v6670_v21 = vld [vmem:[#allocation2 + $0x7a] sm:$0xff]  ;;  %v6672_v16 = vld [vmem:[#allocation2 + $0x92] sm:$0xff]  ;;  %v6676_v10 = vld [vmem:[#allocation2 + $0xc2] sm:$0xff] }
 0x61b   : > { %14087 = vmatprep.mubr.msk.bf16.mxu0 %vm172_vm1, %v17205_v61  ;;  %v6673_v60 = vld [vmem:[#allocation2 + $0x9a] sm:$0xff]  ;;  %v17318_v48 = vpack.c.bf16 %v6671_v12, %v6670_v21  ;;  %v6675_v26 = vld [vmem:[#allocation2 + $0xb2] sm:$0xff]  ;;  %v6677_v6 = vld [vmem:[#allocation2 + $0xca] sm:$0xff] }
 0x61c   : > { %v17320_v39 = vpack.c.bf16 %v6673_v60, %v6672_v16  ;;  %v17326_v53 = vpack.c.bf16 %v6675_v26, %v6674_v52  ;;  %v17328_v58 = vpack.c.bf16 %v6677_v6, %v6676_v10  ;;  %v6678_v22 = vld [vmem:[#allocation2 + $0xda] sm:$0xff]  ;;  %v6687_v3 = vld [vmem:[#allocation2 + $0x142] sm:$0xff]  ;;  %v6688_v44 = vld [vmem:[#allocation2 + $0x152] sm:$0xff] }
 0x61d   : > { %v6167_v47 = vld [vmem:[#allocation2 + $0x169] sm:$0xff]  ;;  %v6686_v63 = vld [vmem:[#allocation2 + $0x13a] sm:$0xff] }
 0x61e   : > { %v6110_v27 = vld [vmem:[#allocation2 + $0x168] sm:$0xff]  ;;  %v6689_v33 = vld [vmem:[#allocation2 + $0x15a] sm:$0xff]  ;;  %v15831_v26 = vld [vmem:[%s18211_s1 + $0x2d0] sm:$0xff]  }
 0x61f   : > { %v6168_v55 = vld [vmem:[#allocation2 + $0x171] sm:$0xff]  ;;  %v17352_v21 = vpack.c.bf16 %v6689_v33, %v6688_v44  ;;  %v15830_v52 = vld [vmem:[%s18211_s1 + $0x2c8] sm:$0xff]   ;;  %v7012_v6 = vld [vmem:[#allocation2 + $0x180] sm:$0xff] }
 0x620   : > { %v17211_v23 = vpack.c.bf16 %v6168_v55, %v6167_v47  ;;  %v6660_v47 = vld [vmem:[#allocation2 + $0x2] sm:$0xff]  ;;  %v6661_v55 = vld [vmem:[#allocation2 + $0xa] sm:$0xff]  ;;  %v6691_v16 = vld [vmem:[#allocation2 + $0x172] sm:$0xff] }
 0x621   : > { %v6692_v19 = vpack.c.bf16 %v6661_v55, %v6660_v47  ;;  %v6679_v47 = vld [vmem:[#allocation2 + $0xe2] sm:$0xff]  ;;  %v6680_v55 = vld [vmem:[#allocation2 + $0xf2] sm:$0xff]  ;;  %v6690_v12 = vld [vmem:[#allocation2 + $0x16a] sm:$0xff] }
 0x622   : > { %14088 = vmatmul.mubr.msk.bf16.gmra.mrb[60].mxu0 %vm172_vm1, %v17211_v23  ;;  %v17358_v60 = vpack.c.bf16 %v6691_v16, %v6690_v12  ;;  %v7013_v10 = vld [vmem:[#allocation2 + $0x188] sm:$0xff]  ;;  %v15848_v44 = vld [vmem:[%s18211_s1 + $0x358] sm:$0xff]  }
 0x623   : > { %14099 = vmatprep.mubr.msk.bf16.mxu0 %vm172_vm1, %v6112_v57  ;;  %v6111_v57 = vld [vmem:[#allocation2 + $0x170] sm:$0xff] }
 0x624   : > { %v17285_v5 = vpack.c.bf16 %v6111_v57, %v6110_v27  ;;  %v6681_v57 = vld [vmem:[#allocation2 + $0xfa] sm:$0xff]  ;;  %v17334_v27 = vpack.c.bf16 %v6679_v47, %v6678_v22  ;;  %v17404_v22 = vpack.c.bf16 %v7013_v10, %v7012_v6  ;;  %v15834_v47 = vld [vmem:[%s18211_s1 + $0x2e8] sm:$0xff]   ;;  %v8281_v12 = vld [vmem:[#allocation2 + $0xb1] sm:$0xff] }
 0x625   : > { %v8283_v16 = vld [vmem:[#allocation2 + $0xc9] sm:$0xff]  ;;  %v8285_v10 = vld [vmem:[#allocation2 + $0xe1] sm:$0xff]  ;;  %v8287_v6 = vld [vmem:[#allocation2 + $0xf9] sm:$0xff] }
 0x62a   : > { %14100 = vmatmul.mubr.msk.bf16.vlgmr.msra.gmra.mrb[32].mxu0 %vm172_vm1, %v17216_v30 }
 0x62b   : > { %14132 = vmatpush3.bf16.msra.mxu0 %v17132_v34  ;;  %14103 = vmatprep.mubr.msk.bf16.mxu0 %vm172_vm1, %v17221_v62  ;;  %v15824_v34 = vld [vmem:[%s18211_s1 + $0x298] sm:$0xff]  }
 0x62c   : > { %14133 = vmatprep.subr.bf16.mxu0 %v15822_v9 }
 0x62f   : > { %14134 = vmatpush3.bf16.msra.mxu0 %v15822_v9  ;;  %v6663_v9 = vld [vmem:[#allocation2 + $0x22] sm:$0xff] }
 0x630   : > { %14135 = vmatprep.subr.bf16.mxu0 %v15823_v43  ;;  %v17290_v17 = vpack.c.bf16 %v6663_v9, %v6662_v24  ;;  %v6682_v24 = vld [vmem:[#allocation2 + $0x10a] sm:$0xff]  ;;  %v6683_v9 = vld [vmem:[#allocation2 + $0x112] sm:$0xff] }
 0x632   : > { %14104 = vmatmul.mubr.msk.bf16.gmra.mrb[36].mxu0 %vm172_vm1, %v17231_v36 }
 0x633   : > { %14107 = vmatprep.mubr.msk.bf16.mxu0 %vm172_vm1, %v17236_v40  ;;  %14136 = vmatpush3.bf16.msra.mxu0 %v15823_v43  ;;  %v6664_v43 = vld [vmem:[#allocation2 + $0x32] sm:$0xff] }
 0x634   : > { %14137 = vmatprep.subr.bf16.mxu0 %v15824_v34  ;;  %v17295_v35 = vpack.c.bf16 %v6665_v51, %v6664_v43  ;;  %v6684_v43 = vld [vmem:[#allocation2 + $0x122] sm:$0xff]  ;;  %v6685_v51 = vld [vmem:[#allocation2 + $0x12a] sm:$0xff] }
 0x637   : > { %14138 = vmatpush3.bf16.msra.mxu0 %v15824_v34  ;;  %v15827_v34 = vld [vmem:[%s18211_s1 + $0x2b0] sm:$0xff]  }
 0x638   : > { %14171 = vmatprep.subr.bf16.mxu0 %v15825_v11 }
 0x63a   : > { %14108 = vmatmul.mubr.msk.bf16.gmra.mrb[40].mxu0 %vm172_vm1, %v17245_v32 }
 0x63b   : > { %14111 = vmatprep.mubr.msk.bf16.mxu0 %vm172_vm1, %v17247_v14 }
 0x642   : > { %14112 = vmatmul.mubr.msk.bf16.gmra.mrb[44].mxu0 %vm172_vm1, %v17253_v28 }
 0x643   : > { %14115 = vmatprep.mubr.msk.bf16.mxu0 %vm172_vm1, %v17255_v0 }
 0x64a   : > { %14116 = vmatmul.mubr.msk.bf16.gmra.mrb[48].mxu0 %vm172_vm1, %v17261_v29 }
 0x64b   : > { %14119 = vmatprep.mubr.msk.bf16.mxu0 %vm172_vm1, %v17263_v20 }
 0x652   : > { %14120 = vmatmul.mubr.msk.bf16.gmra.mrb[52].mxu0 %vm172_vm1, %v17269_v59 }
 0x653   : > { %14123 = vmatprep.mubr.msk.bf16.mxu0 %vm172_vm1, %v17271_v38 }
 0x65a   : > { %14124 = vmatmul.mubr.msk.bf16.gmra.mrb[56].mxu0 %vm172_vm1, %v17277_v50 }
 0x65b   : > { %14127 = vmatprep.mubr.msk.bf16.mxu0 %vm172_vm1, %v17279_v46 }
 0x662   : > { %14128 = vmatmul.mubr.msk.bf16.gmra.mrb[60].mxu0 %vm172_vm1, %v17285_v5 }
 0x663   : > { %14139 = vmatprep.mubr.msk.bf16.mxu0 %vm172_vm1, %v6692_v19  ;;  %v17336_v19 = vpack.c.bf16 %v6681_v57, %v6680_v55  ;;  %v15835_v55 = vld [vmem:[%s18211_s1 + $0x2f0] sm:$0xff]  }
 0x66a   : > { %14140 = vmatmul.mubr.msk.bf16.vlgmr.msra.gmra.mrb[32].mxu0 %vm172_vm1, %v17290_v17 }
 0x66b   : > { %14172 = vmatpush3.bf16.msra.mxu0 %v15825_v11  ;;  %14143 = vmatprep.mubr.msk.bf16.mxu0 %vm172_vm1, %v17295_v35  ;;  %v15828_v11 = vld [vmem:[%s18211_s1 + $0x2b8] sm:$0xff]  }
 0x66c   : > { %14173 = vmatprep.subr.bf16.mxu0 %v15826_v2 }
 0x66f   : > { %14174 = vmatpush3.bf16.msra.mxu0 %v15826_v2  ;;  %v17342_v2 = vpack.c.bf16 %v6683_v9, %v6682_v24  ;;  %v15847_v24 = vld [vmem:[%s18211_s1 + $0x350] sm:$0xff]   ;;  %v8277_v9 = vld [vmem:[#allocation2 + $0x81] sm:$0xff] }
 0x670   : > { %14175 = vmatprep.subr.bf16.mxu0 %v15827_v34 }
 0x672   : > { %14144 = vmatmul.mubr.msk.bf16.gmra.mrb[36].mxu0 %vm172_vm1, %v17304_v54 }
 0x673   : > { %14147 = vmatprep.mubr.msk.bf16.mxu0 %vm172_vm1, %v17309_v42  ;;  %14176 = vmatpush3.bf16.msra.mxu0 %v15827_v34  ;;  %v17344_v34 = vpack.c.bf16 %v6685_v51, %v6684_v43  ;;  %v8279_v43 = vld [vmem:[#allocation2 + $0x99] sm:$0xff] }
 0x674   : > { %14177 = vmatprep.subr.bf16.mxu0 %v15828_v11  ;;  %v8276_v51 = vld [vmem:[#allocation2 + $0x79] sm:$0xff] }
 0x677   : > { %14178 = vmatpush3.bf16.msra.mxu0 %v15828_v11  ;;  %v17350_v11 = vpack.c.bf16 %v6687_v3, %v6686_v63  ;;  %v8305_v63 = vpack.c.bf16 %v8277_v9, %v8276_v51  ;;  %v8278_v3 = vld [vmem:[#allocation2 + $0x91] sm:$0xff] }
 0x678   : > { %14211 = vmatprep.subr.bf16.mxu0 %v15829_v49  ;;  %v8306_v33 = vpack.c.bf16 %v8279_v43, %v8278_v3 }
 0x67a   : > { %14148 = vmatmul.mubr.msk.bf16.gmra.mrb[40].mxu0 %vm172_vm1, %v17318_v48 }
 0x67b   : > { %14151 = vmatprep.mubr.msk.bf16.mxu0 %vm172_vm1, %v17320_v39 }
 0x682   : > { %14152 = vmatmul.mubr.msk.bf16.gmra.mrb[44].mxu0 %vm172_vm1, %v17326_v53 }
 0x683   : > { %14155 = vmatprep.mubr.msk.bf16.mxu0 %vm172_vm1, %v17328_v58 }
 0x68a   : > { %14156 = vmatmul.mubr.msk.bf16.gmra.mrb[48].mxu0 %vm172_vm1, %v17334_v27 }
 0x68b   : > { %14159 = vmatprep.mubr.msk.bf16.mxu0 %vm172_vm1, %v17336_v19 }
 0x692   : > { %14160 = vmatmul.mubr.msk.bf16.gmra.mrb[52].mxu0 %vm172_vm1, %v17342_v2 }
 0x693   : > { %14163 = vmatprep.mubr.msk.bf16.mxu0 %vm172_vm1, %v17344_v34 }
 0x69a   : > { %14164 = vmatmul.mubr.msk.bf16.gmra.mrb[56].mxu0 %vm172_vm1, %v17350_v11 }
 0x69b   : > { %14167 = vmatprep.mubr.msk.bf16.mxu0 %vm172_vm1, %v17352_v21 }
 0x6a2   : > { %14168 = vmatmul.mubr.msk.bf16.gmra.mrb[60].mxu0 %vm172_vm1, %v17358_v60 }
 0x6a3   : > { %14179 = vmatprep.mubr.msk.bf16.mxu0 %vm172_vm1, %v17216_v30  ;;  %v15832_v30 = vld [vmem:[%s18211_s1 + $0x2d8] sm:$0xff]  }
 0x6aa   : > { %14180 = vmatmul.mubr.msk.bf16.vlgmr.msra.gmra.mrb[32].mxu0 %vm172_vm1, %v17221_v62 }
 0x6ab   : > { %14212 = vmatpush3.bf16.msra.mxu0 %v15829_v49  ;;  %14183 = vmatprep.mubr.msk.bf16.mxu0 %vm172_vm1, %v17231_v36  ;;  %v15833_v49 = vld [vmem:[%s18211_s1 + $0x2e0] sm:$0xff]  }
 0x6ac   : > { %14213 = vmatprep.subr.bf16.mxu0 %v15830_v52 }
 0x6af   : > { %14214 = vmatpush3.bf16.msra.mxu0 %v15830_v52  ;;  %v8280_v52 = vld [vmem:[#allocation2 + $0xa9] sm:$0xff] }
 0x6b0   : > { %14215 = vmatprep.subr.bf16.mxu0 %v15831_v26 }
 0x6b2   : > { %14184 = vmatmul.mubr.msk.bf16.gmra.mrb[36].mxu0 %vm172_vm1, %v17236_v40 }
 0x6b3   : > { %14187 = vmatprep.mubr.msk.bf16.mxu0 %vm172_vm1, %v17245_v32  ;;  %14216 = vmatpush3.bf16.msra.mxu0 %v15831_v26  ;;  %v8307_v26 = vpack.c.bf16 %v8281_v12, %v8280_v52 }
 0x6b4   : > { %14217 = vmatprep.subr.bf16.mxu0 %v15832_v30 }
 0x6b7   : > { %14218 = vmatpush3.bf16.msra.mxu0 %v15832_v30  ;;  %v8282_v30 = vld [vmem:[#allocation2 + $0xc1] sm:$0xff] }
 0x6b8   : > { %14251 = vmatprep.subr.bf16.mxu0 %v15833_v49 }
 0x6ba   : > { %14188 = vmatmul.mubr.msk.bf16.gmra.mrb[40].mxu0 %vm172_vm1, %v17247_v14 }
 0x6bb   : > { %14191 = vmatprep.mubr.msk.bf16.mxu0 %vm172_vm1, %v17253_v28 }
 0x6c2   : > { %14192 = vmatmul.mubr.msk.bf16.gmra.mrb[44].mxu0 %vm172_vm1, %v17255_v0 }
 0x6c3   : > { %14195 = vmatprep.mubr.msk.bf16.mxu0 %vm172_vm1, %v17261_v29 }
 0x6ca   : > { %14196 = vmatmul.mubr.msk.bf16.gmra.mrb[48].mxu0 %vm172_vm1, %v17263_v20 }
 0x6cb   : > { %14199 = vmatprep.mubr.msk.bf16.mxu0 %vm172_vm1, %v17269_v59 }
 0x6d2   : > { %14200 = vmatmul.mubr.msk.bf16.gmra.mrb[52].mxu0 %vm172_vm1, %v17271_v38 }
 0x6d3   : > { %14203 = vmatprep.mubr.msk.bf16.mxu0 %vm172_vm1, %v17277_v50 }
 0x6da   : > { %14204 = vmatmul.mubr.msk.bf16.gmra.mrb[56].mxu0 %vm172_vm1, %v17279_v46 }
 0x6db   : > { %14207 = vmatprep.mubr.msk.bf16.mxu0 %vm172_vm1, %v17285_v5 }
 0x6e2   : > { %14208 = vmatmul.mubr.msk.bf16.gmra.mrb[60].mxu0 %vm172_vm1, %v17404_v22 }
 0x6e3   : > { %14219 = vmatprep.mubr.msk.bf16.mxu0 %vm172_vm1, %v17092_v37  ;;  %v15836_v37 = vld [vmem:[%s18211_s1 + $0x2f8] sm:$0xff]  }
 0x6ea   : > { %14220 = vmatmul.mubr.msk.bf16.vlgmr.msra.gmra.mrb[32].mxu0 %vm172_vm1, %v17098_v4  ;;  %v15837_v4 = vld [vmem:[%s18211_s1 + $0x300] sm:$0xff]  }
 0x6eb   : > { %14252 = vmatpush3.bf16.msra.mxu0 %v15833_v49  ;;  %14223 = vmatprep.mubr.msk.bf16.mxu0 %vm172_vm1, %v17114_v45  ;;  %v7335_v45 = vld [vmem:[#allocation2 + $0x189] sm:$0xff]  ;;  %v8308_v49 = vpack.c.bf16 %v8283_v16, %v8282_v30 }
 0x6ec   : > { %14253 = vmatprep.subr.bf16.mxu0 %v15834_v47  ;;  %v15852_v30 = vld [vmem:[%s18211_s1 + $0x368] sm:$0xff]  }
 0x6ef   : > { %14254 = vmatpush3.bf16.msra.mxu0 %v15834_v47 }
 0x6f0   : > { %14255 = vmatprep.subr.bf16.mxu0 %v15835_v55 }
 0x6f2   : > { %14224 = vmatmul.mubr.msk.bf16.gmra.mrb[36].mxu0 %vm172_vm1, %v17120_v1  ;;  %v7334_v1 = vld [vmem:[#allocation2 + $0x181] sm:$0xff] }
 0x6f3   : > { %14227 = vmatprep.mubr.msk.bf16.mxu0 %vm172_vm1, %v17138_v41  ;;  %14256 = vmatpush3.bf16.msra.mxu0 %v15835_v55  ;;  %v17450_v41 = vpack.c.bf16 %v7335_v45, %v7334_v1  ;;  %v8286_v55 = vld [vmem:[#allocation2 + $0xf1] sm:$0xff]  ;;  %v8291_v45 = vld [vmem:[#allocation2 + $0x129] sm:$0xff] }
 0x6f4   : > { %14257 = vmatprep.subr.bf16.mxu0 %v15836_v37  ;;  %v8288_v1 = vld [vmem:[#allocation2 + $0x109] sm:$0xff] }
 0x6f7   : > { %14258 = vmatpush3.bf16.msra.mxu0 %v15836_v37  ;;  %v8310_v37 = vpack.c.bf16 %v8287_v6, %v8286_v55 }
 0x6f8   : > { %14291 = vmatprep.subr.bf16.mxu0 %v15837_v4 }
 0x6fa   : > { %14228 = vmatmul.mubr.msk.bf16.gmra.mrb[40].mxu0 %vm172_vm1, %v17142_v13  ;;  %v15838_v13 = vld [vmem:[%s18211_s1 + $0x308] sm:$0xff]  }
 0x6fb   : > { %14231 = vmatprep.mubr.msk.bf16.mxu0 %vm172_vm1, %v17155_v31  ;;  %v15839_v31 = vld [vmem:[%s18211_s1 + $0x310] sm:$0xff]  }
 0x702   : > { %14232 = vmatmul.mubr.msk.bf16.gmra.mrb[44].mxu0 %vm172_vm1, %v17158_v56  ;;  %v15840_v56 = vld [vmem:[%s18211_s1 + $0x318] sm:$0xff]  }
 0x703   : > { %14235 = vmatprep.mubr.msk.bf16.mxu0 %vm172_vm1, %v17171_v8  ;;  %v15841_v8 = vld [vmem:[%s18211_s1 + $0x320] sm:$0xff]  }
 0x70a   : > { %14236 = vmatmul.mubr.msk.bf16.gmra.mrb[48].mxu0 %vm172_vm1, %v17174_v15  ;;  %v7656_v15 = vld [vmem:[#allocation2 + $0x182] sm:$0xff] }
 0x70b   : > { %14239 = vmatprep.mubr.msk.bf16.mxu0 %vm172_vm1, %v17187_v7  ;;  %v7657_v7 = vld [vmem:[#allocation2 + $0x18a] sm:$0xff] }
 0x712   : > { %14240 = vmatmul.mubr.msk.bf16.gmra.mrb[52].mxu0 %vm172_vm1, %v17190_v25  ;;  %v17496_v25 = vpack.c.bf16 %v7657_v7, %v7656_v15  ;;  %v8295_v15 = vld [vmem:[#allocation2 + $0x159] sm:$0xff] }
 0x713   : > { %14243 = vmatprep.mubr.msk.bf16.mxu0 %vm172_vm1, %v17203_v18  ;;  %v15842_v18 = vld [vmem:[%s18211_s1 + $0x328] sm:$0xff]   ;;  %v8292_v7 = vld [vmem:[#allocation2 + $0x139] sm:$0xff] }
 0x71a   : > { %14244 = vmatmul.mubr.msk.bf16.gmra.mrb[56].mxu0 %vm172_vm1, %v17205_v61  ;;  %v15843_v61 = vld [vmem:[%s18211_s1 + $0x330] sm:$0xff]  }
 0x71b   : > { %14247 = vmatprep.mubr.msk.bf16.mxu0 %vm172_vm1, %v17211_v23  ;;  %v15844_v23 = vld [vmem:[%s18211_s1 + $0x338] sm:$0xff]  }
 0x722   : > { %14248 = vmatmul.mubr.msk.bf16.gmra.mrb[60].mxu0 %vm172_vm1, %v17450_v41 }
 0x723   : > { %14259 = vmatprep.mubr.msk.bf16.mxu0 %vm172_vm1, %v17290_v17  ;;  %v15846_v17 = vld [vmem:[%s18211_s1 + $0x348] sm:$0xff]  }
 0x72a   : > { %14260 = vmatmul.mubr.msk.bf16.vlgmr.msra.gmra.mrb[32].mxu0 %vm172_vm1, %v17295_v35 }
 0x72b   : > { %14292 = vmatpush3.bf16.msra.mxu0 %v15837_v4  ;;  %14263 = vmatprep.mubr.msk.bf16.mxu0 %vm172_vm1, %v17304_v54  ;;  %v8289_v4 = vld [vmem:[#allocation2 + $0x111] sm:$0xff] }
 0x72c   : > { %14293 = vmatprep.subr.bf16.mxu0 %v15838_v13 }
 0x72f   : > { %14294 = vmatpush3.bf16.msra.mxu0 %v15838_v13  ;;  %v8311_v13 = vpack.c.bf16 %v8289_v4, %v8288_v1 }
 0x730   : > { %14295 = vmatprep.subr.bf16.mxu0 %v15839_v31 }
 0x732   : > { %14264 = vmatmul.mubr.msk.bf16.gmra.mrb[36].mxu0 %vm172_vm1, %v17309_v42 }
 0x733   : > { %14267 = vmatprep.mubr.msk.bf16.mxu0 %vm172_vm1, %v17318_v48  ;;  %14296 = vmatpush3.bf16.msra.mxu0 %v15839_v31  ;;  %v8290_v31 = vld [vmem:[#allocation2 + $0x121] sm:$0xff] }
 0x734   : > { %14297 = vmatprep.subr.bf16.mxu0 %v15840_v56 }
 0x737   : > { %14298 = vmatpush3.bf16.msra.mxu0 %v15840_v56  ;;  %v8312_v56 = vpack.c.bf16 %v8291_v45, %v8290_v31 }
 0x738   : > { %14331 = vmatprep.subr.bf16.mxu0 %v15841_v8 }
 0x73a   : > { %14268 = vmatmul.mubr.msk.bf16.gmra.mrb[40].mxu0 %vm172_vm1, %v17320_v39 }
 0x73b   : > { %14271 = vmatprep.mubr.msk.bf16.mxu0 %vm172_vm1, %v17326_v53 }
 0x742   : > { %14272 = vmatmul.mubr.msk.bf16.gmra.mrb[44].mxu0 %vm172_vm1, %v17328_v58 }
 0x743   : > { %14275 = vmatprep.mubr.msk.bf16.mxu0 %vm172_vm1, %v17334_v27 }
 0x74a   : > { %14276 = vmatmul.mubr.msk.bf16.gmra.mrb[48].mxu0 %vm172_vm1, %v17336_v19 }
 0x74b   : > { %14279 = vmatprep.mubr.msk.bf16.mxu0 %vm172_vm1, %v17342_v2 }
 0x752   : > { %14280 = vmatmul.mubr.msk.bf16.gmra.mrb[52].mxu0 %vm172_vm1, %v17344_v34 }
 0x753   : > { %14283 = vmatprep.mubr.msk.bf16.mxu0 %vm172_vm1, %v17350_v11 }
 0x75a   : > { %14284 = vmatmul.mubr.msk.bf16.gmra.mrb[56].mxu0 %vm172_vm1, %v17352_v21 }
 0x75b   : > { %14287 = vmatprep.mubr.msk.bf16.mxu0 %vm172_vm1, %v17358_v60 }
 0x762   : > { %14288 = vmatmul.mubr.msk.bf16.gmra.mrb[60].mxu0 %vm172_vm1, %v17496_v25 }
 0x763   : > { %14299 = vmatprep.mubr.msk.bf16.mxu0 %vm172_vm1, %v17221_v62  ;;  %v15845_v62 = vld [vmem:[%s18211_s1 + $0x340] sm:$0xff]  }
 0x76a   : > { %14300 = vmatmul.mubr.msk.bf16.vlgmr.msra.gmra.mrb[32].mxu0 %vm172_vm1, %v17231_v36  ;;  %v7978_v36 = vld [vmem:[#allocation2 + $0x198] sm:$0xff] }
 0x76b   : > { %14332 = vmatpush3.bf16.msra.mxu0 %v15841_v8  ;;  %14303 = vmatprep.mubr.msk.bf16.mxu0 %vm172_vm1, %v17236_v40  ;;  %v7979_v40 = vld [vmem:[#allocation2 + $0x1a0] sm:$0xff] }
 0x76c   : > { %14333 = vmatprep.subr.bf16.mxu0 %v15842_v18  ;;  %v8293_v8 = vld [vmem:[#allocation2 + $0x141] sm:$0xff] }
 0x76f   : > { %14334 = vmatpush3.bf16.msra.mxu0 %v15842_v18  ;;  %v8313_v18 = vpack.c.bf16 %v8293_v8, %v8292_v7 }
 0x770   : > { %14335 = vmatprep.subr.bf16.mxu0 %v15843_v61 }
 0x772   : > { %14304 = vmatmul.mubr.msk.bf16.gmra.mrb[36].mxu0 %vm172_vm1, %v17245_v32  ;;  %v7995_v32 = vpack.c.bf16 %v7979_v40, %v7978_v36  ;;  %v8296_v36 = vld [vmem:[#allocation2 + $0x169] sm:$0xff] }
 0x773   : > { %14307 = vmatprep.mubr.msk.bf16.mxu0 %vm172_vm1, %v17247_v14  ;;  %14336 = vmatpush3.bf16.msra.mxu0 %v15843_v61  ;;  %v8271_v14 = vld [vmem:[#allocation2 + $0x39] sm:$0xff]  ;;  %v8294_v61 = vld [vmem:[#allocation2 + $0x151] sm:$0xff] }
 0x774   : > { %14337 = vmatprep.subr.bf16.mxu0 %v15844_v23 }
 0x777   : > { %14338 = vmatpush3.bf16.msra.mxu0 %v15844_v23  ;;  %v8314_v23 = vpack.c.bf16 %v8295_v15, %v8294_v61 }
 0x778   : > { %14371 = vmatprep.subr.bf16.mxu0 %v15845_v62 }
 0x77a   : > { %14308 = vmatmul.mubr.msk.bf16.gmra.mrb[40].mxu0 %vm172_vm1, %v17253_v28  ;;  %v8270_v28 = vld [vmem:[#allocation2 + $0x31] sm:$0xff] }
 0x77b   : > { %14311 = vmatprep.mubr.msk.bf16.mxu0 %vm172_vm1, %v17255_v0  ;;  %v8302_v0 = vpack.c.bf16 %v8271_v14, %v8270_v28  ;;  %v8301_v14 = vld [vmem:[#allocation2 + $0x1a1] sm:$0xff] }
 0x782   : > { %14312 = vmatmul.mubr.msk.bf16.gmra.mrb[44].mxu0 %vm172_vm1, %v17261_v29  ;;  %v15849_v29 = vld [vmem:[%s18211_s1 + $0x380] sm:$0xff]  }
 0x783   : > { %14315 = vmatprep.mubr.msk.bf16.mxu0 %vm172_vm1, %v17263_v20  ;;  %v15850_v20 = vld [vmem:[%s18211_s1 + $0x388] sm:$0xff]   ;;  %14411 = vmatprep.subr.bf16.mxu1 %v15849_v29 }
 0x784   : > { %14412 = vmatpush3.bf16.msra.mxu1 %v15849_v29 }
 0x785   : > { %14413 = vmatprep.subr.bf16.mxu1 %v15850_v20 }
 0x788   : > { %14414 = vmatpush3.bf16.msra.mxu1 %v15850_v20 }
 0x78a   : > { %14316 = vmatmul.mubr.msk.bf16.gmra.mrb[48].mxu0 %vm172_vm1, %v17269_v59  ;;  %v8273_v59 = vld [vmem:[#allocation2 + $0x51] sm:$0xff] }
 0x78b   : > { %14319 = vmatprep.mubr.msk.bf16.mxu0 %vm172_vm1, %v17271_v38  ;;  %v8275_v38 = vld [vmem:[#allocation2 + $0x69] sm:$0xff] }
 0x792   : > { %14320 = vmatmul.mubr.msk.bf16.gmra.mrb[52].mxu0 %vm172_vm1, %v17277_v50  ;;  %v8272_v50 = vld [vmem:[#allocation2 + $0x49] sm:$0xff] }
 0x793   : > { %14323 = vmatprep.mubr.msk.bf16.mxu0 %vm172_vm1, %v17279_v46  ;;  %v8303_v46 = vpack.c.bf16 %v8273_v59, %v8272_v50 }
 0x79a   : > { %14324 = vmatmul.mubr.msk.bf16.gmra.mrb[56].mxu0 %vm172_vm1, %v17285_v5  ;;  %v8274_v5 = vld [vmem:[#allocation2 + $0x61] sm:$0xff] }
 0x79b   : > { %14327 = vmatprep.mubr.msk.bf16.mxu0 %vm172_vm1, %v17404_v22  ;;  %v8304_v57 = vpack.c.bf16 %v8275_v38, %v8274_v5  ;;  %v8284_v22 = vld [vmem:[#allocation2 + $0xd9] sm:$0xff] }
 0x79c   : > { %v8309_v47 = vpack.c.bf16 %v8285_v10, %v8284_v22 }
 0x7a2   : > { %14328 = vmatmul.mubr.msk.bf16.gmra.mrb[60].mxu0 %vm172_vm1, %v7995_v32  ;;  %v8300_v32 = vld [vmem:[#allocation2 + $0x199] sm:$0xff] }
 0x7a3   : > { %14339 = vmatprep.mubr.msk.bf16.mxu0 %vm172_vm1, %v8302_v0  ;;  %v8317_v28 = vpack.c.bf16 %v8301_v14, %v8300_v32 }
 0x7aa   : > { %14340 = vmatmul.mubr.msk.bf16.vlgmr.msra.gmra.mrb[32].mxu0 %vm172_vm1, %v8303_v46 }
 0x7ab   : > { %14372 = vmatpush3.bf16.msra.mxu0 %v15845_v62  ;;  %14343 = vmatprep.mubr.msk.bf16.mxu0 %vm172_vm1, %v8304_v57  ;;  %v8297_v62 = vld [vmem:[#allocation2 + $0x171] sm:$0xff] }
 0x7ac   : > { %14373 = vmatprep.subr.bf16.mxu0 %v15846_v17  ;;  %v8315_v40 = vpack.c.bf16 %v8297_v62, %v8296_v36 }
 0x7af   : > { %14374 = vmatpush3.bf16.msra.mxu0 %v15846_v17 }
 0x7b0   : > { %14375 = vmatprep.subr.bf16.mxu0 %v15847_v24 }
 0x7b2   : > { %14344 = vmatmul.mubr.msk.bf16.gmra.mrb[36].mxu0 %vm172_vm1, %v8305_v63 }
 0x7b3   : > { %14347 = vmatprep.mubr.msk.bf16.mxu0 %vm172_vm1, %v8306_v33  ;;  %14376 = vmatpush3.bf16.msra.mxu0 %v15847_v24 }
 0x7b4   : > { %14377 = vmatprep.subr.bf16.mxu0 %v15848_v44 }
 0x7b7   : > { %14378 = vmatpush3.bf16.msra.mxu0 %v15848_v44 }
 0x7ba   : > { %14348 = vmatmul.mubr.msk.bf16.gmra.mrb[40].mxu0 %vm172_vm1, %v8307_v26 }
 0x7bb   : > { %14351 = vmatprep.mubr.msk.bf16.mxu0 %vm172_vm1, %v8308_v49 }
 0x7c2   : > { %14352 = vmatmul.mubr.msk.bf16.gmra.mrb[44].mxu0 %vm172_vm1, %v8309_v47 }
 0x7c3   : > { %14355 = vmatprep.mubr.msk.bf16.mxu0 %vm172_vm1, %v8310_v37 }
 0x7ca   : > { %14356 = vmatmul.mubr.msk.bf16.gmra.mrb[48].mxu0 %vm172_vm1, %v8311_v13  ;;  %v17649_v13 = vld [vmem:[%s18211_s1 + $0x3a0] sm:$0xff]  }
 0x7cb   : > { %14359 = vmatprep.mubr.msk.bf16.mxu0 %vm172_vm1, %v8312_v56 }
 0x7d2   : > { %14360 = vmatmul.mubr.msk.bf16.gmra.mrb[52].mxu0 %vm172_vm1, %v8313_v18 }
 0x7d3   : > { %14363 = vmatprep.mubr.msk.bf16.mxu0 %vm172_vm1, %v8314_v23 }
 0x7da   : > { %14364 = vmatmul.mubr.msk.bf16.gmra.mrb[56].mxu0 %vm172_vm1, %v8315_v40 }
 0x7db   : > { %14367 = vmatprep.mubr.msk.bf16.mxu0 %vm172_vm1, %v17450_v41 }
 0x7e2   : > { %14368 = vmatmul.mubr.msk.bf16.gmra.mrb[60].mxu0 %vm172_vm1, %v8317_v28 }
 0x7e3   : > { %14379 = vmatprep.mubr.msk.bf16.mxu0 %vm172_vm1, %v17295_v35  ;;  %v8622_v35 = vld [vmem:[#allocation2 + $0x19a] sm:$0xff] }
 0x7ea   : > { %14380 = vmatmul.mubr.msk.bf16.vlgmr.msra.gmra.mrb[32].mxu0 %vm172_vm1, %v17304_v54  ;;  %v8623_v54 = vld [vmem:[#allocation2 + $0x1a2] sm:$0xff] }
 0x7eb   : > { %14383 = vmatprep.mubr.msk.bf16.mxu0 %vm172_vm1, %v17309_v42  ;;  %v8639_v42 = vpack.c.bf16 %v8623_v54, %v8622_v35 }
 0x7f2   : > { %14384 = vmatmul.mubr.msk.bf16.gmra.mrb[36].mxu0 %vm172_vm1, %v17318_v48  ;;  %v9071_v48 = vld [vmem:[#allocation2 + $0x1] sm:$0xff] }
 0x7f3   : > { %14387 = vmatprep.mubr.msk.bf16.mxu0 %vm172_vm1, %v17320_v39  ;;  %v9072_v39 = vld [vmem:[#allocation2 + $0x9] sm:$0xff] }
 0x7fa   : > { %14388 = vmatmul.mubr.msk.bf16.gmra.mrb[40].mxu0 %vm172_vm1, %v17326_v53  ;;  %v9103_v53 = vpack.c.bf16 %v9072_v39, %v9071_v48 }
 0x7fb   : > { %14391 = vmatprep.mubr.msk.bf16.mxu0 %vm172_vm1, %v17328_v58  ;;  %v15851_v58 = vld [vmem:[%s18211_s1 + $0x360] sm:$0xff]  }
 0x7fc   : > { %14415 = vmatprep.mubr.msk.bf16.mxu1 %vm9136_vm5, %v9103_v53  ;;  %14447 = vmatprep.subr.bf16.mxu1 %v15851_v58 }
 0x802   : > { %14392 = vmatmul.mubr.msk.bf16.gmra.mrb[44].mxu0 %vm172_vm1, %v17334_v27  ;;  %v17613_v27 = vld [vmem:[%s18212_s2 + $0x2] ss:$0 sm:$0xff] }
 0x803   : > { %14395 = vmatprep.mubr.msk.bf16.mxu0 %vm172_vm1, %v17336_v19 }
 0x80a   : > { %14396 = vmatmul.mubr.msk.bf16.gmra.mrb[48].mxu0 %vm172_vm1, %v17342_v2 }
 0x80b   : > { %14399 = vmatprep.mubr.msk.bf16.mxu0 %vm172_vm1, %v17344_v34 }
 0x812   : > { %14400 = vmatmul.mubr.msk.bf16.gmra.mrb[52].mxu0 %vm172_vm1, %v17350_v11 }
 0x813   : > { %14403 = vmatprep.mubr.msk.bf16.mxu0 %vm172_vm1, %v17352_v21 }
 0x81a   : > { %14404 = vmatmul.mubr.msk.bf16.gmra.mrb[56].mxu0 %vm172_vm1, %v17358_v60 }
 0x81b   : > { %14407 = vmatprep.mubr.msk.bf16.mxu0 %vm172_vm1, %v17496_v25 }
 0x822   : > { %14408 = vmatmul.mubr.msk.bf16.gmra.mrb[60].mxu0 %vm172_vm1, %v8639_v42 }
 0x8bd   : > { %v14381_v19 = vpop.f32.mrb[32].mxu0 }
 0x8be   : > { %v8924_v2 = vadd.f32 %v14381_v19, %v17613_v27  ;;  %v8755_v34 = vpop.f32.mrb[33].mxu0 }
 0x8bf   : > { %v8922_v11 = vadd.f32 %v17613_v27, %v8755_v34  ;;  %v14382_v21 = vpop.f32.mrb[34].mxu0 }
 0x8c0   : > { %v8956_v60 = vmax.f32 %v8924_v2, 0.0  ;;  %v8925_v41 = vadd.f32 %v14382_v21, %v17613_v27  ;;  %v8758_v25 = vpop.f32.mrb[35].mxu0 }
 0x8c1   : > { %v8954_v0 = vmax.f32 %v8922_v11, 0.0  ;;  %v8923_v29 = vadd.f32 %v17613_v27, %v8758_v25 }
 0x8c2   : > { %8988 = vst.msk [vmem:[#allocation2 + $0x31] sm:$0xff] %vm172_vm1, %v8956_v60  ;;  %v8957_v20 = vmax.f32 %v8925_v41, 0.0 }
 0x8c3   : > { %8986 = vst.msk [vmem:[#allocation2 + $0x19] sm:$0xff] %vm172_vm1, %v8954_v0  ;;  %v8955_v59 = vmax.f32 %v8923_v29, 0.0 }
 0x8c4   : > { %8989 = vst.msk [vmem:[#allocation2 + $0x39] sm:$0xff] %vm172_vm1, %v8957_v20 }
 0x8c5   : > { %8987 = vst.msk [vmem:[#allocation2 + $0x21] sm:$0xff] %vm172_vm1, %v8955_v59  ;;  %v14385_v38 = vpop.f32.mrb[36].mxu0 }
 0x8c6   : > { %v8928_v50 = vadd.f32 %v14385_v38, %v17613_v27  ;;  %v8771_v46 = vpop.f32.mrb[37].mxu0 }
 0x8c7   : > { %v8926_v5 = vadd.f32 %v17613_v27, %v8771_v46  ;;  %v14386_v17 = vpop.f32.mrb[38].mxu0 }
 0x8c8   : > { %v8960_v57 = vmax.f32 %v8928_v50, 0.0  ;;  %v8929_v24 = vadd.f32 %v14386_v17, %v17613_v27  ;;  %v8774_v9 = vpop.f32.mrb[39].mxu0 }
 0x8c9   : > { %v8958_v43 = vmax.f32 %v8926_v5, 0.0  ;;  %v8927_v51 = vadd.f32 %v17613_v27, %v8774_v9  ;;  %v9075_v26 = vld [vmem:[#allocation2 + $0x31] sm:$0xff] }
 0x8ca   : > { %8992 = vst.msk [vmem:[#allocation2 + $0x61] sm:$0xff] %vm172_vm1, %v8960_v57  ;;  %v8961_v63 = vmax.f32 %v8929_v24, 0.0  ;;  %v9073_v33 = vld [vmem:[#allocation2 + $0x19] sm:$0xff] }
 0x8cb   : > { %8990 = vst.msk [vmem:[#allocation2 + $0x49] sm:$0xff] %vm172_vm1, %v8958_v43  ;;  %v8959_v3 = vmax.f32 %v8927_v51, 0.0  ;;  %v9076_v44 = vld [vmem:[#allocation2 + $0x39] sm:$0xff] }
 0x8cc   : > { %8993 = vst.msk [vmem:[#allocation2 + $0x69] sm:$0xff] %vm172_vm1, %v8961_v63  ;;  %v9074_v12 = vld [vmem:[#allocation2 + $0x21] sm:$0xff]  ;;  %v17637_v6 = vpack.c.bf16 %v9076_v44, %v9075_v26 }
 0x8cd   : > { %8991 = vst.msk [vmem:[#allocation2 + $0x51] sm:$0xff] %vm172_vm1, %v8959_v3  ;;  %v14389_v16 = vpop.f32.mrb[40].mxu0  ;;  %v17631_v52 = vpack.c.bf16 %v9074_v12, %v9073_v33 }
 0x8ce   : > { %v8932_v49 = vadd.f32 %v14389_v16, %v17613_v27  ;;  %v8787_v10 = vpop.f32.mrb[41].mxu0 }
 0x8cf   : > { %v8930_v22 = vadd.f32 %v17613_v27, %v8787_v10  ;;  %v14390_v47 = vpop.f32.mrb[42].mxu0  ;;  %14416 = vmatmul.mubr.msk.bf16.vlgmr.msra.gmra.mrb[32].mxu1 %vm9136_vm5, %v17631_v52 }
 0x8d0   : > { %v8964_v55 = vmax.f32 %v8932_v49, 0.0  ;;  %v8933_v37 = vadd.f32 %v14390_v47, %v17613_v27  ;;  %14448 = vmatpush3.bf16.msra.mxu1 %v15851_v58  ;;  %v8790_v4 = vpop.f32.mrb[43].mxu0  ;;  %14419 = vmatprep.mubr.msk.bf16.mxu1 %vm9136_vm5, %v17637_v6 }
 0x8d1   : > { %v8962_v45 = vmax.f32 %v8930_v22, 0.0  ;;  %v8931_v1 = vadd.f32 %v17613_v27, %v8790_v4  ;;  %14449 = vmatprep.subr.bf16.mxu1 %v15852_v30  ;;  %v9079_v23 = vld [vmem:[#allocation2 + $0x61] sm:$0xff] }
 0x8d2   : > { %8996 = vst.msk [vmem:[#allocation2 + $0x91] sm:$0xff] %vm172_vm1, %v8964_v55  ;;  %v8965_v31 = vmax.f32 %v8933_v37, 0.0  ;;  %v9077_v15 = vld [vmem:[#allocation2 + $0x49] sm:$0xff] }
 0x8d3   : > { %8994 = vst.msk [vmem:[#allocation2 + $0x79] sm:$0xff] %vm172_vm1, %v8962_v45  ;;  %v8963_v56 = vmax.f32 %v8931_v1, 0.0  ;;  %v9080_v8 = vld [vmem:[#allocation2 + $0x69] sm:$0xff] }
 0x8d4   : > { %8997 = vst.msk [vmem:[#allocation2 + $0x99] sm:$0xff] %vm172_vm1, %v8965_v31  ;;  %v9078_v7 = vld [vmem:[#allocation2 + $0x51] sm:$0xff]  ;;  %14450 = vmatpush3.bf16.msra.mxu1 %v15852_v30  ;;  %v17659_v40 = vpack.c.bf16 %v9080_v8, %v9079_v23 }
 0x8d5   : > { %8995 = vst.msk [vmem:[#allocation2 + $0x81] sm:$0xff] %vm172_vm1, %v8963_v56  ;;  %v14393_v18 = vpop.f32.mrb[44].mxu0  ;;  %v17655_v61 = vpack.c.bf16 %v9078_v7, %v9077_v15  ;;  %14483 = vmatprep.subr.bf16.mxu1 %v17649_v13 }
 0x8d6   : > { %v8936_v62 = vadd.f32 %v14393_v18, %v17613_v27  ;;  %v8803_v36 = vpop.f32.mrb[45].mxu0 }
 0x8d7   : > { %v8934_v32 = vadd.f32 %v17613_v27, %v8803_v36  ;;  %v14394_v14 = vpop.f32.mrb[46].mxu0  ;;  %14420 = vmatmul.mubr.msk.bf16.gmra.mrb[36].mxu1 %vm9136_vm5, %v17655_v61 }
 0x8d8   : > { %v8968_v28 = vmax.f32 %v8936_v62, 0.0  ;;  %v8937_v35 = vadd.f32 %v14394_v14, %v17613_v27  ;;  %v8806_v54 = vpop.f32.mrb[47].mxu0  ;;  %14423 = vmatprep.mubr.msk.bf16.mxu1 %vm9136_vm5, %v17659_v40 }
 0x8d9   : > { %v8966_v42 = vmax.f32 %v8934_v32, 0.0  ;;  %v8935_v48 = vadd.f32 %v17613_v27, %v8806_v54  ;;  %v9083_v21 = vld [vmem:[#allocation2 + $0x91] sm:$0xff] }
 0x8da   : > { %9000 = vst.msk [vmem:[#allocation2 + $0xc1] sm:$0xff] %vm172_vm1, %v8968_v28  ;;  %v8969_v39 = vmax.f32 %v8937_v35, 0.0  ;;  %v9081_v19 = vld [vmem:[#allocation2 + $0x79] sm:$0xff] }
 0x8db   : > { %8998 = vst.msk [vmem:[#allocation2 + $0xa9] sm:$0xff] %vm172_vm1, %v8966_v42  ;;  %v8967_v53 = vmax.f32 %v8935_v48, 0.0  ;;  %v9084_v58 = vld [vmem:[#allocation2 + $0x99] sm:$0xff] }
 0x8dc   : > { %9001 = vst.msk [vmem:[#allocation2 + $0xc9] sm:$0xff] %vm172_vm1, %v8969_v39  ;;  %v9082_v2 = vld [vmem:[#allocation2 + $0x81] sm:$0xff]  ;;  %v17675_v25 = vpack.c.bf16 %v9084_v58, %v9083_v21 }
 0x8dd   : > { %8999 = vst.msk [vmem:[#allocation2 + $0xb1] sm:$0xff] %vm172_vm1, %v8967_v53  ;;  %v14397_v34 = vpop.f32.mrb[48].mxu0  ;;  %v17672_v11 = vpack.c.bf16 %v9082_v2, %v9081_v19 }
 0x8de   : > { %v8940_v60 = vadd.f32 %v14397_v34, %v17613_v27  ;;  %v8819_v41 = vpop.f32.mrb[49].mxu0 }
 0x8df   : > { %v8938_v0 = vadd.f32 %v17613_v27, %v8819_v41  ;;  %v14398_v29 = vpop.f32.mrb[50].mxu0  ;;  %14424 = vmatmul.mubr.msk.bf16.gmra.mrb[40].mxu1 %vm9136_vm5, %v17672_v11 }
 0x8e0   : > { %v8972_v20 = vmax.f32 %v8940_v60, 0.0  ;;  %v8941_v59 = vadd.f32 %v14398_v29, %v17613_v27  ;;  %v8822_v38 = vpop.f32.mrb[51].mxu0  ;;  %14427 = vmatprep.mubr.msk.bf16.mxu1 %vm9136_vm5, %v17675_v25 }
 0x8e1   : > { %v8970_v50 = vmax.f32 %v8938_v0, 0.0  ;;  %v8939_v46 = vadd.f32 %v17613_v27, %v8822_v38  ;;  %v9087_v63 = vld [vmem:[#allocation2 + $0xc1] sm:$0xff] }
 0x8e2   : > { %9004 = vst.msk [vmem:[#allocation2 + $0xf1] sm:$0xff] %vm172_vm1, %v8972_v20  ;;  %v8973_v5 = vmax.f32 %v8941_v59, 0.0  ;;  %v9085_v24 = vld [vmem:[#allocation2 + $0xa9] sm:$0xff] }
 0x8e3   : > { %9002 = vst.msk [vmem:[#allocation2 + $0xd9] sm:$0xff] %vm172_vm1, %v8970_v50  ;;  %v8971_v17 = vmax.f32 %v8939_v46, 0.0  ;;  %v9088_v57 = vld [vmem:[#allocation2 + $0xc9] sm:$0xff] }
 0x8e4   : > { %9005 = vst.msk [vmem:[#allocation2 + $0xf9] sm:$0xff] %vm172_vm1, %v8973_v5  ;;  %v9086_v9 = vld [vmem:[#allocation2 + $0xb1] sm:$0xff]  ;;  %v17691_v33 = vpack.c.bf16 %v9088_v57, %v9087_v63  ;;  %v9019_v63 = vld [vmem:[#allocation2 + $0x8] sm:$0xff] }
 0x8e5   : > { %9003 = vst.msk [vmem:[#allocation2 + $0xe1] sm:$0xff] %vm172_vm1, %v8971_v17  ;;  %v14401_v43 = vpop.f32.mrb[52].mxu0  ;;  %v17688_v51 = vpack.c.bf16 %v9086_v9, %v9085_v24 }
 0x8e6   : > { %v8944_v3 = vadd.f32 %v14401_v43, %v17613_v27  ;;  %v8835_v44 = vpop.f32.mrb[53].mxu0 }
 0x8e7   : > { %v8942_v12 = vadd.f32 %v17613_v27, %v8835_v44  ;;  %v14402_v16 = vpop.f32.mrb[54].mxu0  ;;  %14428 = vmatmul.mubr.msk.bf16.gmra.mrb[44].mxu1 %vm9136_vm5, %v17688_v51 }
 0x8e8   : > { %v8976_v26 = vmax.f32 %v8944_v3, 0.0  ;;  %v8945_v30 = vadd.f32 %v14402_v16, %v17613_v27  ;;  %v8838_v49 = vpop.f32.mrb[55].mxu0  ;;  %14431 = vmatprep.mubr.msk.bf16.mxu1 %vm9136_vm5, %v17691_v33 }
 0x8e9   : > { %v8974_v10 = vmax.f32 %v8942_v12, 0.0  ;;  %v8943_v22 = vadd.f32 %v17613_v27, %v8838_v49  ;;  %v9091_v56 = vld [vmem:[#allocation2 + $0xf1] sm:$0xff] }
 0x8ea   : > { %9008 = vst.msk [vmem:[#allocation2 + $0x121] sm:$0xff] %vm172_vm1, %v8976_v26  ;;  %v8977_v47 = vmax.f32 %v8945_v30, 0.0  ;;  %v9089_v4 = vld [vmem:[#allocation2 + $0xd9] sm:$0xff] }
 0x8eb   : > { %9006 = vst.msk [vmem:[#allocation2 + $0x109] sm:$0xff] %vm172_vm1, %v8974_v10  ;;  %v8975_v55 = vmax.f32 %v8943_v22, 0.0  ;;  %v9092_v37 = vld [vmem:[#allocation2 + $0xf9] sm:$0xff]  ;;  %v9022_v22 = vld [vmem:[#allocation2 + $0x30] sm:$0xff] }
 0x8ec   : > { %9009 = vst.msk [vmem:[#allocation2 + $0x129] sm:$0xff] %vm172_vm1, %v8977_v47  ;;  %v9090_v45 = vld [vmem:[#allocation2 + $0xe1] sm:$0xff]  ;;  %v17707_v7 = vpack.c.bf16 %v9092_v37, %v9091_v56  ;;  %v9023_v30 = vld [vmem:[#allocation2 + $0x38] sm:$0xff] }
 0x8ed   : > { %9007 = vst.msk [vmem:[#allocation2 + $0x111] sm:$0xff] %vm172_vm1, %v8975_v55  ;;  %v14405_v1 = vpop.f32.mrb[56].mxu0  ;;  %v17704_v31 = vpack.c.bf16 %v9090_v45, %v9089_v4  ;;  %v9021_v26 = vld [vmem:[#allocation2 + $0x20] sm:$0xff]  ;;  %v9020_v49 = vld [vmem:[#allocation2 + $0x18] sm:$0xff]  ;;  %v15854_v47 = vld [vmem:[%s18211_s1 + $0x3a8] sm:$0xff]   ;;  %v17754_v55 = vpack.c.bf16 %v9023_v30, %v9022_v22 }
 0x8ee   : > { %v8948_v8 = vadd.f32 %v14405_v1, %v17613_v27  ;;  %v8851_v15 = vpop.f32.mrb[57].mxu0  ;;  %v17749_v10 = vpack.c.bf16 %v9021_v26, %v9020_v49  ;;  %v17764_v37 = vld [vmem:[%s18211_s1 + $0x3c0] sm:$0xff]   ;;  %v9025_v4 = vld [vmem:[#allocation2 + $0x50] sm:$0xff]  ;;  %v9027_v45 = vld [vmem:[#allocation2 + $0x68] sm:$0xff] }
 0x8ef   : > { %v8946_v18 = vadd.f32 %v17613_v27, %v8851_v15  ;;  %v14406_v23 = vpop.f32.mrb[58].mxu0  ;;  %14432 = vmatmul.mubr.msk.bf16.gmra.mrb[48].mxu1 %vm9136_vm5, %v17704_v31  ;;  %v9024_v1 = vld [vmem:[#allocation2 + $0x48] sm:$0xff]  ;;  %v9569_v30 = vld [vmem:[#allocation2 + $0x1a] sm:$0xff]  ;;  %v9571_v22 = vld [vmem:[#allocation2 + $0x32] sm:$0xff] }
 0x8f0   : > { %v8980_v62 = vmax.f32 %v8948_v8, 0.0  ;;  %v8949_v36 = vadd.f32 %v14406_v23, %v17613_v27  ;;  %v8854_v32 = vpop.f32.mrb[59].mxu0  ;;  %14435 = vmatprep.mubr.msk.bf16.mxu1 %vm9136_vm5, %v17707_v7  ;;  %v17766_v56 = vpack.c.bf16 %v9025_v4, %v9024_v1  ;;  %v9026_v8 = vld [vmem:[#allocation2 + $0x60] sm:$0xff]  ;;  %v9028_v23 = vld [vmem:[#allocation2 + $0x78] sm:$0xff] }
 0x8f1   : > { %v8978_v14 = vmax.f32 %v8946_v18, 0.0  ;;  %v8947_v28 = vadd.f32 %v17613_v27, %v8854_v32  ;;  %v9095_v19 = vld [vmem:[#allocation2 + $0x121] sm:$0xff]  ;;  %v17769_v15 = vpack.c.bf16 %v9027_v45, %v9026_v8  ;;  %v9031_v18 = vld [vmem:[#allocation2 + $0x98] sm:$0xff] }
 0x8f2   : > { %9012 = vst.msk [vmem:[#allocation2 + $0x151] sm:$0xff] %vm172_vm1, %v8980_v62  ;;  %v8981_v35 = vmax.f32 %v8949_v36, 0.0  ;;  %v9093_v48 = vld [vmem:[#allocation2 + $0x109] sm:$0xff]  ;;  %v15857_v8 = vld [vmem:[%s18211_s1 + $0x3e0] sm:$0xff]  }
 0x8f3   : > { %9010 = vst.msk [vmem:[#allocation2 + $0x139] sm:$0xff] %vm172_vm1, %v8978_v14  ;;  %v8979_v54 = vmax.f32 %v8947_v28, 0.0  ;;  %v9096_v42 = vld [vmem:[#allocation2 + $0x129] sm:$0xff] }
 0x8f4   : > { %9013 = vst.msk [vmem:[#allocation2 + $0x159] sm:$0xff] %vm172_vm1, %v8981_v35  ;;  %v9094_v39 = vld [vmem:[#allocation2 + $0x111] sm:$0xff]  ;;  %v17723_v21 = vpack.c.bf16 %v9096_v42, %v9095_v19  ;;  %v9035_v28 = vld [vmem:[#allocation2 + $0xc8] sm:$0xff]  ;;  %v9034_v42 = vld [vmem:[#allocation2 + $0xc0] sm:$0xff] }
 0x8f5   : > { %9011 = vst.msk [vmem:[#allocation2 + $0x141] sm:$0xff] %vm172_vm1, %v8979_v54  ;;  %v14409_v53 = vpop.f32.mrb[60].mxu0  ;;  %v17720_v58 = vpack.c.bf16 %v9094_v39, %v9093_v48  ;;  %v9030_v36 = vld [vmem:[#allocation2 + $0x90] sm:$0xff]  ;;  %v9032_v35 = vld [vmem:[#allocation2 + $0xa8] sm:$0xff]  ;;  %v17785_v48 = vpack.c.bf16 %v9035_v28, %v9034_v42  ;;  %v9037_v39 = vld [vmem:[#allocation2 + $0xe0] sm:$0xff] }
 0x8f6   : > { %v8952_v2 = vadd.f32 %v14409_v53, %v17613_v27  ;;  %v8867_v34 = vpop.f32.mrb[61].mxu0  ;;  %v17777_v32 = vpack.c.bf16 %v9031_v18, %v9030_v36  ;;  %v9033_v14 = vld [vmem:[#allocation2 + $0xb0] sm:$0xff]  ;;  %v9039_v53 = vld [vmem:[#allocation2 + $0xf8] sm:$0xff]  ;;  %v9570_v49 = vld [vmem:[#allocation2 + $0x22] sm:$0xff] }
 0x8f7   : > { %v8950_v60 = vadd.f32 %v17613_v27, %v8867_v34  ;;  %v14410_v41 = vpop.f32.mrb[62].mxu0  ;;  %14436 = vmatmul.mubr.msk.bf16.gmra.mrb[52].mxu1 %vm9136_vm5, %v17720_v58  ;;  %v17783_v54 = vpack.c.bf16 %v9033_v14, %v9032_v35  ;;  %v9036_v19 = vld [vmem:[#allocation2 + $0xd8] sm:$0xff]  ;;  %v9038_v34 = vld [vmem:[#allocation2 + $0xf0] sm:$0xff]  ;;  %v17820_v4 = vpack.c.bf16 %v9570_v49, %v9569_v30  ;;  %v15856_v45 = vld [vmem:[%s18211_s1 + $0x3c8] sm:$0xff]  }
 0x8f8   : > { %v8984_v0 = vmax.f32 %v8952_v2, 0.0  ;;  %v8953_v29 = vadd.f32 %v14410_v41, %v17613_v27  ;;  %v8870_v20 = vpop.f32.mrb[63].mxu0  ;;  %14439 = vmatprep.mubr.msk.bf16.mxu1 %vm9136_vm5, %v17723_v21  ;;  %v17791_v2 = vpack.c.bf16 %v9037_v39, %v9036_v19  ;;  %v9041_v41 = vld [vmem:[#allocation2 + $0x110] sm:$0xff]  ;;  %v9578_v35 = vld [vmem:[#allocation2 + $0x82] sm:$0xff]  ;;  %v9580_v39 = vld [vmem:[#allocation2 + $0x9a] sm:$0xff] }
 0x8f9   : > { %v8982_v59 = vmax.f32 %v8950_v60, 0.0  ;;  %v8951_v38 = vadd.f32 %v17613_v27, %v8870_v20  ;;  %v9099_v9 = vld [vmem:[#allocation2 + $0x151] sm:$0xff]  ;;  %v9018_v27 = vld [vmem:[#allocation2] sm:$0xff]  ;;  %v17793_v60 = vpack.c.bf16 %v9039_v53, %v9038_v34 }
 0x8fa   : > { %9016 = vst.msk [vmem:[#allocation2 + $0x181] sm:$0xff] %vm172_vm1, %v8984_v0  ;;  %v8985_v50 = vmax.f32 %v8953_v29, 0.0  ;;  %v9097_v17 = vld [vmem:[#allocation2 + $0x139] sm:$0xff]  ;;  %v9050_v12 = vpack.c.bf16 %v9019_v63, %v9018_v27  ;;  %v9043_v0 = vld [vmem:[#allocation2 + $0x128] sm:$0xff] }
 0x8fb   : > { %9014 = vst.msk [vmem:[#allocation2 + $0x169] sm:$0xff] %vm172_vm1, %v8982_v59  ;;  %v8983_v46 = vmax.f32 %v8951_v38, 0.0  ;;  %v9100_v5 = vld [vmem:[#allocation2 + $0x159] sm:$0xff]  ;;  %v9040_v29 = vld [vmem:[#allocation2 + $0x108] sm:$0xff] }
 0x8fc   : > { %9017 = vst.msk [vmem:[#allocation2 + $0x189] sm:$0xff] %vm172_vm1, %v8985_v50  ;;  %v9098_v57 = vld [vmem:[#allocation2 + $0x141] sm:$0xff]  ;;  %v17738_v43 = vpack.c.bf16 %v9100_v5, %v9099_v9  ;;  %v17799_v20 = vpack.c.bf16 %v9041_v41, %v9040_v29  ;;  %v9044_v5 = vld [vmem:[#allocation2 + $0x138] sm:$0xff]  ;;  %v9568_v63 = vld [vmem:[#allocation2 + $0xa] sm:$0xff] }
 0x8fd   : > { %9015 = vst.msk [vmem:[#allocation2 + $0x171] sm:$0xff] %vm172_vm1, %v8983_v46  ;;  %v17736_v24 = vpack.c.bf16 %v9098_v57, %v9097_v17  ;;  %v9042_v59 = vld [vmem:[#allocation2 + $0x120] sm:$0xff]  ;;  %v9047_v46 = vld [vmem:[#allocation2 + $0x158] sm:$0xff]  ;;  %v9046_v57 = vld [vmem:[#allocation2 + $0x150] sm:$0xff] }
 0x8fe   : > { %v17801_v38 = vpack.c.bf16 %v9043_v0, %v9042_v59  ;;  %v9045_v50 = vld [vmem:[#allocation2 + $0x140] sm:$0xff]  ;;  %v17809_v9 = vpack.c.bf16 %v9047_v46, %v9046_v57  ;;  %v9574_v18 = vld [vmem:[#allocation2 + $0x52] sm:$0xff]  ;;  %v9576_v36 = vld [vmem:[#allocation2 + $0x6a] sm:$0xff] }
 0x8ff   : > { %14440 = vmatmul.mubr.msk.bf16.gmra.mrb[56].mxu1 %vm9136_vm5, %v17736_v24  ;;  %v17807_v17 = vpack.c.bf16 %v9045_v50, %v9044_v5  ;;  %v9567_v27 = vld [vmem:[#allocation2 + $0x2] sm:$0xff]  ;;  %v9579_v42 = vld [vmem:[#allocation2 + $0x92] sm:$0xff]  ;;  %v9581_v34 = vld [vmem:[#allocation2 + $0xaa] sm:$0xff] }
 0x900   : > { %14443 = vmatprep.mubr.msk.bf16.mxu1 %vm9136_vm5, %v17738_v43  ;;  %v17845_v19 = vpack.c.bf16 %v9580_v39, %v9579_v42  ;;  %v9582_v41 = vld [vmem:[#allocation2 + $0xb2] sm:$0xff]  ;;  %v9583_v0 = vld [vmem:[#allocation2 + $0xc2] sm:$0xff]  ;;  %v9584_v29 = vld [vmem:[#allocation2 + $0xca] sm:$0xff] }
 0x901   : > { %v17851_v59 = vpack.c.bf16 %v9582_v41, %v9581_v34  ;;  %v17853_v50 = vpack.c.bf16 %v9584_v29, %v9583_v0  ;;  %v9585_v46 = vld [vmem:[#allocation2 + $0xda] sm:$0xff]  ;;  %v9586_v5 = vld [vmem:[#allocation2 + $0xe2] sm:$0xff]  ;;  %v9587_v57 = vld [vmem:[#allocation2 + $0xf2] sm:$0xff] }
 0x902   : > { %v9101_v3 = vld [vmem:[#allocation2 + $0x169] sm:$0xff]  ;;  %v15859_v41 = vld [vmem:[%s18211_s1 + $0x400] sm:$0xff]  }
 0x903   : > { %v9591_v30 = vld [vmem:[#allocation2 + $0x122] sm:$0xff]  ;;  %v9592_v49 = vld [vmem:[#allocation2 + $0x12a] sm:$0xff] }
 0x904   : > { %v9102_v44 = vld [vmem:[#allocation2 + $0x171] sm:$0xff]  ;;  %v15858_v34 = vld [vmem:[%s18211_s1 + $0x3e8] sm:$0xff]  }
 0x905   : > { %v17744_v16 = vpack.c.bf16 %v9102_v44, %v9101_v3  ;;  %v9049_v3 = vld [vmem:[#allocation2 + $0x170] sm:$0xff]  ;;  %v9048_v44 = vld [vmem:[#allocation2 + $0x168] sm:$0xff] }
 0x906   : > { %v17815_v26 = vpack.c.bf16 %v9049_v3, %v9048_v44  ;;  %v9589_v44 = vld [vmem:[#allocation2 + $0x10a] sm:$0xff]  ;;  %v9598_v42 = vld [vmem:[#allocation2 + $0x172] sm:$0xff] }
 0x907   : > { %14444 = vmatmul.mubr.msk.bf16.gmra.mrb[60].mxu1 %vm9136_vm5, %v17744_v16  ;;  %v15860_v29 = vld [vmem:[%s18211_s1 + $0x408] sm:$0xff]  }
 0x908   : > { %14451 = vmatprep.mubr.msk.bf16.mxu1 %vm9136_vm5, %v9050_v12  ;;  %v9599_v12 = vpack.c.bf16 %v9568_v63, %v9567_v27  ;;  %v9588_v27 = vld [vmem:[#allocation2 + $0xfa] sm:$0xff]  ;;  %v17859_v63 = vpack.c.bf16 %v9586_v5, %v9585_v46 }
 0x909   : > { %v17861_v3 = vpack.c.bf16 %v9588_v27, %v9587_v57  ;;  %v15861_v46 = vld [vmem:[%s18211_s1 + $0x420] sm:$0xff]   ;;  %v11105_v57 = vld [vmem:[#allocation2 + $0x91] sm:$0xff] }
 0x90f   : > { %14452 = vmatmul.mubr.msk.bf16.vlgmr.msra.gmra.mrb[32].mxu1 %vm9136_vm5, %v17749_v10 }
 0x910   : > { %14484 = vmatpush3.bf16.msra.mxu1 %v17649_v13  ;;  %14455 = vmatprep.mubr.msk.bf16.mxu1 %vm9136_vm5, %v17754_v55  ;;  %v9029_v13 = vld [vmem:[#allocation2 + $0x80] sm:$0xff] }
 0x911   : > { %14485 = vmatprep.subr.bf16.mxu1 %v15854_v47  ;;  %v17775_v62 = vpack.c.bf16 %v9029_v13, %v9028_v23  ;;  %v9573_v13 = vld [vmem:[#allocation2 + $0x4a] sm:$0xff]  ;;  %v9575_v23 = vld [vmem:[#allocation2 + $0x62] sm:$0xff] }
 0x912   : > { %v17835_v14 = vpack.c.bf16 %v9574_v18, %v9573_v13  ;;  %v17837_v28 = vpack.c.bf16 %v9576_v36, %v9575_v23  ;;  %v9594_v13 = vld [vmem:[#allocation2 + $0x142] sm:$0xff]  ;;  %v9595_v18 = vld [vmem:[#allocation2 + $0x152] sm:$0xff]  ;;  %v9596_v23 = vld [vmem:[#allocation2 + $0x15a] sm:$0xff] }
 0x914   : > { %14486 = vmatpush3.bf16.msra.mxu1 %v15854_v47  ;;  %v9572_v47 = vld [vmem:[#allocation2 + $0x3a] sm:$0xff] }
 0x915   : > { %14519 = vmatprep.subr.bf16.mxu1 %v17764_v37  ;;  %v17825_v1 = vpack.c.bf16 %v9572_v47, %v9571_v22  ;;  %v17869_v47 = vpack.c.bf16 %v9592_v49, %v9591_v30  ;;  %v11107_v30 = vld [vmem:[#allocation2 + $0xa9] sm:$0xff] }
 0x917   : > { %14456 = vmatmul.mubr.msk.bf16.gmra.mrb[36].mxu1 %vm9136_vm5, %v17766_v56 }
 0x918   : > { %14459 = vmatprep.mubr.msk.bf16.mxu1 %vm9136_vm5, %v17769_v15 }
 0x91f   : > { %14460 = vmatmul.mubr.msk.bf16.gmra.mrb[40].mxu1 %vm9136_vm5, %v17775_v62 }
 0x920   : > { %14463 = vmatprep.mubr.msk.bf16.mxu1 %vm9136_vm5, %v17777_v32 }
 0x927   : > { %14464 = vmatmul.mubr.msk.bf16.gmra.mrb[44].mxu1 %vm9136_vm5, %v17783_v54 }
 0x928   : > { %14467 = vmatprep.mubr.msk.bf16.mxu1 %vm9136_vm5, %v17785_v48 }
 0x92f   : > { %14468 = vmatmul.mubr.msk.bf16.gmra.mrb[48].mxu1 %vm9136_vm5, %v17791_v2 }
 0x930   : > { %14471 = vmatprep.mubr.msk.bf16.mxu1 %vm9136_vm5, %v17793_v60 }
 0x937   : > { %14472 = vmatmul.mubr.msk.bf16.gmra.mrb[52].mxu1 %vm9136_vm5, %v17799_v20 }
 0x938   : > { %14475 = vmatprep.mubr.msk.bf16.mxu1 %vm9136_vm5, %v17801_v38 }
 0x93f   : > { %14476 = vmatmul.mubr.msk.bf16.gmra.mrb[56].mxu1 %vm9136_vm5, %v17807_v17 }
 0x940   : > { %14479 = vmatprep.mubr.msk.bf16.mxu1 %vm9136_vm5, %v17809_v9 }
 0x947   : > { %14480 = vmatmul.mubr.msk.bf16.gmra.mrb[60].mxu1 %vm9136_vm5, %v17815_v26 }
 0x948   : > { %14487 = vmatprep.mubr.msk.bf16.mxu1 %vm9136_vm5, %v9599_v12  ;;  %v9590_v12 = vld [vmem:[#allocation2 + $0x112] sm:$0xff] }
 0x949   : > { %v17867_v22 = vpack.c.bf16 %v9590_v12, %v9589_v44  ;;  %v11108_v44 = vld [vmem:[#allocation2 + $0xb1] sm:$0xff]  ;;  %v11110_v12 = vld [vmem:[#allocation2 + $0xc9] sm:$0xff] }
 0x94a   : > { %v11134_v49 = vpack.c.bf16 %v11108_v44, %v11107_v30 }
 0x94f   : > { %14488 = vmatmul.mubr.msk.bf16.vlgmr.msra.gmra.mrb[32].mxu1 %vm9136_vm5, %v17820_v4 }
 0x950   : > { %14520 = vmatpush3.bf16.msra.mxu1 %v17764_v37  ;;  %14491 = vmatprep.mubr.msk.bf16.mxu1 %vm9136_vm5, %v17825_v1  ;;  %v9577_v37 = vld [vmem:[#allocation2 + $0x7a] sm:$0xff] }
 0x951   : > { %14521 = vmatprep.subr.bf16.mxu1 %v15856_v45  ;;  %v17843_v53 = vpack.c.bf16 %v9578_v35, %v9577_v37  ;;  %v17877_v37 = vpack.c.bf16 %v9596_v23, %v9595_v18  ;;  %v9597_v35 = vld [vmem:[#allocation2 + $0x16a] sm:$0xff]  ;;  %v11112_v18 = vld [vmem:[#allocation2 + $0xe1] sm:$0xff]  ;;  %v11114_v23 = vld [vmem:[#allocation2 + $0xf9] sm:$0xff] }
 0x952   : > { %v17883_v39 = vpack.c.bf16 %v9598_v42, %v9597_v35  ;;  %v11111_v35 = vld [vmem:[#allocation2 + $0xd9] sm:$0xff] }
 0x953   : > { %v11136_v42 = vpack.c.bf16 %v11112_v18, %v11111_v35 }
 0x954   : > { %14522 = vmatpush3.bf16.msra.mxu1 %v15856_v45  ;;  %v9593_v45 = vld [vmem:[#allocation2 + $0x13a] sm:$0xff] }
 0x955   : > { %14555 = vmatprep.subr.bf16.mxu1 %v15857_v8  ;;  %v17875_v36 = vpack.c.bf16 %v9594_v13, %v9593_v45  ;;  %v11109_v45 = vld [vmem:[#allocation2 + $0xc1] sm:$0xff] }
 0x956   : > { %v11135_v13 = vpack.c.bf16 %v11110_v12, %v11109_v45 }
 0x957   : > { %14492 = vmatmul.mubr.msk.bf16.gmra.mrb[36].mxu1 %vm9136_vm5, %v17835_v14 }
 0x958   : > { %14495 = vmatprep.mubr.msk.bf16.mxu1 %vm9136_vm5, %v17837_v28 }
 0x95f   : > { %14496 = vmatmul.mubr.msk.bf16.gmra.mrb[40].mxu1 %vm9136_vm5, %v17843_v53 }
 0x960   : > { %14499 = vmatprep.mubr.msk.bf16.mxu1 %vm9136_vm5, %v17845_v19 }
 0x967   : > { %14500 = vmatmul.mubr.msk.bf16.gmra.mrb[44].mxu1 %vm9136_vm5, %v17851_v59 }
 0x968   : > { %14503 = vmatprep.mubr.msk.bf16.mxu1 %vm9136_vm5, %v17853_v50 }
 0x96f   : > { %14504 = vmatmul.mubr.msk.bf16.gmra.mrb[48].mxu1 %vm9136_vm5, %v17859_v63 }
 0x970   : > { %14507 = vmatprep.mubr.msk.bf16.mxu1 %vm9136_vm5, %v17861_v3 }
 0x977   : > { %14508 = vmatmul.mubr.msk.bf16.gmra.mrb[52].mxu1 %vm9136_vm5, %v17867_v22 }
 0x978   : > { %14511 = vmatprep.mubr.msk.bf16.mxu1 %vm9136_vm5, %v17869_v47 }
 0x97f   : > { %14512 = vmatmul.mubr.msk.bf16.gmra.mrb[56].mxu1 %vm9136_vm5, %v17875_v36 }
 0x980   : > { %14515 = vmatprep.mubr.msk.bf16.mxu1 %vm9136_vm5, %v17877_v37 }
 0x987   : > { %14516 = vmatmul.mubr.msk.bf16.gmra.mrb[60].mxu1 %vm9136_vm5, %v17883_v39 }
 0x988   : > { %14523 = vmatprep.mubr.msk.bf16.mxu1 %vm9136_vm5, %v17749_v10  ;;  %v9904_v10 = vld [vmem:[#allocation2 + $0x188] sm:$0xff] }
 0x98f   : > { %14524 = vmatmul.mubr.msk.bf16.vlgmr.msra.gmra.mrb[32].mxu1 %vm9136_vm5, %v17754_v55 }
 0x990   : > { %14556 = vmatpush3.bf16.msra.mxu1 %v15857_v8  ;;  %14527 = vmatprep.mubr.msk.bf16.mxu1 %vm9136_vm5, %v17766_v56  ;;  %v9903_v8 = vld [vmem:[#allocation2 + $0x180] sm:$0xff] }
 0x991   : > { %14557 = vmatprep.subr.bf16.mxu1 %v15858_v34  ;;  %v17923_v0 = vpack.c.bf16 %v9904_v10, %v9903_v8  ;;  %v11116_v10 = vld [vmem:[#allocation2 + $0x111] sm:$0xff]  ;;  %v11115_v8 = vld [vmem:[#allocation2 + $0x109] sm:$0xff] }
 0x994   : > { %14558 = vmatpush3.bf16.msra.mxu1 %v15858_v34  ;;  %v11113_v34 = vld [vmem:[#allocation2 + $0xf1] sm:$0xff] }
 0x995   : > { %14591 = vmatprep.subr.bf16.mxu1 %v15859_v41 }
 0x997   : > { %14528 = vmatmul.mubr.msk.bf16.gmra.mrb[36].mxu1 %vm9136_vm5, %v17769_v15 }
 0x998   : > { %14531 = vmatprep.mubr.msk.bf16.mxu1 %vm9136_vm5, %v17775_v62 }
 0x99f   : > { %14532 = vmatmul.mubr.msk.bf16.gmra.mrb[40].mxu1 %vm9136_vm5, %v17777_v32 }
 0x9a0   : > { %14535 = vmatprep.mubr.msk.bf16.mxu1 %vm9136_vm5, %v17783_v54 }
 0x9a7   : > { %14536 = vmatmul.mubr.msk.bf16.gmra.mrb[44].mxu1 %vm9136_vm5, %v17785_v48 }
 0x9a8   : > { %14539 = vmatprep.mubr.msk.bf16.mxu1 %vm9136_vm5, %v17791_v2 }
 0x9af   : > { %14540 = vmatmul.mubr.msk.bf16.gmra.mrb[48].mxu1 %vm9136_vm5, %v17793_v60 }
 0x9b0   : > { %14543 = vmatprep.mubr.msk.bf16.mxu1 %vm9136_vm5, %v17799_v20 }
 0x9b7   : > { %14544 = vmatmul.mubr.msk.bf16.gmra.mrb[52].mxu1 %vm9136_vm5, %v17801_v38 }
 0x9b8   : > { %14547 = vmatprep.mubr.msk.bf16.mxu1 %vm9136_vm5, %v17807_v17 }
 0x9bf   : > { %14548 = vmatmul.mubr.msk.bf16.gmra.mrb[56].mxu1 %vm9136_vm5, %v17809_v9 }
 0x9c0   : > { %14551 = vmatprep.mubr.msk.bf16.mxu1 %vm9136_vm5, %v17815_v26 }
 0x9c7   : > { %14552 = vmatmul.mubr.msk.bf16.gmra.mrb[60].mxu1 %vm9136_vm5, %v17923_v0 }
 0x9c8   : > { %14559 = vmatprep.mubr.msk.bf16.mxu1 %vm9136_vm5, %v17631_v52  ;;  %v10210_v52 = vld [vmem:[#allocation2 + $0x189] sm:$0xff] }
 0x9cf   : > { %14560 = vmatmul.mubr.msk.bf16.vlgmr.msra.gmra.mrb[32].mxu1 %vm9136_vm5, %v17637_v6  ;;  %v10209_v6 = vld [vmem:[#allocation2 + $0x181] sm:$0xff] }
 0x9d0   : > { %14592 = vmatpush3.bf16.msra.mxu1 %v15859_v41  ;;  %14563 = vmatprep.mubr.msk.bf16.mxu1 %vm9136_vm5, %v17655_v61  ;;  %v17963_v61 = vpack.c.bf16 %v10210_v52, %v10209_v6  ;;  %v11137_v41 = vpack.c.bf16 %v11114_v23, %v11113_v34 }
 0x9d1   : > { %14593 = vmatprep.subr.bf16.mxu1 %v15860_v29 }
 0x9d4   : > { %14594 = vmatpush3.bf16.msra.mxu1 %v15860_v29  ;;  %v11127_v29 = vld [vmem:[#allocation2 + $0x199] sm:$0xff] }
 0x9d5   : > { %14627 = vmatprep.subr.bf16.mxu1 %v15861_v46 }
 0x9d7   : > { %14564 = vmatmul.mubr.msk.bf16.gmra.mrb[36].mxu1 %vm9136_vm5, %v17659_v40  ;;  %v15862_v40 = vld [vmem:[%s18211_s1 + $0x428] sm:$0xff]  }
 0x9d8   : > { %14567 = vmatprep.mubr.msk.bf16.mxu1 %vm9136_vm5, %v17672_v11  ;;  %v15863_v11 = vld [vmem:[%s18211_s1 + $0x440] sm:$0xff]  }
 0x9df   : > { %14568 = vmatmul.mubr.msk.bf16.gmra.mrb[40].mxu1 %vm9136_vm5, %v17675_v25  ;;  %v10515_v25 = vld [vmem:[#allocation2 + $0x182] sm:$0xff] }
 0x9e0   : > { %14571 = vmatprep.mubr.msk.bf16.mxu1 %vm9136_vm5, %v17688_v51  ;;  %v10516_v51 = vld [vmem:[#allocation2 + $0x18a] sm:$0xff] }
 0x9e7   : > { %14572 = vmatmul.mubr.msk.bf16.gmra.mrb[44].mxu1 %vm9136_vm5, %v17691_v33  ;;  %v18003_v33 = vpack.c.bf16 %v10516_v51, %v10515_v25 }
 0x9e8   : > { %14575 = vmatprep.mubr.msk.bf16.mxu1 %vm9136_vm5, %v17704_v31  ;;  %v15864_v31 = vld [vmem:[%s18211_s1 + $0x448] sm:$0xff]  }
 0x9ef   : > { %14576 = vmatmul.mubr.msk.bf16.gmra.mrb[48].mxu1 %vm9136_vm5, %v17707_v7  ;;  %v15865_v7 = vld [vmem:[%s18211_s1 + $0x460] sm:$0xff]  }
 0x9f0   : > { %14579 = vmatprep.mubr.msk.bf16.mxu1 %vm9136_vm5, %v17720_v58  ;;  %v10821_v58 = vld [vmem:[#allocation2 + $0x198] sm:$0xff] }
 0x9f7   : > { %14580 = vmatmul.mubr.msk.bf16.gmra.mrb[52].mxu1 %vm9136_vm5, %v17723_v21 }
 0x9f8   : > { %14583 = vmatprep.mubr.msk.bf16.mxu1 %vm9136_vm5, %v17736_v24 }
 0x9ff   : > { %14584 = vmatmul.mubr.msk.bf16.gmra.mrb[56].mxu1 %vm9136_vm5, %v17738_v43 }
 0xa00   : > { %14587 = vmatprep.mubr.msk.bf16.mxu1 %vm9136_vm5, %v17744_v16 }
 0xa07   : > { %14588 = vmatmul.mubr.msk.bf16.gmra.mrb[60].mxu1 %vm9136_vm5, %v17963_v61 }
 0xa08   : > { %14595 = vmatprep.mubr.msk.bf16.mxu1 %vm9136_vm5, %v17820_v4  ;;  %v11103_v4 = vld [vmem:[#allocation2 + $0x79] sm:$0xff] }
 0xa0f   : > { %14596 = vmatmul.mubr.msk.bf16.vlgmr.msra.gmra.mrb[32].mxu1 %vm9136_vm5, %v17825_v1 }
 0xa10   : > { %14628 = vmatpush3.bf16.msra.mxu1 %v15861_v46  ;;  %14599 = vmatprep.mubr.msk.bf16.mxu1 %vm9136_vm5, %v17835_v14  ;;  %v11128_v46 = vld [vmem:[#allocation2 + $0x1a1] sm:$0xff] }
 0xa11   : > { %14629 = vmatprep.subr.bf16.mxu1 %v15862_v40  ;;  %v11144_v52 = vpack.c.bf16 %v11128_v46, %v11127_v29 }
 0xa14   : > { %14630 = vmatpush3.bf16.msra.mxu1 %v15862_v40 }
 0xa15   : > { %14663 = vmatprep.subr.bf16.mxu1 %v15863_v11 }
 0xa17   : > { %14600 = vmatmul.mubr.msk.bf16.gmra.mrb[36].mxu1 %vm9136_vm5, %v17837_v28 }
 0xa18   : > { %14603 = vmatprep.mubr.msk.bf16.mxu1 %vm9136_vm5, %v17843_v53 }
 0xa1f   : > { %14604 = vmatmul.mubr.msk.bf16.gmra.mrb[40].mxu1 %vm9136_vm5, %v17845_v19 }
 0xa20   : > { %14607 = vmatprep.mubr.msk.bf16.mxu1 %vm9136_vm5, %v17851_v59 }
 0xa27   : > { %14608 = vmatmul.mubr.msk.bf16.gmra.mrb[44].mxu1 %vm9136_vm5, %v17853_v50 }
 0xa28   : > { %14611 = vmatprep.mubr.msk.bf16.mxu1 %vm9136_vm5, %v17859_v63 }
 0xa2f   : > { %14612 = vmatmul.mubr.msk.bf16.gmra.mrb[48].mxu1 %vm9136_vm5, %v17861_v3 }
 0xa30   : > { %14615 = vmatprep.mubr.msk.bf16.mxu1 %vm9136_vm5, %v17867_v22 }
 0xa37   : > { %14616 = vmatmul.mubr.msk.bf16.gmra.mrb[52].mxu1 %vm9136_vm5, %v17869_v47 }
 0xa38   : > { %14619 = vmatprep.mubr.msk.bf16.mxu1 %vm9136_vm5, %v17875_v36 }
 0xa3f   : > { %14620 = vmatmul.mubr.msk.bf16.gmra.mrb[56].mxu1 %vm9136_vm5, %v17877_v37 }
 0xa40   : > { %14623 = vmatprep.mubr.msk.bf16.mxu1 %vm9136_vm5, %v17883_v39 }
 0xa47   : > { %14624 = vmatmul.mubr.msk.bf16.gmra.mrb[60].mxu1 %vm9136_vm5, %v18003_v33 }
 0xa48   : > { %14631 = vmatprep.mubr.msk.bf16.mxu1 %vm9136_vm5, %v17754_v55  ;;  %v10822_v55 = vld [vmem:[#allocation2 + $0x1a0] sm:$0xff] }
 0xa4f   : > { %14632 = vmatmul.mubr.msk.bf16.vlgmr.msra.gmra.mrb[32].mxu1 %vm9136_vm5, %v17766_v56  ;;  %v10838_v56 = vpack.c.bf16 %v10822_v55, %v10821_v58 }
 0xa50   : > { %14664 = vmatpush3.bf16.msra.mxu1 %v15863_v11  ;;  %14635 = vmatprep.mubr.msk.bf16.mxu1 %vm9136_vm5, %v17769_v15  ;;  %v11098_v15 = vld [vmem:[#allocation2 + $0x39] sm:$0xff] }
 0xa51   : > { %14665 = vmatprep.subr.bf16.mxu1 %v15864_v31 }
 0xa54   : > { %14666 = vmatpush3.bf16.msra.mxu1 %v15864_v31 }
 0xa55   : > { %14699 = vmatprep.subr.bf16.mxu1 %v15865_v7 }
 0xa57   : > { %14636 = vmatmul.mubr.msk.bf16.gmra.mrb[36].mxu1 %vm9136_vm5, %v17775_v62  ;;  %v11097_v62 = vld [vmem:[#allocation2 + $0x31] sm:$0xff] }
 0xa58   : > { %14639 = vmatprep.mubr.msk.bf16.mxu1 %vm9136_vm5, %v17777_v32  ;;  %v11129_v32 = vpack.c.bf16 %v11098_v15, %v11097_v62 }
 0xa5f   : > { %14640 = vmatmul.mubr.msk.bf16.gmra.mrb[40].mxu1 %vm9136_vm5, %v17783_v54  ;;  %v11100_v54 = vld [vmem:[#allocation2 + $0x51] sm:$0xff] }
 0xa60   : > { %14643 = vmatprep.mubr.msk.bf16.mxu1 %vm9136_vm5, %v17785_v48  ;;  %v11102_v48 = vld [vmem:[#allocation2 + $0x69] sm:$0xff] }
 0xa67   : > { %14644 = vmatmul.mubr.msk.bf16.gmra.mrb[44].mxu1 %vm9136_vm5, %v17791_v2  ;;  %v11099_v2 = vld [vmem:[#allocation2 + $0x49] sm:$0xff] }
 0xa68   : > { %14647 = vmatprep.mubr.msk.bf16.mxu1 %vm9136_vm5, %v17793_v60  ;;  %v11130_v60 = vpack.c.bf16 %v11100_v54, %v11099_v2 }
 0xa6f   : > { %14648 = vmatmul.mubr.msk.bf16.gmra.mrb[48].mxu1 %vm9136_vm5, %v17799_v20  ;;  %v11101_v20 = vld [vmem:[#allocation2 + $0x61] sm:$0xff] }
 0xa70   : > { %14651 = vmatprep.mubr.msk.bf16.mxu1 %vm9136_vm5, %v17801_v38  ;;  %v15866_v38 = vld [vmem:[%s18211_s1 + $0x468] sm:$0xff]  }
 0xa77   : > { %14652 = vmatmul.mubr.msk.bf16.gmra.mrb[52].mxu1 %vm9136_vm5, %v17807_v17  ;;  %v11131_v17 = vpack.c.bf16 %v11102_v48, %v11101_v20 }
 0xa78   : > { %14655 = vmatprep.mubr.msk.bf16.mxu1 %vm9136_vm5, %v17809_v9  ;;  %v11104_v9 = vld [vmem:[#allocation2 + $0x81] sm:$0xff] }
 0xa79   : > { %v11132_v5 = vpack.c.bf16 %v11104_v9, %v11103_v4 }
 0xa7f   : > { %14656 = vmatmul.mubr.msk.bf16.gmra.mrb[56].mxu1 %vm9136_vm5, %v17815_v26  ;;  %v11106_v26 = vld [vmem:[#allocation2 + $0x99] sm:$0xff] }
 0xa80   : > { %14659 = vmatprep.mubr.msk.bf16.mxu1 %vm9136_vm5, %v17923_v0  ;;  %v11133_v27 = vpack.c.bf16 %v11106_v26, %v11105_v57  ;;  %v11138_v0 = vpack.c.bf16 %v11116_v10, %v11115_v8 }
 0xa87   : > { %14660 = vmatmul.mubr.msk.bf16.gmra.mrb[60].mxu1 %vm9136_vm5, %v10838_v56 }
 0xa88   : > { %14667 = vmatprep.mubr.msk.bf16.mxu1 %vm9136_vm5, %v11129_v32 }
 0xa8f   : > { %14668 = vmatmul.mubr.msk.bf16.vlgmr.msra.gmra.mrb[32].mxu1 %vm9136_vm5, %v11130_v60 }
 0xa90   : > { %14700 = vmatpush3.bf16.msra.mxu1 %v15865_v7  ;;  %14671 = vmatprep.mubr.msk.bf16.mxu1 %vm9136_vm5, %v11131_v17 }
 0xa91   : > { %14701 = vmatprep.subr.bf16.mxu1 %v15866_v38 }
 0xa94   : > { %14702 = vmatpush3.bf16.msra.mxu1 %v15866_v38 }
 0xa97   : > { %14672 = vmatmul.mubr.msk.bf16.gmra.mrb[36].mxu1 %vm9136_vm5, %v11132_v5 }
 0xa98   : > { %14675 = vmatprep.mubr.msk.bf16.mxu1 %vm9136_vm5, %v11133_v27 }
 0xa9f   : > { %14676 = vmatmul.mubr.msk.bf16.gmra.mrb[40].mxu1 %vm9136_vm5, %v11134_v49 }
 0xaa0   : > { %14679 = vmatprep.mubr.msk.bf16.mxu1 %vm9136_vm5, %v11135_v13 }
 0xaa7   : > { %14680 = vmatmul.mubr.msk.bf16.gmra.mrb[44].mxu1 %vm9136_vm5, %v11136_v42 }
 0xaa8   : > { %14683 = vmatprep.mubr.msk.bf16.mxu1 %vm9136_vm5, %v11137_v41 }
 0xaaf   : > { %14684 = vmatmul.mubr.msk.bf16.gmra.mrb[48].mxu1 %vm9136_vm5, %v11138_v0 }
 0xab0   : > { %14687 = vmatprep.mubr.msk.bf16.mxu1 %vm9136_vm5, %v17723_v21  ;;  %v11433_v21 = vld [vmem:[#allocation2 + $0x19a] sm:$0xff] }
 0xab7   : > { %14688 = vmatmul.mubr.msk.bf16.gmra.mrb[52].mxu1 %vm9136_vm5, %v17736_v24  ;;  %v11434_v24 = vld [vmem:[#allocation2 + $0x1a2] sm:$0xff] }
 0xab8   : > { %14691 = vmatprep.mubr.msk.bf16.mxu1 %vm9136_vm5, %v17738_v43  ;;  %v11450_v43 = vpack.c.bf16 %v11434_v24, %v11433_v21 }
 0xabf   : > { %14692 = vmatmul.mubr.msk.bf16.gmra.mrb[56].mxu1 %vm9136_vm5, %v17744_v16  ;;  %v18102_v16 = vld [vmem:[%s18212_s2 + $0x3] ss:$0 sm:$0xff] }
 0xac0   : > { %14695 = vmatprep.mubr.msk.bf16.mxu1 %vm9136_vm5, %v17963_v61 }
 0xac7   : > { %14696 = vmatmul.mubr.msk.bf16.gmra.mrb[60].mxu1 %vm9136_vm5, %v11144_v52 }
 0xac8   : > { %14703 = vmatprep.mubr.msk.bf16.mxu1 %vm9136_vm5, %v17825_v1 }
 0xacf   : > { %14704 = vmatmul.mubr.msk.bf16.vlgmr.msra.gmra.mrb[32].mxu1 %vm9136_vm5, %v17835_v14 }
 0xad0   : > { %14707 = vmatprep.mubr.msk.bf16.mxu1 %vm9136_vm5, %v17837_v28 }
 0xad7   : > { %14708 = vmatmul.mubr.msk.bf16.gmra.mrb[36].mxu1 %vm9136_vm5, %v17843_v53 }
 0xad8   : > { %14711 = vmatprep.mubr.msk.bf16.mxu1 %vm9136_vm5, %v17845_v19 }
 0xadf   : > { %14712 = vmatmul.mubr.msk.bf16.gmra.mrb[40].mxu1 %vm9136_vm5, %v17851_v59 }
 0xae0   : > { %14715 = vmatprep.mubr.msk.bf16.mxu1 %vm9136_vm5, %v17853_v50 }
 0xae7   : > { %14716 = vmatmul.mubr.msk.bf16.gmra.mrb[44].mxu1 %vm9136_vm5, %v17859_v63 }
 0xae8   : > { %14719 = vmatprep.mubr.msk.bf16.mxu1 %vm9136_vm5, %v17861_v3 }
 0xaef   : > { %14720 = vmatmul.mubr.msk.bf16.gmra.mrb[48].mxu1 %vm9136_vm5, %v17867_v22 }
 0xaf0   : > { %14723 = vmatprep.mubr.msk.bf16.mxu1 %vm9136_vm5, %v17869_v47 }
 0xaf7   : > { %14724 = vmatmul.mubr.msk.bf16.gmra.mrb[52].mxu1 %vm9136_vm5, %v17875_v36 }
 0xaf8   : > { %14727 = vmatprep.mubr.msk.bf16.mxu1 %vm9136_vm5, %v17877_v37 }
 0xaff   : > { %14728 = vmatmul.mubr.msk.bf16.gmra.mrb[56].mxu1 %vm9136_vm5, %v17883_v39 }
 0xb00   : > { %14731 = vmatprep.mubr.msk.bf16.mxu1 %vm9136_vm5, %v18003_v33 }
 0xb07   : > { %14732 = vmatmul.mubr.msk.bf16.gmra.mrb[60].mxu1 %vm9136_vm5, %v11450_v43 }
 0xba2   : > { %v14705_v1 = vpop.f32.mrb[32].mxu1 }
 0xba3   : > { %v11719_v14 = vadd.f32 %v14705_v1, %v18102_v16  ;;  %v11550_v28 = vpop.f32.mrb[33].mxu1 }
 0xba4   : > { %v11717_v53 = vadd.f32 %v18102_v16, %v11550_v28  ;;  %v14706_v19 = vpop.f32.mrb[34].mxu1 }
 0xba5   : > { %11751 = vst.msk [vmem:[%s18109_s7 + $0x10] sm:$0xff] %vm172_vm1, %v11719_v14  ;;  %v11720_v59 = vadd.f32 %v14706_v19, %v18102_v16  ;;  %v11553_v50 = vpop.f32.mrb[35].mxu1 }
 0xba6   : > { %11749 = vst.msk [vmem:[%s18109_s7] sm:$0xff] %vm172_vm1, %v11717_v53  ;;  %v11718_v63 = vadd.f32 %v18102_v16, %v11553_v50 }
 0xba7   : > { %11752 = vst.msk [vmem:[%s18109_s7 + $0x18] sm:$0xff] %vm172_vm1, %v11720_v59 }
 0xba8   : > { %11750 = vst.msk [vmem:[%s18109_s7 + $0x8] sm:$0xff] %vm172_vm1, %v11718_v63 }
 0xbaa   : > { %v14709_v3 = vpop.f32.mrb[36].mxu1 }
 0xbab   : > { %v11723_v22 = vadd.f32 %v14709_v3, %v18102_v16  ;;  %v11566_v47 = vpop.f32.mrb[37].mxu1 }
 0xbac   : > { %v11721_v36 = vadd.f32 %v18102_v16, %v11566_v47  ;;  %v14710_v37 = vpop.f32.mrb[38].mxu1 }
 0xbad   : > { %11755 = vst.msk [vmem:[%s18109_s7 + $0x30] sm:$0xff] %vm172_vm1, %v11723_v22  ;;  %v11724_v39 = vadd.f32 %v14710_v37, %v18102_v16  ;;  %v11569_v6 = vpop.f32.mrb[39].mxu1 }
 0xbae   : > { %11753 = vst.msk [vmem:[%s18109_s7 + $0x20] sm:$0xff] %vm172_vm1, %v11721_v36  ;;  %v11722_v61 = vadd.f32 %v18102_v16, %v11569_v6 }
 0xbaf   : > { %11756 = vst.msk [vmem:[%s18109_s7 + $0x38] sm:$0xff] %vm172_vm1, %v11724_v39 }
 0xbb0   : > { %11754 = vst.msk [vmem:[%s18109_s7 + $0x28] sm:$0xff] %vm172_vm1, %v11722_v61 }
 0xbb2   : > { %v14713_v40 = vpop.f32.mrb[40].mxu1 }
 0xbb3   : > { %v11727_v11 = vadd.f32 %v14713_v40, %v18102_v16  ;;  %v11582_v25 = vpop.f32.mrb[41].mxu1 }
 0xbb4   : > { %v11725_v51 = vadd.f32 %v18102_v16, %v11582_v25  ;;  %v14714_v33 = vpop.f32.mrb[42].mxu1 }
 0xbb5   : > { %11759 = vst.msk [vmem:[%s18109_s7 + $0x50] sm:$0xff] %vm172_vm1, %v11727_v11  ;;  %v11728_v31 = vadd.f32 %v14714_v33, %v18102_v16  ;;  %v11585_v7 = vpop.f32.mrb[43].mxu1 }
 0xbb6   : > { %11757 = vst.msk [vmem:[%s18109_s7 + $0x40] sm:$0xff] %vm172_vm1, %v11725_v51  ;;  %v11726_v58 = vadd.f32 %v18102_v16, %v11585_v7 }
 0xbb7   : > { %11760 = vst.msk [vmem:[%s18109_s7 + $0x58] sm:$0xff] %vm172_vm1, %v11728_v31 }
 0xbb8   : > { %11758 = vst.msk [vmem:[%s18109_s7 + $0x48] sm:$0xff] %vm172_vm1, %v11726_v58 }
 0xbba   : > { %v14717_v55 = vpop.f32.mrb[44].mxu1 }
 0xbbb   : > { %v11731_v56 = vadd.f32 %v14717_v55, %v18102_v16  ;;  %v11598_v15 = vpop.f32.mrb[45].mxu1 }
 0xbbc   : > { %v11729_v62 = vadd.f32 %v18102_v16, %v11598_v15  ;;  %v14718_v32 = vpop.f32.mrb[46].mxu1 }
 0xbbd   : > { %11763 = vst.msk [vmem:[%s18109_s7 + $0x70] sm:$0xff] %vm172_vm1, %v11731_v56  ;;  %v11732_v54 = vadd.f32 %v14718_v32, %v18102_v16  ;;  %v11601_v48 = vpop.f32.mrb[47].mxu1 }
 0xbbe   : > { %11761 = vst.msk [vmem:[%s18109_s7 + $0x60] sm:$0xff] %vm172_vm1, %v11729_v62  ;;  %v11730_v2 = vadd.f32 %v18102_v16, %v11601_v48 }
 0xbbf   : > { %11764 = vst.msk [vmem:[%s18109_s7 + $0x78] sm:$0xff] %vm172_vm1, %v11732_v54 }
 0xbc0   : > { %11762 = vst.msk [vmem:[%s18109_s7 + $0x68] sm:$0xff] %vm172_vm1, %v11730_v2 }
 0xbc2   : > { %v14721_v60 = vpop.f32.mrb[48].mxu1 }
 0xbc3   : > { %v11735_v20 = vadd.f32 %v14721_v60, %v18102_v16  ;;  %v11614_v38 = vpop.f32.mrb[49].mxu1 }
 0xbc4   : > { %v11733_v17 = vadd.f32 %v18102_v16, %v11614_v38  ;;  %v14722_v9 = vpop.f32.mrb[50].mxu1 }
 0xbc5   : > { %11767 = vst.msk [vmem:[%s18109_s7 + $0x90] sm:$0xff] %vm172_vm1, %v11735_v20  ;;  %v11736_v26 = vadd.f32 %v14722_v9, %v18102_v16  ;;  %v11617_v4 = vpop.f32.mrb[51].mxu1 }
 0xbc6   : > { %11765 = vst.msk [vmem:[%s18109_s7 + $0x80] sm:$0xff] %vm172_vm1, %v11733_v17  ;;  %v11734_v5 = vadd.f32 %v18102_v16, %v11617_v4 }
 0xbc7   : > { %11768 = vst.msk [vmem:[%s18109_s7 + $0x98] sm:$0xff] %vm172_vm1, %v11736_v26 }
 0xbc8   : > { %11766 = vst.msk [vmem:[%s18109_s7 + $0x88] sm:$0xff] %vm172_vm1, %v11734_v5 }
 0xbca   : > { %v14725_v57 = vpop.f32.mrb[52].mxu1 }
 0xbcb   : > { %v11739_v27 = vadd.f32 %v14725_v57, %v18102_v16  ;;  %v11630_v44 = vpop.f32.mrb[53].mxu1 }
 0xbcc   : > { %v11737_v12 = vadd.f32 %v18102_v16, %v11630_v44  ;;  %v14726_v30 = vpop.f32.mrb[54].mxu1 }
 0xbcd   : > { %11771 = vst.msk [vmem:[%s18109_s7 + $0xb0] sm:$0xff] %vm172_vm1, %v11739_v27  ;;  %v11740_v49 = vadd.f32 %v14726_v30, %v18102_v16  ;;  %v11633_v45 = vpop.f32.mrb[55].mxu1 }
 0xbce   : > { %11769 = vst.msk [vmem:[%s18109_s7 + $0xa0] sm:$0xff] %vm172_vm1, %v11737_v12  ;;  %v11738_v13 = vadd.f32 %v18102_v16, %v11633_v45 }
 0xbcf   : > { %11772 = vst.msk [vmem:[%s18109_s7 + $0xb8] sm:$0xff] %vm172_vm1, %v11740_v49 }
 0xbd0   : > { %11770 = vst.msk [vmem:[%s18109_s7 + $0xa8] sm:$0xff] %vm172_vm1, %v11738_v13 }
 0xbd2   : > { %v14729_v18 = vpop.f32.mrb[56].mxu1 }
 0xbd3   : > { %v11743_v23 = vadd.f32 %v14729_v18, %v18102_v16  ;;  %v11646_v35 = vpop.f32.mrb[57].mxu1 }
 0xbd4   : > { %v11741_v42 = vadd.f32 %v18102_v16, %v11646_v35  ;;  %v14730_v34 = vpop.f32.mrb[58].mxu1 }
 0xbd5   : > { %11775 = vst.msk [vmem:[%s18109_s7 + $0xd0] sm:$0xff] %vm172_vm1, %v11743_v23  ;;  %v11744_v41 = vadd.f32 %v14730_v34, %v18102_v16  ;;  %v11649_v10 = vpop.f32.mrb[59].mxu1 }
 0xbd6   : > { %11773 = vst.msk [vmem:[%s18109_s7 + $0xc0] sm:$0xff] %vm172_vm1, %v11741_v42  ;;  %v11742_v8 = vadd.f32 %v18102_v16, %v11649_v10 }
 0xbd7   : > { %11776 = vst.msk [vmem:[%s18109_s7 + $0xd8] sm:$0xff] %vm172_vm1, %v11744_v41 }
 0xbd8   : > { %11774 = vst.msk [vmem:[%s18109_s7 + $0xc8] sm:$0xff] %vm172_vm1, %v11742_v8 }
 0xbda   : > { %v14733_v0 = vpop.f32.mrb[60].mxu1 }
 0xbdb   : > { %v11747_v29 = vadd.f32 %v14733_v0, %v18102_v16  ;;  %v11662_v46 = vpop.f32.mrb[61].mxu1 }
 0xbdc   : > { %v11745_v52 = vadd.f32 %v18102_v16, %v11662_v46  ;;  %v14734_v21 = vpop.f32.mrb[62].mxu1 }
 0xbdd   : > { %11779 = vst.msk [vmem:[%s18109_s7 + $0xf0] sm:$0xff] %vm172_vm1, %v11747_v29  ;;  %v11748_v24 = vadd.f32 %v14734_v21, %v18102_v16  ;;  %v11665_v43 = vpop.f32.mrb[63].mxu1 }
 0xbde   : > { %11777 = vst.msk [vmem:[%s18109_s7 + $0xe0] sm:$0xff] %vm172_vm1, %v11745_v52  ;;  %v11746_v1 = vadd.f32 %v18102_v16, %v11665_v43 }
 0xbdf   : > { %11780 = vst.msk [vmem:[%s18109_s7 + $0xf8] sm:$0xff] %vm172_vm1, %v11748_v24 }
 0xbe0   : > { %11778 = vst.msk [vmem:[%s18109_s7 + $0xe8] sm:$0xff] %vm172_vm1, %v11746_v1 }
 0xbe1 PF: > { %s13_s12 = sadd.s32 1, %s15873_s12  }
 0xbe2   : > { %p10_p4 = scmp.ge.s32.totalorder %s13_s12, 4  }
 0xbe4   :  { %12 = sbr.rel (!%p10_p4) target bundleno = 1 (0x1), region = 103 }

</bundles_post_ra>
